<compile_context>
chip_gen: v5e
topology: v5e:2x2
jax: 0.10.0
libtpu: 0.0.40
codegen_flags: <defaults>
</compile_context>

<pallas_src>
import math
import jax
import jax.numpy as jnp
from jax import lax
from jax.experimental import pallas as pl
from jax.experimental.pallas import tpu as pltpu


def make_gru_attn_kernel(T, D_in, H, L, NH, Bt):
    hd = H // NH
    scale = 1.0 / math.sqrt(hd)
    inv_nh = 1.0 / NH
    f32 = jnp.float32

    def kernel(*refs):
        idx = 0
        x_ref = refs[idx]; idx += 1            # [T, Bt, D_in] (time-major batch tile)
        h0_ref = refs[idx]; idx += 1           # [L, Bt, H]
        gru = []
        for _ in range(L):
            # wih [3, D_l, H], whh [3, H, H], bih [3, 1, H], bhh [3, 1, H]
            gru.append(refs[idx:idx + 4]); idx += 4
        (wq_ref, wk_ref, wv_ref, bq_ref, bk_ref, bv_ref,
         wo_ref, bo_ref, hm_ref) = refs[idx:idx + 9]; idx += 9
        ctx_ref = refs[idx]; idx += 1          # out: [Bt, H]
        aw_ref = refs[idx]; idx += 1           # out: [Bt, T]
        gir_ref, giz_ref, gin_ref, hseq_ref = refs[idx:idx + 4]   # VMEM [T, Bt, H] each
        gi_refs = (gir_ref, giz_ref, gin_ref)

        # ----------------- multi-layer GRU (PyTorch gate order r, z, n) ------
        h = None
        for l in range(L):
            wih_ref, whh_ref, bih_ref, bhh_ref = gru[l]
            if l == 0:
                xin2 = x_ref[...].reshape(T * Bt, D_in)      # [T*Bt, D_in]
            else:
                xin2 = hseq_ref[...].reshape(T * Bt, H)      # previous layer output

            # Hoisted input projection: one [T*Bt, D_l] x [D_l, H] matmul per gate,
            # stored time-major so the recurrence reads one dense [Bt, H] row / step.
            for g in range(3):
                gi = jnp.dot(xin2, wih_ref[g],
                             preferred_element_type=f32) + bih_ref[g]
                gi_refs[g][...] = gi.reshape(T, Bt, H)

            # Hoist recurrent weights / biases out of the serial time loop.
            whh_r, whh_z, whh_n = whh_ref[0], whh_ref[1], whh_ref[2]
            bhh_r, bhh_z, bhh_n = bhh_ref[0], bhh_ref[1], bhh_ref[2]

            def step(t, h):
                gh_r = jnp.dot(h, whh_r, preferred_element_type=f32) + bhh_r
                gh_z = jnp.dot(h, whh_z, preferred_element_type=f32) + bhh_z
                gh_n = jnp.dot(h, whh_n, preferred_element_type=f32) + bhh_n
                r = jax.nn.sigmoid(gir_ref[t] + gh_r)
                z = jax.nn.sigmoid(giz_ref[t] + gh_z)
                n = jnp.tanh(gin_ref[t] + r * gh_n)
                h_new = (1.0 - z) * n + z * h
                hseq_ref[t] = h_new                          # dense [Bt, H] row store
                return h_new

            # Short fixed trip count -> full unroll; use unroll=4..8 if T grows.
            h = lax.fori_loop(0, T, step, h0_ref[l], unroll=True)

        # ----------------- multi-head QKV attention (batch + heads batched) --
        # One transpose to batch-major, off the serial critical path.
        seq_bm = jnp.transpose(hseq_ref[...], (1, 0, 2))     # [Bt, T, H]
        seq2 = seq_bm.reshape(Bt * T, H)

        q = jnp.dot(h, wq_ref[...], preferred_element_type=f32) + bq_ref[...]   # [Bt, H]
        k = (jnp.dot(seq2, wk_ref[...], preferred_element_type=f32)
             + bk_ref[...]).reshape(Bt, T, H)
        v = (jnp.dot(seq2, wv_ref[...], preferred_element_type=f32)
             + bv_ref[...]).reshape(Bt, T, H)

        hm = hm_ref[...]                                      # [NH, H] head membership mask
        qm = q[:, None, :] * hm[None, :, :] * scale           # [Bt, NH, H]
        s = jnp.einsum('bnh,bth->bnt', qm, k,
                       preferred_element_type=f32)            # [Bt, NH, T]
        m = jnp.max(s, axis=-1, keepdims=True)
        e = jnp.exp(s - m)
        w = e / jnp.sum(e, axis=-1, keepdims=True)            # exact softmax (parity)

        ctxh = jnp.einsum('bnt,bth->bnh', w, v,
                          preferred_element_type=f32)          # [Bt, NH, H]
        ctx = jnp.sum(ctxh * hm[None, :, :], axis=1)           # [Bt, H] (head concat)
        out = jnp.dot(ctx, wo_ref[...], preferred_element_type=f32) + bo_ref[...]

        ctx_ref[...] = out                                     # [Bt, H]
        aw_ref[...] = jnp.sum(w, axis=1) * inv_nh              # [Bt, T] head-averaged

    return kernel


def _full_spec(a):
    """Whole-array VMEM block, resident across the batch-tile grid."""
    nd = a.ndim
    return pl.BlockSpec(a.shape, lambda i, _nd=nd: (0,) * _nd)


def prepare_params(gru_weights, attn_params, num_heads):
    """One-time weight prep: per-gate split along a leading axis (no lane-offset
    gate slicing in the kernel), transposes, bias reshapes, head-mask build.

    gru_weights: list of (W_ih [3H,D_l], W_hh [3H,H], b_ih [3H], b_hh [3H]).
    attn_params: (in_proj_w [3H,H], in_proj_b [3H], out_proj_w [H,H], out_proj_b [H]).
    """
    gru_t = []
    for (w_ih, w_hh, b_ih, b_hh) in gru_weights:
        w_ih = jnp.asarray(w_ih); w_hh = jnp.asarray(w_hh)
        b_ih = jnp.asarray(b_ih); b_hh = jnp.asarray(b_hh)
        H = w_hh.shape[1]
        wih = jnp.stack([w_ih[g * H:(g + 1) * H].T for g in range(3)])          # [3, D_l, H]
        whh = jnp.stack([w_hh[g * H:(g + 1) * H].T for g in range(3)])          # [3, H, H]
        bih = jnp.stack([b_ih[g * H:(g + 1) * H].reshape(1, H) for g in range(3)])  # [3, 1, H]
        bhh = jnp.stack([b_hh[g * H:(g + 1) * H].reshape(1, H) for g in range(3)])  # [3, 1, H]
        gru_t.append((wih, whh, bih, bhh))

    in_proj_w, in_proj_b, out_proj_w, out_proj_b = attn_params
    H = out_proj_w.shape[0]
    wq, wk, wv = in_proj_w[:H].T, in_proj_w[H:2 * H].T, in_proj_w[2 * H:].T
    bq = in_proj_b[:H].reshape(1, H)
    bk = in_proj_b[H:2 * H].reshape(1, H)
    bv = in_proj_b[2 * H:].reshape(1, H)
    attn_t = (wq, wk, wv, bq, bk, bv, out_proj_w.T, out_proj_b.reshape(1, H))

    hd = H // num_heads
    head_ids = jnp.arange(H, dtype=jnp.int32) // hd
    head_mask = (head_ids[None, :] ==
                 jnp.arange(num_heads, dtype=jnp.int32)[:, None]).astype(jnp.float32)
    return gru_t, attn_t, head_mask


def gru_with_qkv_attention(x, h0, gru_params_t, attn_params_t, head_mask):
    """x: [B, T, D_in] f32; h0: [L, B, H] f32 (PyTorch layout).
    gru_params_t / attn_params_t / head_mask: outputs of prepare_params()."""
    B, T, D_in = x.shape
    L, _, H = h0.shape
    NH = head_mask.shape[0]

    # Batch folded into the matmul M dim; grid only over batch tiles (megacore).
    b_tile = min(B, 128)
    # TODO(synk): pad B to a multiple of b_tile for non-divisible batch sizes.
    assert B % b_tile == 0
    n_tiles = B // b_tile

    # Time-major input so the recurrence reads dense [B_tile, H] rows per step.
    x_tm = jnp.transpose(x, (1, 0, 2))                       # [T, B, D_in]

    args = [x_tm, h0]
    in_specs = [
        pl.BlockSpec((T, b_tile, D_in), lambda i: (0, i, 0)),
        pl.BlockSpec((L, b_tile, H), lambda i: (0, i, 0)),
    ]
    for p in gru_params_t:
        args += list(p)
        in_specs += [_full_spec(a) for a in p]
    args += list(attn_params_t) + [head_mask]
    in_specs += [_full_spec(a) for a in attn_params_t] + [_full_spec(head_mask)]

    kernel = make_gru_attn_kernel(T, D_in, H, L, NH, b_tile)

    ctx, attn_w = pl.pallas_call(
        kernel,
        grid=(n_tiles,),
        out_shape=(jax.ShapeDtypeStruct((B, H), jnp.float32),
                   jax.ShapeDtypeStruct((B, T), jnp.float32)),
        in_specs=in_specs,
        out_specs=(pl.BlockSpec((b_tile, H), lambda i: (i, 0)),
                   pl.BlockSpec((b_tile, T), lambda i: (i, 0))),
        scratch_shapes=[pltpu.VMEM((T, b_tile, H), jnp.float32)] * 4,  # gi_r, gi_z, gi_n, hseq
        compiler_params=pltpu.CompilerParams(
            dimension_semantics=("parallel",)),
    )(*args)
    return ctx, attn_w.reshape(B, 1, T)


def init_params(key, input_size, hidden_size, num_layers):
    """Deterministic synthetic init (shapes match nn.GRU / nn.MultiheadAttention)."""
    k = 1.0 / math.sqrt(hidden_size)
    gru_weights = []
    keys = jax.random.split(key, num_layers * 4 + 4)
    ki = 0
    for l in range(num_layers):
        d_l = input_size if l == 0 else hidden_size
        w_ih = jax.random.uniform(keys[ki], (3 * hidden_size, d_l), jnp.float32, -k, k); ki += 1
        w_hh = jax.random.uniform(keys[ki], (3 * hidden_size, hidden_size), jnp.float32, -k, k); ki += 1
        b_ih = jax.random.uniform(keys[ki], (3 * hidden_size,), jnp.float32, -k, k); ki += 1
        b_hh = jax.random.uniform(keys[ki], (3 * hidden_size,), jnp.float32, -k, k); ki += 1
        gru_weights.append((w_ih, w_hh, b_ih, b_hh))

    in_proj_w = jax.random.uniform(keys[ki], (3 * hidden_size, hidden_size), jnp.float32, -k, k); ki += 1
    in_proj_b = jnp.zeros((3 * hidden_size,), jnp.float32)
    out_proj_w = jax.random.uniform(keys[ki], (hidden_size, hidden_size), jnp.float32, -k, k); ki += 1
    out_proj_b = jnp.zeros((hidden_size,), jnp.float32)
    return gru_weights, (in_proj_w, in_proj_b, out_proj_w, out_proj_b)


if __name__ == "__main__":
    B, T = 2, 8
    input_size, hidden_size, num_layers, num_heads = 16, 32, 2, 4

    key = jax.random.PRNGKey(0)
    kx, kh, kp = jax.random.split(key, 3)
    x = jax.random.normal(kx, (B, T, input_size), jnp.float32)
    h0 = jax.random.normal(kh, (num_layers, B, hidden_size), jnp.float32)   # [L, B, H]
    gru_w, attn_p = init_params(kp, input_size, hidden_size, num_layers)

    # One-time parameter prep (out of the per-call path).
    gru_t, attn_t, head_mask = prepare_params(gru_w, attn_p, num_heads)
    jax.block_until_ready((gru_t, attn_t, head_mask))

    context, attention_weights = gru_with_qkv_attention(x, h0, gru_t, attn_t, head_mask)
    jax.block_until_ready((context, attention_weights))

    assert context.shape == (B, hidden_size)
    assert attention_weights.shape == (B, 1, T)
    print("KERNEL_OK")
</pallas_src>

<mosaic_0001>
module attributes {stable_mosaic.version = 11 : i64} {
  func.func @kernel(%arg0: i32, %arg1: memref<8x2x16xf32, #tpu.memory_space<vmem>>, %arg2: memref<2x2x32xf32, #tpu.memory_space<vmem>>, %arg3: memref<3x16x32xf32, #tpu.memory_space<vmem>>, %arg4: memref<3x32x32xf32, #tpu.memory_space<vmem>>, %arg5: memref<3x1x32xf32, #tpu.memory_space<vmem>>, %arg6: memref<3x1x32xf32, #tpu.memory_space<vmem>>, %arg7: memref<3x32x32xf32, #tpu.memory_space<vmem>>, %arg8: memref<3x32x32xf32, #tpu.memory_space<vmem>>, %arg9: memref<3x1x32xf32, #tpu.memory_space<vmem>>, %arg10: memref<3x1x32xf32, #tpu.memory_space<vmem>>, %arg11: memref<32x32xf32, #tpu.memory_space<vmem>>, %arg12: memref<32x32xf32, #tpu.memory_space<vmem>>, %arg13: memref<32x32xf32, #tpu.memory_space<vmem>>, %arg14: memref<1x32xf32, #tpu.memory_space<vmem>>, %arg15: memref<1x32xf32, #tpu.memory_space<vmem>>, %arg16: memref<1x32xf32, #tpu.memory_space<vmem>>, %arg17: memref<32x32xf32, #tpu.memory_space<vmem>>, %arg18: memref<1x32xf32, #tpu.memory_space<vmem>>, %arg19: memref<4x32xf32, #tpu.memory_space<vmem>>, %arg20: memref<2x32xf32, #tpu.memory_space<vmem>>, %arg21: memref<2x8xf32, #tpu.memory_space<vmem>>, %arg22: memref<8x2x32xf32, #tpu.memory_space<vmem>>, %arg23: memref<8x2x32xf32, #tpu.memory_space<vmem>>, %arg24: memref<8x2x32xf32, #tpu.memory_space<vmem>>, %arg25: memref<8x2x32xf32, #tpu.memory_space<vmem>>) attributes {dimension_semantics = [#tpu.dimension_semantics<parallel>], iteration_bounds = array<i64: 1>, scalar_prefetch = 0 : i64, scratch_operands = 4 : i64, tpu.core_type = #tpu.core_type<tc>, window_params = [{transform_indices = @transform_0, window_bounds = array<i64: 8, 2, 16>}, {transform_indices = @transform_1, window_bounds = array<i64: 2, 2, 32>}, {pipeline_mode = #tpu.pipeline_mode<synchronous>, transform_indices = @transform_2, window_bounds = array<i64: 3, 16, 32>}, {pipeline_mode = #tpu.pipeline_mode<synchronous>, transform_indices = @transform_3, window_bounds = array<i64: 3, 32, 32>}, {pipeline_mode = #tpu.pipeline_mode<synchronous>, transform_indices = @transform_4, window_bounds = array<i64: 3, 1, 32>}, {pipeline_mode = #tpu.pipeline_mode<synchronous>, transform_indices = @transform_5, window_bounds = array<i64: 3, 1, 32>}, {pipeline_mode = #tpu.pipeline_mode<synchronous>, transform_indices = @transform_6, window_bounds = array<i64: 3, 32, 32>}, {pipeline_mode = #tpu.pipeline_mode<synchronous>, transform_indices = @transform_7, window_bounds = array<i64: 3, 32, 32>}, {pipeline_mode = #tpu.pipeline_mode<synchronous>, transform_indices = @transform_8, window_bounds = array<i64: 3, 1, 32>}, {pipeline_mode = #tpu.pipeline_mode<synchronous>, transform_indices = @transform_9, window_bounds = array<i64: 3, 1, 32>}, {pipeline_mode = #tpu.pipeline_mode<synchronous>, transform_indices = @transform_10, window_bounds = array<i64: 32, 32>}, {pipeline_mode = #tpu.pipeline_mode<synchronous>, transform_indices = @transform_11, window_bounds = array<i64: 32, 32>}, {pipeline_mode = #tpu.pipeline_mode<synchronous>, transform_indices = @transform_12, window_bounds = array<i64: 32, 32>}, {pipeline_mode = #tpu.pipeline_mode<synchronous>, transform_indices = @transform_13, window_bounds = array<i64: 1, 32>}, {pipeline_mode = #tpu.pipeline_mode<synchronous>, transform_indices = @transform_14, window_bounds = array<i64: 1, 32>}, {pipeline_mode = #tpu.pipeline_mode<synchronous>, transform_indices = @transform_15, window_bounds = array<i64: 1, 32>}, {pipeline_mode = #tpu.pipeline_mode<synchronous>, transform_indices = @transform_16, window_bounds = array<i64: 32, 32>}, {pipeline_mode = #tpu.pipeline_mode<synchronous>, transform_indices = @transform_17, window_bounds = array<i64: 1, 32>}, {pipeline_mode = #tpu.pipeline_mode<synchronous>, transform_indices = @transform_18, window_bounds = array<i64: 4, 32>}, {transform_indices = @transform_19, window_bounds = array<i64: 2, 32>}, {transform_indices = @transform_20, window_bounds = array<i64: 2, 8>}]} {
    %c0 = arith.constant 0 : index
    %c0_0 = arith.constant 0 : index
    %c0_1 = arith.constant 0 : index
    %0 = vector.load %arg1[%c0, %c0_0, %c0_1] : memref<8x2x16xf32, #tpu.memory_space<vmem>>, vector<8x2x16xf32>
    %1 = vector.shape_cast %0 : vector<8x2x16xf32> to vector<16x16xf32>
    %c0_2 = arith.constant 0 : index
    %c0_3 = arith.constant 0 : index
    %c0_4 = arith.constant 0 : index
    %2 = vector.load %arg3[%c0_2, %c0_3, %c0_4] : memref<3x16x32xf32, #tpu.memory_space<vmem>>, vector<1x16x32xf32>
    %3 = vector.shape_cast %2 : vector<1x16x32xf32> to vector<16x32xf32>
    %cst = arith.constant dense<0.000000e+00> : vector<16x32xf32>
    %4 = tpu.matmul %1, %3, %cst {dimension_numbers = #tpu.dot_dimension_numbers<[1], [0], [0], [1], [0, 0, 1, 1], [], []>} : vector<16x16xf32>, vector<16x32xf32>, vector<16x32xf32> -> vector<16x32xf32>
    %c0_5 = arith.constant 0 : index
    %c0_6 = arith.constant 0 : index
    %c0_7 = arith.constant 0 : index
    %5 = vector.load %arg5[%c0_5, %c0_6, %c0_7] : memref<3x1x32xf32, #tpu.memory_space<vmem>>, vector<1x1x32xf32>
    %6 = vector.shape_cast %5 : vector<1x1x32xf32> to vector<1x32xf32>
    %7 = vector.broadcast %6 : vector<1x32xf32> to vector<16x32xf32>
    %8 = arith.addf %4, %7 : vector<16x32xf32>
    %9 = vector.shape_cast %8 : vector<16x32xf32> to vector<8x2x32xf32>
    %c0_8 = arith.constant 0 : index
    %c0_9 = arith.constant 0 : index
    %c0_10 = arith.constant 0 : index
    %10 = vector.load %arg22[%c0_8, %c0_9, %c0_10] : memref<8x2x32xf32, #tpu.memory_space<vmem>>, vector<8x2x32xf32>
    tpu.vector_store %arg22[%c0_8, %c0_9, %c0_10], %9 {strides = array<i32>} : memref<8x2x32xf32, #tpu.memory_space<vmem>>, vector<8x2x32xf32>,
    %c1 = arith.constant 1 : index
    %c0_11 = arith.constant 0 : index
    %c0_12 = arith.constant 0 : index
    %11 = vector.load %arg3[%c1, %c0_11, %c0_12] : memref<3x16x32xf32, #tpu.memory_space<vmem>>, vector<1x16x32xf32>
    %12 = vector.shape_cast %11 : vector<1x16x32xf32> to vector<16x32xf32>
    %cst_13 = arith.constant dense<0.000000e+00> : vector<16x32xf32>
    %13 = tpu.matmul %1, %12, %cst_13 {dimension_numbers = #tpu.dot_dimension_numbers<[1], [0], [0], [1], [0, 0, 1, 1], [], []>} : vector<16x16xf32>, vector<16x32xf32>, vector<16x32xf32> -> vector<16x32xf32>
    %c1_14 = arith.constant 1 : index
    %c0_15 = arith.constant 0 : index
    %c0_16 = arith.constant 0 : index
    %14 = vector.load %arg5[%c1_14, %c0_15, %c0_16] : memref<3x1x32xf32, #tpu.memory_space<vmem>>, vector<1x1x32xf32>
    %15 = vector.shape_cast %14 : vector<1x1x32xf32> to vector<1x32xf32>
    %16 = vector.broadcast %15 : vector<1x32xf32> to vector<16x32xf32>
    %17 = arith.addf %13, %16 : vector<16x32xf32>
    %18 = vector.shape_cast %17 : vector<16x32xf32> to vector<8x2x32xf32>
    %c0_17 = arith.constant 0 : index
    %c0_18 = arith.constant 0 : index
    %c0_19 = arith.constant 0 : index
    %19 = vector.load %arg23[%c0_17, %c0_18, %c0_19] : memref<8x2x32xf32, #tpu.memory_space<vmem>>, vector<8x2x32xf32>
    tpu.vector_store %arg23[%c0_17, %c0_18, %c0_19], %18 {strides = array<i32>} : memref<8x2x32xf32, #tpu.memory_space<vmem>>, vector<8x2x32xf32>,
    %c2 = arith.constant 2 : index
    %c0_20 = arith.constant 0 : index
    %c0_21 = arith.constant 0 : index
    %20 = vector.load %arg3[%c2, %c0_20, %c0_21] : memref<3x16x32xf32, #tpu.memory_space<vmem>>, vector<1x16x32xf32>
    %21 = vector.shape_cast %20 : vector<1x16x32xf32> to vector<16x32xf32>
    %cst_22 = arith.constant dense<0.000000e+00> : vector<16x32xf32>
    %22 = tpu.matmul %1, %21, %cst_22 {dimension_numbers = #tpu.dot_dimension_numbers<[1], [0], [0], [1], [0, 0, 1, 1], [], []>} : vector<16x16xf32>, vector<16x32xf32>, vector<16x32xf32> -> vector<16x32xf32>
    %c2_23 = arith.constant 2 : index
    %c0_24 = arith.constant 0 : index
    %c0_25 = arith.constant 0 : index
    %23 = vector.load %arg5[%c2_23, %c0_24, %c0_25] : memref<3x1x32xf32, #tpu.memory_space<vmem>>, vector<1x1x32xf32>
    %24 = vector.shape_cast %23 : vector<1x1x32xf32> to vector<1x32xf32>
    %25 = vector.broadcast %24 : vector<1x32xf32> to vector<16x32xf32>
    %26 = arith.addf %22, %25 : vector<16x32xf32>
    %27 = vector.shape_cast %26 : vector<16x32xf32> to vector<8x2x32xf32>
    %c0_26 = arith.constant 0 : index
    %c0_27 = arith.constant 0 : index
    %c0_28 = arith.constant 0 : index
    %28 = vector.load %arg24[%c0_26, %c0_27, %c0_28] : memref<8x2x32xf32, #tpu.memory_space<vmem>>, vector<8x2x32xf32>
    tpu.vector_store %arg24[%c0_26, %c0_27, %c0_28], %27 {strides = array<i32>} : memref<8x2x32xf32, #tpu.memory_space<vmem>>, vector<8x2x32xf32>,
    %c0_29 = arith.constant 0 : index
    %c0_30 = arith.constant 0 : index
    %c0_31 = arith.constant 0 : index
    %29 = vector.load %arg4[%c0_29, %c0_30, %c0_31] : memref<3x32x32xf32, #tpu.memory_space<vmem>>, vector<1x32x32xf32>
    %30 = vector.shape_cast %29 : vector<1x32x32xf32> to vector<32x32xf32>
    %c1_32 = arith.constant 1 : index
    %c0_33 = arith.constant 0 : index
    %c0_34 = arith.constant 0 : index
    %31 = vector.load %arg4[%c1_32, %c0_33, %c0_34] : memref<3x32x32xf32, #tpu.memory_space<vmem>>, vector<1x32x32xf32>
    %32 = vector.shape_cast %31 : vector<1x32x32xf32> to vector<32x32xf32>
    %c2_35 = arith.constant 2 : index
    %c0_36 = arith.constant 0 : index
    %c0_37 = arith.constant 0 : index
    %33 = vector.load %arg4[%c2_35, %c0_36, %c0_37] : memref<3x32x32xf32, #tpu.memory_space<vmem>>, vector<1x32x32xf32>
    %34 = vector.shape_cast %33 : vector<1x32x32xf32> to vector<32x32xf32>
    %c0_38 = arith.constant 0 : index
    %c0_39 = arith.constant 0 : index
    %c0_40 = arith.constant 0 : index
    %35 = vector.load %arg6[%c0_38, %c0_39, %c0_40] : memref<3x1x32xf32, #tpu.memory_space<vmem>>, vector<1x1x32xf32>
    %36 = vector.shape_cast %35 : vector<1x1x32xf32> to vector<1x32xf32>
    %c1_41 = arith.constant 1 : index
    %c0_42 = arith.constant 0 : index
    %c0_43 = arith.constant 0 : index
    %37 = vector.load %arg6[%c1_41, %c0_42, %c0_43] : memref<3x1x32xf32, #tpu.memory_space<vmem>>, vector<1x1x32xf32>
    %38 = vector.shape_cast %37 : vector<1x1x32xf32> to vector<1x32xf32>
    %c2_44 = arith.constant 2 : index
    %c0_45 = arith.constant 0 : index
    %c0_46 = arith.constant 0 : index
    %39 = vector.load %arg6[%c2_44, %c0_45, %c0_46] : memref<3x1x32xf32, #tpu.memory_space<vmem>>, vector<1x1x32xf32>
    %40 = vector.shape_cast %39 : vector<1x1x32xf32> to vector<1x32xf32>
    %c0_47 = arith.constant 0 : index
    %c0_48 = arith.constant 0 : index
    %c0_49 = arith.constant 0 : index
    %41 = vector.load %arg2[%c0_47, %c0_48, %c0_49] : memref<2x2x32xf32, #tpu.memory_space<vmem>>, vector<1x2x32xf32>
    %42 = vector.shape_cast %41 : vector<1x2x32xf32> to vector<2x32xf32>
    %c0_i32 = arith.constant 0 : i32
    %cst_50 = arith.constant dense<0.000000e+00> : vector<2x32xf32>
    %43 = tpu.matmul %42, %30, %cst_50 {dimension_numbers = #tpu.dot_dimension_numbers<[1], [0], [0], [1], [0, 0, 1, 1], [], []>} : vector<2x32xf32>, vector<32x32xf32>, vector<2x32xf32> -> vector<2x32xf32>
    %44 = vector.broadcast %36 : vector<1x32xf32> to vector<2x32xf32>
    %45 = arith.addf %43, %44 : vector<2x32xf32>
    %cst_51 = arith.constant dense<0.000000e+00> : vector<2x32xf32>
    %46 = tpu.matmul %42, %32, %cst_51 {dimension_numbers = #tpu.dot_dimension_numbers<[1], [0], [0], [1], [0, 0, 1, 1], [], []>} : vector<2x32xf32>, vector<32x32xf32>, vector<2x32xf32> -> vector<2x32xf32>
    %47 = vector.broadcast %38 : vector<1x32xf32> to vector<2x32xf32>
    %48 = arith.addf %46, %47 : vector<2x32xf32>
    %cst_52 = arith.constant dense<0.000000e+00> : vector<2x32xf32>
    %49 = tpu.matmul %42, %34, %cst_52 {dimension_numbers = #tpu.dot_dimension_numbers<[1], [0], [0], [1], [0, 0, 1, 1], [], []>} : vector<2x32xf32>, vector<32x32xf32>, vector<2x32xf32> -> vector<2x32xf32>
    %50 = vector.broadcast %40 : vector<1x32xf32> to vector<2x32xf32>
    %51 = arith.addf %49, %50 : vector<2x32xf32>
    %52 = arith.index_cast %c0_i32 : i32 to index
    %c0_53 = arith.constant 0 : index
    %c0_54 = arith.constant 0 : index
    %53 = vector.load %arg22[%52, %c0_53, %c0_54] : memref<8x2x32xf32, #tpu.memory_space<vmem>>, vector<1x2x32xf32>
    %54 = vector.shape_cast %53 : vector<1x2x32xf32> to vector<2x32xf32>
    %55 = arith.addf %54, %45 : vector<2x32xf32>
    %56 = arith.negf %55 : vector<2x32xf32>
    %57 = math.exp %56 : vector<2x32xf32>
    %cst_55 = arith.constant 1.000000e+00 : f32
    %58 = vector.broadcast %cst_55 : f32 to vector<2x32xf32>
    %59 = arith.addf %58, %57 : vector<2x32xf32>
    %60 = arith.divf %58, %59 : vector<2x32xf32>
    %61 = arith.index_cast %c0_i32 : i32 to index
    %c0_56 = arith.constant 0 : index
    %c0_57 = arith.constant 0 : index
    %62 = vector.load %arg23[%61, %c0_56, %c0_57] : memref<8x2x32xf32, #tpu.memory_space<vmem>>, vector<1x2x32xf32>
    %63 = vector.shape_cast %62 : vector<1x2x32xf32> to vector<2x32xf32>
    %64 = arith.addf %63, %48 : vector<2x32xf32>
    %65 = arith.negf %64 : vector<2x32xf32>
    %66 = math.exp %65 : vector<2x32xf32>
    %cst_58 = arith.constant 1.000000e+00 : f32
    %67 = vector.broadcast %cst_58 : f32 to vector<2x32xf32>
    %68 = arith.addf %67, %66 : vector<2x32xf32>
    %69 = arith.divf %67, %68 : vector<2x32xf32>
    %70 = arith.index_cast %c0_i32 : i32 to index
    %c0_59 = arith.constant 0 : index
    %c0_60 = arith.constant 0 : index
    %71 = vector.load %arg24[%70, %c0_59, %c0_60] : memref<8x2x32xf32, #tpu.memory_space<vmem>>, vector<1x2x32xf32>
    %72 = vector.shape_cast %71 : vector<1x2x32xf32> to vector<2x32xf32>
    %73 = arith.mulf %60, %51 : vector<2x32xf32>
    %74 = arith.addf %72, %73 : vector<2x32xf32>
    %75 = math.tanh %74 : vector<2x32xf32>
    %cst_61 = arith.constant 1.000000e+00 : f32
    %76 = vector.broadcast %cst_61 : f32 to vector<2x32xf32>
    %77 = arith.subf %76, %69 : vector<2x32xf32>
    %78 = arith.mulf %77, %75 : vector<2x32xf32>
    %79 = arith.mulf %69, %42 : vector<2x32xf32>
    %80 = arith.addf %78, %79 : vector<2x32xf32>
    %81 = arith.index_cast %c0_i32 : i32 to index
    %c0_62 = arith.constant 0 : index
    %c0_63 = arith.constant 0 : index
    %82 = vector.load %arg25[%81, %c0_62, %c0_63] : memref<8x2x32xf32, #tpu.memory_space<vmem>>, vector<1x2x32xf32>
    %83 = vector.shape_cast %82 : vector<1x2x32xf32> to vector<2x32xf32>
    %84 = vector.shape_cast %80 : vector<2x32xf32> to vector<1x2x32xf32>
    tpu.vector_store %arg25[%81, %c0_62, %c0_63], %84 {strides = array<i32>} : memref<8x2x32xf32, #tpu.memory_space<vmem>>, vector<1x2x32xf32>,
    %c1_i32 = arith.constant 1 : i32
    %cst_64 = arith.constant dense<0.000000e+00> : vector<2x32xf32>
    %85 = tpu.matmul %80, %30, %cst_64 {dimension_numbers = #tpu.dot_dimension_numbers<[1], [0], [0], [1], [0, 0, 1, 1], [], []>} : vector<2x32xf32>, vector<32x32xf32>, vector<2x32xf32> -> vector<2x32xf32>
    %86 = vector.broadcast %36 : vector<1x32xf32> to vector<2x32xf32>
    %87 = arith.addf %85, %86 : vector<2x32xf32>
    %cst_65 = arith.constant dense<0.000000e+00> : vector<2x32xf32>
    %88 = tpu.matmul %80, %32, %cst_65 {dimension_numbers = #tpu.dot_dimension_numbers<[1], [0], [0], [1], [0, 0, 1, 1], [], []>} : vector<2x32xf32>, vector<32x32xf32>, vector<2x32xf32> -> vector<2x32xf32>
    %89 = vector.broadcast %38 : vector<1x32xf32> to vector<2x32xf32>
    %90 = arith.addf %88, %89 : vector<2x32xf32>
    %cst_66 = arith.constant dense<0.000000e+00> : vector<2x32xf32>
    %91 = tpu.matmul %80, %34, %cst_66 {dimension_numbers = #tpu.dot_dimension_numbers<[1], [0], [0], [1], [0, 0, 1, 1], [], []>} : vector<2x32xf32>, vector<32x32xf32>, vector<2x32xf32> -> vector<2x32xf32>
    %92 = vector.broadcast %40 : vector<1x32xf32> to vector<2x32xf32>
    %93 = arith.addf %91, %92 : vector<2x32xf32>
    %94 = arith.index_cast %c1_i32 : i32 to index
    %c0_67 = arith.constant 0 : index
    %c0_68 = arith.constant 0 : index
    %95 = vector.load %arg22[%94, %c0_67, %c0_68] : memref<8x2x32xf32, #tpu.memory_space<vmem>>, vector<1x2x32xf32>
    %96 = vector.shape_cast %95 : vector<1x2x32xf32> to vector<2x32xf32>
    %97 = arith.addf %96, %87 : vector<2x32xf32>
    %98 = arith.negf %97 : vector<2x32xf32>
    %99 = math.exp %98 : vector<2x32xf32>
    %cst_69 = arith.constant 1.000000e+00 : f32
    %100 = vector.broadcast %cst_69 : f32 to vector<2x32xf32>
    %101 = arith.addf %100, %99 : vector<2x32xf32>
    %102 = arith.divf %100, %101 : vector<2x32xf32>
    %103 = arith.index_cast %c1_i32 : i32 to index
    %c0_70 = arith.constant 0 : index
    %c0_71 = arith.constant 0 : index
    %104 = vector.load %arg23[%103, %c0_70, %c0_71] : memref<8x2x32xf32, #tpu.memory_space<vmem>>, vector<1x2x32xf32>
    %105 = vector.shape_cast %104 : vector<1x2x32xf32> to vector<2x32xf32>
    %106 = arith.addf %105, %90 : vector<2x32xf32>
    %107 = arith.negf %106 : vector<2x32xf32>
    %108 = math.exp %107 : vector<2x32xf32>
    %cst_72 = arith.constant 1.000000e+00 : f32
    %109 = vector.broadcast %cst_72 : f32 to vector<2x32xf32>
    %110 = arith.addf %109, %108 : vector<2x32xf32>
    %111 = arith.divf %109, %110 : vector<2x32xf32>
    %112 = arith.index_cast %c1_i32 : i32 to index
    %c0_73 = arith.constant 0 : index
    %c0_74 = arith.constant 0 : index
    %113 = vector.load %arg24[%112, %c0_73, %c0_74] : memref<8x2x32xf32, #tpu.memory_space<vmem>>, vector<1x2x32xf32>
    %114 = vector.shape_cast %113 : vector<1x2x32xf32> to vector<2x32xf32>
    %115 = arith.mulf %102, %93 : vector<2x32xf32>
    %116 = arith.addf %114, %115 : vector<2x32xf32>
    %117 = math.tanh %116 : vector<2x32xf32>
    %cst_75 = arith.constant 1.000000e+00 : f32
    %118 = vector.broadcast %cst_75 : f32 to vector<2x32xf32>
    %119 = arith.subf %118, %111 : vector<2x32xf32>
    %120 = arith.mulf %119, %117 : vector<2x32xf32>
    %121 = arith.mulf %111, %80 : vector<2x32xf32>
    %122 = arith.addf %120, %121 : vector<2x32xf32>
    %123 = arith.index_cast %c1_i32 : i32 to index
    %c0_76 = arith.constant 0 : index
    %c0_77 = arith.constant 0 : index
    %124 = vector.load %arg25[%123, %c0_76, %c0_77] : memref<8x2x32xf32, #tpu.memory_space<vmem>>, vector<1x2x32xf32>
    %125 = vector.shape_cast %124 : vector<1x2x32xf32> to vector<2x32xf32>
    %126 = vector.shape_cast %122 : vector<2x32xf32> to vector<1x2x32xf32>
    tpu.vector_store %arg25[%123, %c0_76, %c0_77], %126 {strides = array<i32>} : memref<8x2x32xf32, #tpu.memory_space<vmem>>, vector<1x2x32xf32>,
    %c2_i32 = arith.constant 2 : i32
    %cst_78 = arith.constant dense<0.000000e+00> : vector<2x32xf32>
    %127 = tpu.matmul %122, %30, %cst_78 {dimension_numbers = #tpu.dot_dimension_numbers<[1], [0], [0], [1], [0, 0, 1, 1], [], []>} : vector<2x32xf32>, vector<32x32xf32>, vector<2x32xf32> -> vector<2x32xf32>
    %128 = vector.broadcast %36 : vector<1x32xf32> to vector<2x32xf32>
    %129 = arith.addf %127, %128 : vector<2x32xf32>
    %cst_79 = arith.constant dense<0.000000e+00> : vector<2x32xf32>
    %130 = tpu.matmul %122, %32, %cst_79 {dimension_numbers = #tpu.dot_dimension_numbers<[1], [0], [0], [1], [0, 0, 1, 1], [], []>} : vector<2x32xf32>, vector<32x32xf32>, vector<2x32xf32> -> vector<2x32xf32>
    %131 = vector.broadcast %38 : vector<1x32xf32> to vector<2x32xf32>
    %132 = arith.addf %130, %131 : vector<2x32xf32>
    %cst_80 = arith.constant dense<0.000000e+00> : vector<2x32xf32>
    %133 = tpu.matmul %122, %34, %cst_80 {dimension_numbers = #tpu.dot_dimension_numbers<[1], [0], [0], [1], [0, 0, 1, 1], [], []>} : vector<2x32xf32>, vector<32x32xf32>, vector<2x32xf32> -> vector<2x32xf32>
    %134 = vector.broadcast %40 : vector<1x32xf32> to vector<2x32xf32>
    %135 = arith.addf %133, %134 : vector<2x32xf32>
    %136 = arith.index_cast %c2_i32 : i32 to index
    %c0_81 = arith.constant 0 : index
    %c0_82 = arith.constant 0 : index
    %137 = vector.load %arg22[%136, %c0_81, %c0_82] : memref<8x2x32xf32, #tpu.memory_space<vmem>>, vector<1x2x32xf32>
    %138 = vector.shape_cast %137 : vector<1x2x32xf32> to vector<2x32xf32>
    %139 = arith.addf %138, %129 : vector<2x32xf32>
    %140 = arith.negf %139 : vector<2x32xf32>
    %141 = math.exp %140 : vector<2x32xf32>
    %cst_83 = arith.constant 1.000000e+00 : f32
    %142 = vector.broadcast %cst_83 : f32 to vector<2x32xf32>
    %143 = arith.addf %142, %141 : vector<2x32xf32>
    %144 = arith.divf %142, %143 : vector<2x32xf32>
    %145 = arith.index_cast %c2_i32 : i32 to index
    %c0_84 = arith.constant 0 : index
    %c0_85 = arith.constant 0 : index
    %146 = vector.load %arg23[%145, %c0_84, %c0_85] : memref<8x2x32xf32, #tpu.memory_space<vmem>>, vector<1x2x32xf32>
    %147 = vector.shape_cast %146 : vector<1x2x32xf32> to vector<2x32xf32>
    %148 = arith.addf %147, %132 : vector<2x32xf32>
    %149 = arith.negf %148 : vector<2x32xf32>
    %150 = math.exp %149 : vector<2x32xf32>
    %cst_86 = arith.constant 1.000000e+00 : f32
    %151 = vector.broadcast %cst_86 : f32 to vector<2x32xf32>
    %152 = arith.addf %151, %150 : vector<2x32xf32>
    %153 = arith.divf %151, %152 : vector<2x32xf32>
    %154 = arith.index_cast %c2_i32 : i32 to index
    %c0_87 = arith.constant 0 : index
    %c0_88 = arith.constant 0 : index
    %155 = vector.load %arg24[%154, %c0_87, %c0_88] : memref<8x2x32xf32, #tpu.memory_space<vmem>>, vector<1x2x32xf32>
    %156 = vector.shape_cast %155 : vector<1x2x32xf32> to vector<2x32xf32>
    %157 = arith.mulf %144, %135 : vector<2x32xf32>
    %158 = arith.addf %156, %157 : vector<2x32xf32>
    %159 = math.tanh %158 : vector<2x32xf32>
    %cst_89 = arith.constant 1.000000e+00 : f32
    %160 = vector.broadcast %cst_89 : f32 to vector<2x32xf32>
    %161 = arith.subf %160, %153 : vector<2x32xf32>
    %162 = arith.mulf %161, %159 : vector<2x32xf32>
    %163 = arith.mulf %153, %122 : vector<2x32xf32>
    %164 = arith.addf %162, %163 : vector<2x32xf32>
    %165 = arith.index_cast %c2_i32 : i32 to index
    %c0_90 = arith.constant 0 : index
    %c0_91 = arith.constant 0 : index
    %166 = vector.load %arg25[%165, %c0_90, %c0_91] : memref<8x2x32xf32, #tpu.memory_space<vmem>>, vector<1x2x32xf32>
    %167 = vector.shape_cast %166 : vector<1x2x32xf32> to vector<2x32xf32>
    %168 = vector.shape_cast %164 : vector<2x32xf32> to vector<1x2x32xf32>
    tpu.vector_store %arg25[%165, %c0_90, %c0_91], %168 {strides = array<i32>} : memref<8x2x32xf32, #tpu.memory_space<vmem>>, vector<1x2x32xf32>,
    %c3_i32 = arith.constant 3 : i32
    %cst_92 = arith.constant dense<0.000000e+00> : vector<2x32xf32>
    %169 = tpu.matmul %164, %30, %cst_92 {dimension_numbers = #tpu.dot_dimension_numbers<[1], [0], [0], [1], [0, 0, 1, 1], [], []>} : vector<2x32xf32>, vector<32x32xf32>, vector<2x32xf32> -> vector<2x32xf32>
    %170 = vector.broadcast %36 : vector<1x32xf32> to vector<2x32xf32>
    %171 = arith.addf %169, %170 : vector<2x32xf32>
    %cst_93 = arith.constant dense<0.000000e+00> : vector<2x32xf32>
    %172 = tpu.matmul %164, %32, %cst_93 {dimension_numbers = #tpu.dot_dimension_numbers<[1], [0], [0], [1], [0, 0, 1, 1], [], []>} : vector<2x32xf32>, vector<32x32xf32>, vector<2x32xf32> -> vector<2x32xf32>
    %173 = vector.broadcast %38 : vector<1x32xf32> to vector<2x32xf32>
    %174 = arith.addf %172, %173 : vector<2x32xf32>
    %cst_94 = arith.constant dense<0.000000e+00> : vector<2x32xf32>
    %175 = tpu.matmul %164, %34, %cst_94 {dimension_numbers = #tpu.dot_dimension_numbers<[1], [0], [0], [1], [0, 0, 1, 1], [], []>} : vector<2x32xf32>, vector<32x32xf32>, vector<2x32xf32> -> vector<2x32xf32>
    %176 = vector.broadcast %40 : vector<1x32xf32> to vector<2x32xf32>
    %177 = arith.addf %175, %176 : vector<2x32xf32>
    %178 = arith.index_cast %c3_i32 : i32 to index
    %c0_95 = arith.constant 0 : index
    %c0_96 = arith.constant 0 : index
    %179 = vector.load %arg22[%178, %c0_95, %c0_96] : memref<8x2x32xf32, #tpu.memory_space<vmem>>, vector<1x2x32xf32>
    %180 = vector.shape_cast %179 : vector<1x2x32xf32> to vector<2x32xf32>
    %181 = arith.addf %180, %171 : vector<2x32xf32>
    %182 = arith.negf %181 : vector<2x32xf32>
    %183 = math.exp %182 : vector<2x32xf32>
    %cst_97 = arith.constant 1.000000e+00 : f32
    %184 = vector.broadcast %cst_97 : f32 to vector<2x32xf32>
    %185 = arith.addf %184, %183 : vector<2x32xf32>
    %186 = arith.divf %184, %185 : vector<2x32xf32>
    %187 = arith.index_cast %c3_i32 : i32 to index
    %c0_98 = arith.constant 0 : index
    %c0_99 = arith.constant 0 : index
    %188 = vector.load %arg23[%187, %c0_98, %c0_99] : memref<8x2x32xf32, #tpu.memory_space<vmem>>, vector<1x2x32xf32>
    %189 = vector.shape_cast %188 : vector<1x2x32xf32> to vector<2x32xf32>
    %190 = arith.addf %189, %174 : vector<2x32xf32>
    %191 = arith.negf %190 : vector<2x32xf32>
    %192 = math.exp %191 : vector<2x32xf32>
    %cst_100 = arith.constant 1.000000e+00 : f32
    %193 = vector.broadcast %cst_100 : f32 to vector<2x32xf32>
    %194 = arith.addf %193, %192 : vector<2x32xf32>
    %195 = arith.divf %193, %194 : vector<2x32xf32>
    %196 = arith.index_cast %c3_i32 : i32 to index
    %c0_101 = arith.constant 0 : index
    %c0_102 = arith.constant 0 : index
    %197 = vector.load %arg24[%196, %c0_101, %c0_102] : memref<8x2x32xf32, #tpu.memory_space<vmem>>, vector<1x2x32xf32>
    %198 = vector.shape_cast %197 : vector<1x2x32xf32> to vector<2x32xf32>
    %199 = arith.mulf %186, %177 : vector<2x32xf32>
    %200 = arith.addf %198, %199 : vector<2x32xf32>
    %201 = math.tanh %200 : vector<2x32xf32>
    %cst_103 = arith.constant 1.000000e+00 : f32
    %202 = vector.broadcast %cst_103 : f32 to vector<2x32xf32>
    %203 = arith.subf %202, %195 : vector<2x32xf32>
    %204 = arith.mulf %203, %201 : vector<2x32xf32>
    %205 = arith.mulf %195, %164 : vector<2x32xf32>
    %206 = arith.addf %204, %205 : vector<2x32xf32>
    %207 = arith.index_cast %c3_i32 : i32 to index
    %c0_104 = arith.constant 0 : index
    %c0_105 = arith.constant 0 : index
    %208 = vector.load %arg25[%207, %c0_104, %c0_105] : memref<8x2x32xf32, #tpu.memory_space<vmem>>, vector<1x2x32xf32>
    %209 = vector.shape_cast %208 : vector<1x2x32xf32> to vector<2x32xf32>
    %210 = vector.shape_cast %206 : vector<2x32xf32> to vector<1x2x32xf32>
    tpu.vector_store %arg25[%207, %c0_104, %c0_105], %210 {strides = array<i32>} : memref<8x2x32xf32, #tpu.memory_space<vmem>>, vector<1x2x32xf32>,
    %c4_i32 = arith.constant 4 : i32
    %cst_106 = arith.constant dense<0.000000e+00> : vector<2x32xf32>
    %211 = tpu.matmul %206, %30, %cst_106 {dimension_numbers = #tpu.dot_dimension_numbers<[1], [0], [0], [1], [0, 0, 1, 1], [], []>} : vector<2x32xf32>, vector<32x32xf32>, vector<2x32xf32> -> vector<2x32xf32>
    %212 = vector.broadcast %36 : vector<1x32xf32> to vector<2x32xf32>
    %213 = arith.addf %211, %212 : vector<2x32xf32>
    %cst_107 = arith.constant dense<0.000000e+00> : vector<2x32xf32>
    %214 = tpu.matmul %206, %32, %cst_107 {dimension_numbers = #tpu.dot_dimension_numbers<[1], [0], [0], [1], [0, 0, 1, 1], [], []>} : vector<2x32xf32>, vector<32x32xf32>, vector<2x32xf32> -> vector<2x32xf32>
    %215 = vector.broadcast %38 : vector<1x32xf32> to vector<2x32xf32>
    %216 = arith.addf %214, %215 : vector<2x32xf32>
    %cst_108 = arith.constant dense<0.000000e+00> : vector<2x32xf32>
    %217 = tpu.matmul %206, %34, %cst_108 {dimension_numbers = #tpu.dot_dimension_numbers<[1], [0], [0], [1], [0, 0, 1, 1], [], []>} : vector<2x32xf32>, vector<32x32xf32>, vector<2x32xf32> -> vector<2x32xf32>
    %218 = vector.broadcast %40 : vector<1x32xf32> to vector<2x32xf32>
    %219 = arith.addf %217, %218 : vector<2x32xf32>
    %220 = arith.index_cast %c4_i32 : i32 to index
    %c0_109 = arith.constant 0 : index
    %c0_110 = arith.constant 0 : index
    %221 = vector.load %arg22[%220, %c0_109, %c0_110] : memref<8x2x32xf32, #tpu.memory_space<vmem>>, vector<1x2x32xf32>
    %222 = vector.shape_cast %221 : vector<1x2x32xf32> to vector<2x32xf32>
    %223 = arith.addf %222, %213 : vector<2x32xf32>
    %224 = arith.negf %223 : vector<2x32xf32>
    %225 = math.exp %224 : vector<2x32xf32>
    %cst_111 = arith.constant 1.000000e+00 : f32
    %226 = vector.broadcast %cst_111 : f32 to vector<2x32xf32>
    %227 = arith.addf %226, %225 : vector<2x32xf32>
    %228 = arith.divf %226, %227 : vector<2x32xf32>
    %229 = arith.index_cast %c4_i32 : i32 to index
    %c0_112 = arith.constant 0 : index
    %c0_113 = arith.constant 0 : index
    %230 = vector.load %arg23[%229, %c0_112, %c0_113] : memref<8x2x32xf32, #tpu.memory_space<vmem>>, vector<1x2x32xf32>
    %231 = vector.shape_cast %230 : vector<1x2x32xf32> to vector<2x32xf32>
    %232 = arith.addf %231, %216 : vector<2x32xf32>
    %233 = arith.negf %232 : vector<2x32xf32>
    %234 = math.exp %233 : vector<2x32xf32>
    %cst_114 = arith.constant 1.000000e+00 : f32
    %235 = vector.broadcast %cst_114 : f32 to vector<2x32xf32>
    %236 = arith.addf %235, %234 : vector<2x32xf32>
    %237 = arith.divf %235, %236 : vector<2x32xf32>
    %238 = arith.index_cast %c4_i32 : i32 to index
    %c0_115 = arith.constant 0 : index
    %c0_116 = arith.constant 0 : index
    %239 = vector.load %arg24[%238, %c0_115, %c0_116] : memref<8x2x32xf32, #tpu.memory_space<vmem>>, vector<1x2x32xf32>
    %240 = vector.shape_cast %239 : vector<1x2x32xf32> to vector<2x32xf32>
    %241 = arith.mulf %228, %219 : vector<2x32xf32>
    %242 = arith.addf %240, %241 : vector<2x32xf32>
    %243 = math.tanh %242 : vector<2x32xf32>
    %cst_117 = arith.constant 1.000000e+00 : f32
    %244 = vector.broadcast %cst_117 : f32 to vector<2x32xf32>
    %245 = arith.subf %244, %237 : vector<2x32xf32>
    %246 = arith.mulf %245, %243 : vector<2x32xf32>
    %247 = arith.mulf %237, %206 : vector<2x32xf32>
    %248 = arith.addf %246, %247 : vector<2x32xf32>
    %249 = arith.index_cast %c4_i32 : i32 to index
    %c0_118 = arith.constant 0 : index
    %c0_119 = arith.constant 0 : index
    %250 = vector.load %arg25[%249, %c0_118, %c0_119] : memref<8x2x32xf32, #tpu.memory_space<vmem>>, vector<1x2x32xf32>
    %251 = vector.shape_cast %250 : vector<1x2x32xf32> to vector<2x32xf32>
    %252 = vector.shape_cast %248 : vector<2x32xf32> to vector<1x2x32xf32>
    tpu.vector_store %arg25[%249, %c0_118, %c0_119], %252 {strides = array<i32>} : memref<8x2x32xf32, #tpu.memory_space<vmem>>, vector<1x2x32xf32>,
    %c5_i32 = arith.constant 5 : i32
    %cst_120 = arith.constant dense<0.000000e+00> : vector<2x32xf32>
    %253 = tpu.matmul %248, %30, %cst_120 {dimension_numbers = #tpu.dot_dimension_numbers<[1], [0], [0], [1], [0, 0, 1, 1], [], []>} : vector<2x32xf32>, vector<32x32xf32>, vector<2x32xf32> -> vector<2x32xf32>
    %254 = vector.broadcast %36 : vector<1x32xf32> to vector<2x32xf32>
    %255 = arith.addf %253, %254 : vector<2x32xf32>
    %cst_121 = arith.constant dense<0.000000e+00> : vector<2x32xf32>
    %256 = tpu.matmul %248, %32, %cst_121 {dimension_numbers = #tpu.dot_dimension_numbers<[1], [0], [0], [1], [0, 0, 1, 1], [], []>} : vector<2x32xf32>, vector<32x32xf32>, vector<2x32xf32> -> vector<2x32xf32>
    %257 = vector.broadcast %38 : vector<1x32xf32> to vector<2x32xf32>
    %258 = arith.addf %256, %257 : vector<2x32xf32>
    %cst_122 = arith.constant dense<0.000000e+00> : vector<2x32xf32>
    %259 = tpu.matmul %248, %34, %cst_122 {dimension_numbers = #tpu.dot_dimension_numbers<[1], [0], [0], [1], [0, 0, 1, 1], [], []>} : vector<2x32xf32>, vector<32x32xf32>, vector<2x32xf32> -> vector<2x32xf32>
    %260 = vector.broadcast %40 : vector<1x32xf32> to vector<2x32xf32>
    %261 = arith.addf %259, %260 : vector<2x32xf32>
    %262 = arith.index_cast %c5_i32 : i32 to index
    %c0_123 = arith.constant 0 : index
    %c0_124 = arith.constant 0 : index
    %263 = vector.load %arg22[%262, %c0_123, %c0_124] : memref<8x2x32xf32, #tpu.memory_space<vmem>>, vector<1x2x32xf32>
    %264 = vector.shape_cast %263 : vector<1x2x32xf32> to vector<2x32xf32>
    %265 = arith.addf %264, %255 : vector<2x32xf32>
    %266 = arith.negf %265 : vector<2x32xf32>
    %267 = math.exp %266 : vector<2x32xf32>
    %cst_125 = arith.constant 1.000000e+00 : f32
    %268 = vector.broadcast %cst_125 : f32 to vector<2x32xf32>
    %269 = arith.addf %268, %267 : vector<2x32xf32>
    %270 = arith.divf %268, %269 : vector<2x32xf32>
    %271 = arith.index_cast %c5_i32 : i32 to index
    %c0_126 = arith.constant 0 : index
    %c0_127 = arith.constant 0 : index
    %272 = vector.load %arg23[%271, %c0_126, %c0_127] : memref<8x2x32xf32, #tpu.memory_space<vmem>>, vector<1x2x32xf32>
    %273 = vector.shape_cast %272 : vector<1x2x32xf32> to vector<2x32xf32>
    %274 = arith.addf %273, %258 : vector<2x32xf32>
    %275 = arith.negf %274 : vector<2x32xf32>
    %276 = math.exp %275 : vector<2x32xf32>
    %cst_128 = arith.constant 1.000000e+00 : f32
    %277 = vector.broadcast %cst_128 : f32 to vector<2x32xf32>
    %278 = arith.addf %277, %276 : vector<2x32xf32>
    %279 = arith.divf %277, %278 : vector<2x32xf32>
    %280 = arith.index_cast %c5_i32 : i32 to index
    %c0_129 = arith.constant 0 : index
    %c0_130 = arith.constant 0 : index
    %281 = vector.load %arg24[%280, %c0_129, %c0_130] : memref<8x2x32xf32, #tpu.memory_space<vmem>>, vector<1x2x32xf32>
    %282 = vector.shape_cast %281 : vector<1x2x32xf32> to vector<2x32xf32>
    %283 = arith.mulf %270, %261 : vector<2x32xf32>
    %284 = arith.addf %282, %283 : vector<2x32xf32>
    %285 = math.tanh %284 : vector<2x32xf32>
    %cst_131 = arith.constant 1.000000e+00 : f32
    %286 = vector.broadcast %cst_131 : f32 to vector<2x32xf32>
    %287 = arith.subf %286, %279 : vector<2x32xf32>
    %288 = arith.mulf %287, %285 : vector<2x32xf32>
    %289 = arith.mulf %279, %248 : vector<2x32xf32>
    %290 = arith.addf %288, %289 : vector<2x32xf32>
    %291 = arith.index_cast %c5_i32 : i32 to index
    %c0_132 = arith.constant 0 : index
    %c0_133 = arith.constant 0 : index
    %292 = vector.load %arg25[%291, %c0_132, %c0_133] : memref<8x2x32xf32, #tpu.memory_space<vmem>>, vector<1x2x32xf32>
    %293 = vector.shape_cast %292 : vector<1x2x32xf32> to vector<2x32xf32>
    %294 = vector.shape_cast %290 : vector<2x32xf32> to vector<1x2x32xf32>
    tpu.vector_store %arg25[%291, %c0_132, %c0_133], %294 {strides = array<i32>} : memref<8x2x32xf32, #tpu.memory_space<vmem>>, vector<1x2x32xf32>,
    %c6_i32 = arith.constant 6 : i32
    %cst_134 = arith.constant dense<0.000000e+00> : vector<2x32xf32>
    %295 = tpu.matmul %290, %30, %cst_134 {dimension_numbers = #tpu.dot_dimension_numbers<[1], [0], [0], [1], [0, 0, 1, 1], [], []>} : vector<2x32xf32>, vector<32x32xf32>, vector<2x32xf32> -> vector<2x32xf32>
    %296 = vector.broadcast %36 : vector<1x32xf32> to vector<2x32xf32>
    %297 = arith.addf %295, %296 : vector<2x32xf32>
    %cst_135 = arith.constant dense<0.000000e+00> : vector<2x32xf32>
    %298 = tpu.matmul %290, %32, %cst_135 {dimension_numbers = #tpu.dot_dimension_numbers<[1], [0], [0], [1], [0, 0, 1, 1], [], []>} : vector<2x32xf32>, vector<32x32xf32>, vector<2x32xf32> -> vector<2x32xf32>
    %299 = vector.broadcast %38 : vector<1x32xf32> to vector<2x32xf32>
    %300 = arith.addf %298, %299 : vector<2x32xf32>
    %cst_136 = arith.constant dense<0.000000e+00> : vector<2x32xf32>
    %301 = tpu.matmul %290, %34, %cst_136 {dimension_numbers = #tpu.dot_dimension_numbers<[1], [0], [0], [1], [0, 0, 1, 1], [], []>} : vector<2x32xf32>, vector<32x32xf32>, vector<2x32xf32> -> vector<2x32xf32>
    %302 = vector.broadcast %40 : vector<1x32xf32> to vector<2x32xf32>
    %303 = arith.addf %301, %302 : vector<2x32xf32>
    %304 = arith.index_cast %c6_i32 : i32 to index
    %c0_137 = arith.constant 0 : index
    %c0_138 = arith.constant 0 : index
    %305 = vector.load %arg22[%304, %c0_137, %c0_138] : memref<8x2x32xf32, #tpu.memory_space<vmem>>, vector<1x2x32xf32>
    %306 = vector.shape_cast %305 : vector<1x2x32xf32> to vector<2x32xf32>
    %307 = arith.addf %306, %297 : vector<2x32xf32>
    %308 = arith.negf %307 : vector<2x32xf32>
    %309 = math.exp %308 : vector<2x32xf32>
    %cst_139 = arith.constant 1.000000e+00 : f32
    %310 = vector.broadcast %cst_139 : f32 to vector<2x32xf32>
    %311 = arith.addf %310, %309 : vector<2x32xf32>
    %312 = arith.divf %310, %311 : vector<2x32xf32>
    %313 = arith.index_cast %c6_i32 : i32 to index
    %c0_140 = arith.constant 0 : index
    %c0_141 = arith.constant 0 : index
    %314 = vector.load %arg23[%313, %c0_140, %c0_141] : memref<8x2x32xf32, #tpu.memory_space<vmem>>, vector<1x2x32xf32>
    %315 = vector.shape_cast %314 : vector<1x2x32xf32> to vector<2x32xf32>
    %316 = arith.addf %315, %300 : vector<2x32xf32>
    %317 = arith.negf %316 : vector<2x32xf32>
    %318 = math.exp %317 : vector<2x32xf32>
    %cst_142 = arith.constant 1.000000e+00 : f32
    %319 = vector.broadcast %cst_142 : f32 to vector<2x32xf32>
    %320 = arith.addf %319, %318 : vector<2x32xf32>
    %321 = arith.divf %319, %320 : vector<2x32xf32>
    %322 = arith.index_cast %c6_i32 : i32 to index
    %c0_143 = arith.constant 0 : index
    %c0_144 = arith.constant 0 : index
    %323 = vector.load %arg24[%322, %c0_143, %c0_144] : memref<8x2x32xf32, #tpu.memory_space<vmem>>, vector<1x2x32xf32>
    %324 = vector.shape_cast %323 : vector<1x2x32xf32> to vector<2x32xf32>
    %325 = arith.mulf %312, %303 : vector<2x32xf32>
    %326 = arith.addf %324, %325 : vector<2x32xf32>
    %327 = math.tanh %326 : vector<2x32xf32>
    %cst_145 = arith.constant 1.000000e+00 : f32
    %328 = vector.broadcast %cst_145 : f32 to vector<2x32xf32>
    %329 = arith.subf %328, %321 : vector<2x32xf32>
    %330 = arith.mulf %329, %327 : vector<2x32xf32>
    %331 = arith.mulf %321, %290 : vector<2x32xf32>
    %332 = arith.addf %330, %331 : vector<2x32xf32>
    %333 = arith.index_cast %c6_i32 : i32 to index
    %c0_146 = arith.constant 0 : index
    %c0_147 = arith.constant 0 : index
    %334 = vector.load %arg25[%333, %c0_146, %c0_147] : memref<8x2x32xf32, #tpu.memory_space<vmem>>, vector<1x2x32xf32>
    %335 = vector.shape_cast %334 : vector<1x2x32xf32> to vector<2x32xf32>
    %336 = vector.shape_cast %332 : vector<2x32xf32> to vector<1x2x32xf32>
    tpu.vector_store %arg25[%333, %c0_146, %c0_147], %336 {strides = array<i32>} : memref<8x2x32xf32, #tpu.memory_space<vmem>>, vector<1x2x32xf32>,
    %c7_i32 = arith.constant 7 : i32
    %cst_148 = arith.constant dense<0.000000e+00> : vector<2x32xf32>
    %337 = tpu.matmul %332, %30, %cst_148 {dimension_numbers = #tpu.dot_dimension_numbers<[1], [0], [0], [1], [0, 0, 1, 1], [], []>} : vector<2x32xf32>, vector<32x32xf32>, vector<2x32xf32> -> vector<2x32xf32>
    %338 = vector.broadcast %36 : vector<1x32xf32> to vector<2x32xf32>
    %339 = arith.addf %337, %338 : vector<2x32xf32>
    %cst_149 = arith.constant dense<0.000000e+00> : vector<2x32xf32>
    %340 = tpu.matmul %332, %32, %cst_149 {dimension_numbers = #tpu.dot_dimension_numbers<[1], [0], [0], [1], [0, 0, 1, 1], [], []>} : vector<2x32xf32>, vector<32x32xf32>, vector<2x32xf32> -> vector<2x32xf32>
    %341 = vector.broadcast %38 : vector<1x32xf32> to vector<2x32xf32>
    %342 = arith.addf %340, %341 : vector<2x32xf32>
    %cst_150 = arith.constant dense<0.000000e+00> : vector<2x32xf32>
    %343 = tpu.matmul %332, %34, %cst_150 {dimension_numbers = #tpu.dot_dimension_numbers<[1], [0], [0], [1], [0, 0, 1, 1], [], []>} : vector<2x32xf32>, vector<32x32xf32>, vector<2x32xf32> -> vector<2x32xf32>
    %344 = vector.broadcast %40 : vector<1x32xf32> to vector<2x32xf32>
    %345 = arith.addf %343, %344 : vector<2x32xf32>
    %346 = arith.index_cast %c7_i32 : i32 to index
    %c0_151 = arith.constant 0 : index
    %c0_152 = arith.constant 0 : index
    %347 = vector.load %arg22[%346, %c0_151, %c0_152] : memref<8x2x32xf32, #tpu.memory_space<vmem>>, vector<1x2x32xf32>
    %348 = vector.shape_cast %347 : vector<1x2x32xf32> to vector<2x32xf32>
    %349 = arith.addf %348, %339 : vector<2x32xf32>
    %350 = arith.negf %349 : vector<2x32xf32>
    %351 = math.exp %350 : vector<2x32xf32>
    %cst_153 = arith.constant 1.000000e+00 : f32
    %352 = vector.broadcast %cst_153 : f32 to vector<2x32xf32>
    %353 = arith.addf %352, %351 : vector<2x32xf32>
    %354 = arith.divf %352, %353 : vector<2x32xf32>
    %355 = arith.index_cast %c7_i32 : i32 to index
    %c0_154 = arith.constant 0 : index
    %c0_155 = arith.constant 0 : index
    %356 = vector.load %arg23[%355, %c0_154, %c0_155] : memref<8x2x32xf32, #tpu.memory_space<vmem>>, vector<1x2x32xf32>
    %357 = vector.shape_cast %356 : vector<1x2x32xf32> to vector<2x32xf32>
    %358 = arith.addf %357, %342 : vector<2x32xf32>
    %359 = arith.negf %358 : vector<2x32xf32>
    %360 = math.exp %359 : vector<2x32xf32>
    %cst_156 = arith.constant 1.000000e+00 : f32
    %361 = vector.broadcast %cst_156 : f32 to vector<2x32xf32>
    %362 = arith.addf %361, %360 : vector<2x32xf32>
    %363 = arith.divf %361, %362 : vector<2x32xf32>
    %364 = arith.index_cast %c7_i32 : i32 to index
    %c0_157 = arith.constant 0 : index
    %c0_158 = arith.constant 0 : index
    %365 = vector.load %arg24[%364, %c0_157, %c0_158] : memref<8x2x32xf32, #tpu.memory_space<vmem>>, vector<1x2x32xf32>
    %366 = vector.shape_cast %365 : vector<1x2x32xf32> to vector<2x32xf32>
    %367 = arith.mulf %354, %345 : vector<2x32xf32>
    %368 = arith.addf %366, %367 : vector<2x32xf32>
    %369 = math.tanh %368 : vector<2x32xf32>
    %cst_159 = arith.constant 1.000000e+00 : f32
    %370 = vector.broadcast %cst_159 : f32 to vector<2x32xf32>
    %371 = arith.subf %370, %363 : vector<2x32xf32>
    %372 = arith.mulf %371, %369 : vector<2x32xf32>
    %373 = arith.mulf %363, %332 : vector<2x32xf32>
    %374 = arith.addf %372, %373 : vector<2x32xf32>
    %375 = arith.index_cast %c7_i32 : i32 to index
    %c0_160 = arith.constant 0 : index
    %c0_161 = arith.constant 0 : index
    %376 = vector.load %arg25[%375, %c0_160, %c0_161] : memref<8x2x32xf32, #tpu.memory_space<vmem>>, vector<1x2x32xf32>
    %377 = vector.shape_cast %376 : vector<1x2x32xf32> to vector<2x32xf32>
    %378 = vector.shape_cast %374 : vector<2x32xf32> to vector<1x2x32xf32>
    tpu.vector_store %arg25[%375, %c0_160, %c0_161], %378 {strides = array<i32>} : memref<8x2x32xf32, #tpu.memory_space<vmem>>, vector<1x2x32xf32>,
    %c8_i32 = arith.constant 8 : i32
    %c0_162 = arith.constant 0 : index
    %c0_163 = arith.constant 0 : index
    %c0_164 = arith.constant 0 : index
    %379 = vector.load %arg25[%c0_162, %c0_163, %c0_164] : memref<8x2x32xf32, #tpu.memory_space<vmem>>, vector<8x2x32xf32>
    %380 = vector.shape_cast %379 : vector<8x2x32xf32> to vector<16x32xf32>
    %c0_165 = arith.constant 0 : index
    %c0_166 = arith.constant 0 : index
    %c0_167 = arith.constant 0 : index
    %381 = vector.load %arg7[%c0_165, %c0_166, %c0_167] : memref<3x32x32xf32, #tpu.memory_space<vmem>>, vector<1x32x32xf32>
    %382 = vector.shape_cast %381 : vector<1x32x32xf32> to vector<32x32xf32>
    %cst_168 = arith.constant dense<0.000000e+00> : vector<16x32xf32>
    %383 = tpu.matmul %380, %382, %cst_168 {dimension_numbers = #tpu.dot_dimension_numbers<[1], [0], [0], [1], [0, 0, 1, 1], [], []>} : vector<16x32xf32>, vector<32x32xf32>, vector<16x32xf32> -> vector<16x32xf32>
    %c0_169 = arith.constant 0 : index
    %c0_170 = arith.constant 0 : index
    %c0_171 = arith.constant 0 : index
    %384 = vector.load %arg9[%c0_169, %c0_170, %c0_171] : memref<3x1x32xf32, #tpu.memory_space<vmem>>, vector<1x1x32xf32>
    %385 = vector.shape_cast %384 : vector<1x1x32xf32> to vector<1x32xf32>
    %386 = vector.broadcast %385 : vector<1x32xf32> to vector<16x32xf32>
    %387 = arith.addf %383, %386 : vector<16x32xf32>
    %388 = vector.shape_cast %387 : vector<16x32xf32> to vector<8x2x32xf32>
    %c0_172 = arith.constant 0 : index
    %c0_173 = arith.constant 0 : index
    %c0_174 = arith.constant 0 : index
    %389 = vector.load %arg22[%c0_172, %c0_173, %c0_174] : memref<8x2x32xf32, #tpu.memory_space<vmem>>, vector<8x2x32xf32>
    tpu.vector_store %arg22[%c0_172, %c0_173, %c0_174], %388 {strides = array<i32>} : memref<8x2x32xf32, #tpu.memory_space<vmem>>, vector<8x2x32xf32>,
    %c1_175 = arith.constant 1 : index
    %c0_176 = arith.constant 0 : index
    %c0_177 = arith.constant 0 : index
    %390 = vector.load %arg7[%c1_175, %c0_176, %c0_177] : memref<3x32x32xf32, #tpu.memory_space<vmem>>, vector<1x32x32xf32>
    %391 = vector.shape_cast %390 : vector<1x32x32xf32> to vector<32x32xf32>
    %cst_178 = arith.constant dense<0.000000e+00> : vector<16x32xf32>
    %392 = tpu.matmul %380, %391, %cst_178 {dimension_numbers = #tpu.dot_dimension_numbers<[1], [0], [0], [1], [0, 0, 1, 1], [], []>} : vector<16x32xf32>, vector<32x32xf32>, vector<16x32xf32> -> vector<16x32xf32>
    %c1_179 = arith.constant 1 : index
    %c0_180 = arith.constant 0 : index
    %c0_181 = arith.constant 0 : index
    %393 = vector.load %arg9[%c1_179, %c0_180, %c0_181] : memref<3x1x32xf32, #tpu.memory_space<vmem>>, vector<1x1x32xf32>
    %394 = vector.shape_cast %393 : vector<1x1x32xf32> to vector<1x32xf32>
    %395 = vector.broadcast %394 : vector<1x32xf32> to vector<16x32xf32>
    %396 = arith.addf %392, %395 : vector<16x32xf32>
    %397 = vector.shape_cast %396 : vector<16x32xf32> to vector<8x2x32xf32>
    %c0_182 = arith.constant 0 : index
    %c0_183 = arith.constant 0 : index
    %c0_184 = arith.constant 0 : index
    %398 = vector.load %arg23[%c0_182, %c0_183, %c0_184] : memref<8x2x32xf32, #tpu.memory_space<vmem>>, vector<8x2x32xf32>
    tpu.vector_store %arg23[%c0_182, %c0_183, %c0_184], %397 {strides = array<i32>} : memref<8x2x32xf32, #tpu.memory_space<vmem>>, vector<8x2x32xf32>,
    %c2_185 = arith.constant 2 : index
    %c0_186 = arith.constant 0 : index
    %c0_187 = arith.constant 0 : index
    %399 = vector.load %arg7[%c2_185, %c0_186, %c0_187] : memref<3x32x32xf32, #tpu.memory_space<vmem>>, vector<1x32x32xf32>
    %400 = vector.shape_cast %399 : vector<1x32x32xf32> to vector<32x32xf32>
    %cst_188 = arith.constant dense<0.000000e+00> : vector<16x32xf32>
    %401 = tpu.matmul %380, %400, %cst_188 {dimension_numbers = #tpu.dot_dimension_numbers<[1], [0], [0], [1], [0, 0, 1, 1], [], []>} : vector<16x32xf32>, vector<32x32xf32>, vector<16x32xf32> -> vector<16x32xf32>
    %c2_189 = arith.constant 2 : index
    %c0_190 = arith.constant 0 : index
    %c0_191 = arith.constant 0 : index
    %402 = vector.load %arg9[%c2_189, %c0_190, %c0_191] : memref<3x1x32xf32, #tpu.memory_space<vmem>>, vector<1x1x32xf32>
    %403 = vector.shape_cast %402 : vector<1x1x32xf32> to vector<1x32xf32>
    %404 = vector.broadcast %403 : vector<1x32xf32> to vector<16x32xf32>
    %405 = arith.addf %401, %404 : vector<16x32xf32>
    %406 = vector.shape_cast %405 : vector<16x32xf32> to vector<8x2x32xf32>
    %c0_192 = arith.constant 0 : index
    %c0_193 = arith.constant 0 : index
    %c0_194 = arith.constant 0 : index
    %407 = vector.load %arg24[%c0_192, %c0_193, %c0_194] : memref<8x2x32xf32, #tpu.memory_space<vmem>>, vector<8x2x32xf32>
    tpu.vector_store %arg24[%c0_192, %c0_193, %c0_194], %406 {strides = array<i32>} : memref<8x2x32xf32, #tpu.memory_space<vmem>>, vector<8x2x32xf32>,
    %c0_195 = arith.constant 0 : index
    %c0_196 = arith.constant 0 : index
    %c0_197 = arith.constant 0 : index
    %408 = vector.load %arg8[%c0_195, %c0_196, %c0_197] : memref<3x32x32xf32, #tpu.memory_space<vmem>>, vector<1x32x32xf32>
    %409 = vector.shape_cast %408 : vector<1x32x32xf32> to vector<32x32xf32>
    %c1_198 = arith.constant 1 : index
    %c0_199 = arith.constant 0 : index
    %c0_200 = arith.constant 0 : index
    %410 = vector.load %arg8[%c1_198, %c0_199, %c0_200] : memref<3x32x32xf32, #tpu.memory_space<vmem>>, vector<1x32x32xf32>
    %411 = vector.shape_cast %410 : vector<1x32x32xf32> to vector<32x32xf32>
    %c2_201 = arith.constant 2 : index
    %c0_202 = arith.constant 0 : index
    %c0_203 = arith.constant 0 : index
    %412 = vector.load %arg8[%c2_201, %c0_202, %c0_203] : memref<3x32x32xf32, #tpu.memory_space<vmem>>, vector<1x32x32xf32>
    %413 = vector.shape_cast %412 : vector<1x32x32xf32> to vector<32x32xf32>
    %c0_204 = arith.constant 0 : index
    %c0_205 = arith.constant 0 : index
    %c0_206 = arith.constant 0 : index
    %414 = vector.load %arg10[%c0_204, %c0_205, %c0_206] : memref<3x1x32xf32, #tpu.memory_space<vmem>>, vector<1x1x32xf32>
    %415 = vector.shape_cast %414 : vector<1x1x32xf32> to vector<1x32xf32>
    %c1_207 = arith.constant 1 : index
    %c0_208 = arith.constant 0 : index
    %c0_209 = arith.constant 0 : index
    %416 = vector.load %arg10[%c1_207, %c0_208, %c0_209] : memref<3x1x32xf32, #tpu.memory_space<vmem>>, vector<1x1x32xf32>
    %417 = vector.shape_cast %416 : vector<1x1x32xf32> to vector<1x32xf32>
    %c2_210 = arith.constant 2 : index
    %c0_211 = arith.constant 0 : index
    %c0_212 = arith.constant 0 : index
    %418 = vector.load %arg10[%c2_210, %c0_211, %c0_212] : memref<3x1x32xf32, #tpu.memory_space<vmem>>, vector<1x1x32xf32>
    %419 = vector.shape_cast %418 : vector<1x1x32xf32> to vector<1x32xf32>
    %c1_213 = arith.constant 1 : index
    %c0_214 = arith.constant 0 : index
    %c0_215 = arith.constant 0 : index
    %420 = vector.load %arg2[%c1_213, %c0_214, %c0_215] : memref<2x2x32xf32, #tpu.memory_space<vmem>>, vector<1x2x32xf32>
    %421 = vector.shape_cast %420 : vector<1x2x32xf32> to vector<2x32xf32>
    %c0_i32_216 = arith.constant 0 : i32
    %cst_217 = arith.constant dense<0.000000e+00> : vector<2x32xf32>
    %422 = tpu.matmul %421, %409, %cst_217 {dimension_numbers = #tpu.dot_dimension_numbers<[1], [0], [0], [1], [0, 0, 1, 1], [], []>} : vector<2x32xf32>, vector<32x32xf32>, vector<2x32xf32> -> vector<2x32xf32>
    %423 = vector.broadcast %415 : vector<1x32xf32> to vector<2x32xf32>
    %424 = arith.addf %422, %423 : vector<2x32xf32>
    %cst_218 = arith.constant dense<0.000000e+00> : vector<2x32xf32>
    %425 = tpu.matmul %421, %411, %cst_218 {dimension_numbers = #tpu.dot_dimension_numbers<[1], [0], [0], [1], [0, 0, 1, 1], [], []>} : vector<2x32xf32>, vector<32x32xf32>, vector<2x32xf32> -> vector<2x32xf32>
    %426 = vector.broadcast %417 : vector<1x32xf32> to vector<2x32xf32>
    %427 = arith.addf %425, %426 : vector<2x32xf32>
    %cst_219 = arith.constant dense<0.000000e+00> : vector<2x32xf32>
    %428 = tpu.matmul %421, %413, %cst_219 {dimension_numbers = #tpu.dot_dimension_numbers<[1], [0], [0], [1], [0, 0, 1, 1], [], []>} : vector<2x32xf32>, vector<32x32xf32>, vector<2x32xf32> -> vector<2x32xf32>
    %429 = vector.broadcast %419 : vector<1x32xf32> to vector<2x32xf32>
    %430 = arith.addf %428, %429 : vector<2x32xf32>
    %431 = arith.index_cast %c0_i32_216 : i32 to index
    %c0_220 = arith.constant 0 : index
    %c0_221 = arith.constant 0 : index
    %432 = vector.load %arg22[%431, %c0_220, %c0_221] : memref<8x2x32xf32, #tpu.memory_space<vmem>>, vector<1x2x32xf32>
    %433 = vector.shape_cast %432 : vector<1x2x32xf32> to vector<2x32xf32>
    %434 = arith.addf %433, %424 : vector<2x32xf32>
    %435 = arith.negf %434 : vector<2x32xf32>
    %436 = math.exp %435 : vector<2x32xf32>
    %cst_222 = arith.constant 1.000000e+00 : f32
    %437 = vector.broadcast %cst_222 : f32 to vector<2x32xf32>
    %438 = arith.addf %437, %436 : vector<2x32xf32>
    %439 = arith.divf %437, %438 : vector<2x32xf32>
    %440 = arith.index_cast %c0_i32_216 : i32 to index
    %c0_223 = arith.constant 0 : index
    %c0_224 = arith.constant 0 : index
    %441 = vector.load %arg23[%440, %c0_223, %c0_224] : memref<8x2x32xf32, #tpu.memory_space<vmem>>, vector<1x2x32xf32>
    %442 = vector.shape_cast %441 : vector<1x2x32xf32> to vector<2x32xf32>
    %443 = arith.addf %442, %427 : vector<2x32xf32>
    %444 = arith.negf %443 : vector<2x32xf32>
    %445 = math.exp %444 : vector<2x32xf32>
    %cst_225 = arith.constant 1.000000e+00 : f32
    %446 = vector.broadcast %cst_225 : f32 to vector<2x32xf32>
    %447 = arith.addf %446, %445 : vector<2x32xf32>
    %448 = arith.divf %446, %447 : vector<2x32xf32>
    %449 = arith.index_cast %c0_i32_216 : i32 to index
    %c0_226 = arith.constant 0 : index
    %c0_227 = arith.constant 0 : index
    %450 = vector.load %arg24[%449, %c0_226, %c0_227] : memref<8x2x32xf32, #tpu.memory_space<vmem>>, vector<1x2x32xf32>
    %451 = vector.shape_cast %450 : vector<1x2x32xf32> to vector<2x32xf32>
    %452 = arith.mulf %439, %430 : vector<2x32xf32>
    %453 = arith.addf %451, %452 : vector<2x32xf32>
    %454 = math.tanh %453 : vector<2x32xf32>
    %cst_228 = arith.constant 1.000000e+00 : f32
    %455 = vector.broadcast %cst_228 : f32 to vector<2x32xf32>
    %456 = arith.subf %455, %448 : vector<2x32xf32>
    %457 = arith.mulf %456, %454 : vector<2x32xf32>
    %458 = arith.mulf %448, %421 : vector<2x32xf32>
    %459 = arith.addf %457, %458 : vector<2x32xf32>
    %460 = arith.index_cast %c0_i32_216 : i32 to index
    %c0_229 = arith.constant 0 : index
    %c0_230 = arith.constant 0 : index
    %461 = vector.load %arg25[%460, %c0_229, %c0_230] : memref<8x2x32xf32, #tpu.memory_space<vmem>>, vector<1x2x32xf32>
    %462 = vector.shape_cast %461 : vector<1x2x32xf32> to vector<2x32xf32>
    %463 = vector.shape_cast %459 : vector<2x32xf32> to vector<1x2x32xf32>
    tpu.vector_store %arg25[%460, %c0_229, %c0_230], %463 {strides = array<i32>} : memref<8x2x32xf32, #tpu.memory_space<vmem>>, vector<1x2x32xf32>,
    %c1_i32_231 = arith.constant 1 : i32
    %cst_232 = arith.constant dense<0.000000e+00> : vector<2x32xf32>
    %464 = tpu.matmul %459, %409, %cst_232 {dimension_numbers = #tpu.dot_dimension_numbers<[1], [0], [0], [1], [0, 0, 1, 1], [], []>} : vector<2x32xf32>, vector<32x32xf32>, vector<2x32xf32> -> vector<2x32xf32>
    %465 = vector.broadcast %415 : vector<1x32xf32> to vector<2x32xf32>
    %466 = arith.addf %464, %465 : vector<2x32xf32>
    %cst_233 = arith.constant dense<0.000000e+00> : vector<2x32xf32>
    %467 = tpu.matmul %459, %411, %cst_233 {dimension_numbers = #tpu.dot_dimension_numbers<[1], [0], [0], [1], [0, 0, 1, 1], [], []>} : vector<2x32xf32>, vector<32x32xf32>, vector<2x32xf32> -> vector<2x32xf32>
    %468 = vector.broadcast %417 : vector<1x32xf32> to vector<2x32xf32>
    %469 = arith.addf %467, %468 : vector<2x32xf32>
    %cst_234 = arith.constant dense<0.000000e+00> : vector<2x32xf32>
    %470 = tpu.matmul %459, %413, %cst_234 {dimension_numbers = #tpu.dot_dimension_numbers<[1], [0], [0], [1], [0, 0, 1, 1], [], []>} : vector<2x32xf32>, vector<32x32xf32>, vector<2x32xf32> -> vector<2x32xf32>
    %471 = vector.broadcast %419 : vector<1x32xf32> to vector<2x32xf32>
    %472 = arith.addf %470, %471 : vector<2x32xf32>
    %473 = arith.index_cast %c1_i32_231 : i32 to index
    %c0_235 = arith.constant 0 : index
    %c0_236 = arith.constant 0 : index
    %474 = vector.load %arg22[%473, %c0_235, %c0_236] : memref<8x2x32xf32, #tpu.memory_space<vmem>>, vector<1x2x32xf32>
    %475 = vector.shape_cast %474 : vector<1x2x32xf32> to vector<2x32xf32>
    %476 = arith.addf %475, %466 : vector<2x32xf32>
    %477 = arith.negf %476 : vector<2x32xf32>
    %478 = math.exp %477 : vector<2x32xf32>
    %cst_237 = arith.constant 1.000000e+00 : f32
    %479 = vector.broadcast %cst_237 : f32 to vector<2x32xf32>
    %480 = arith.addf %479, %478 : vector<2x32xf32>
    %481 = arith.divf %479, %480 : vector<2x32xf32>
    %482 = arith.index_cast %c1_i32_231 : i32 to index
    %c0_238 = arith.constant 0 : index
    %c0_239 = arith.constant 0 : index
    %483 = vector.load %arg23[%482, %c0_238, %c0_239] : memref<8x2x32xf32, #tpu.memory_space<vmem>>, vector<1x2x32xf32>
    %484 = vector.shape_cast %483 : vector<1x2x32xf32> to vector<2x32xf32>
    %485 = arith.addf %484, %469 : vector<2x32xf32>
    %486 = arith.negf %485 : vector<2x32xf32>
    %487 = math.exp %486 : vector<2x32xf32>
    %cst_240 = arith.constant 1.000000e+00 : f32
    %488 = vector.broadcast %cst_240 : f32 to vector<2x32xf32>
    %489 = arith.addf %488, %487 : vector<2x32xf32>
    %490 = arith.divf %488, %489 : vector<2x32xf32>
    %491 = arith.index_cast %c1_i32_231 : i32 to index
    %c0_241 = arith.constant 0 : index
    %c0_242 = arith.constant 0 : index
    %492 = vector.load %arg24[%491, %c0_241, %c0_242] : memref<8x2x32xf32, #tpu.memory_space<vmem>>, vector<1x2x32xf32>
    %493 = vector.shape_cast %492 : vector<1x2x32xf32> to vector<2x32xf32>
    %494 = arith.mulf %481, %472 : vector<2x32xf32>
    %495 = arith.addf %493, %494 : vector<2x32xf32>
    %496 = math.tanh %495 : vector<2x32xf32>
    %cst_243 = arith.constant 1.000000e+00 : f32
    %497 = vector.broadcast %cst_243 : f32 to vector<2x32xf32>
    %498 = arith.subf %497, %490 : vector<2x32xf32>
    %499 = arith.mulf %498, %496 : vector<2x32xf32>
    %500 = arith.mulf %490, %459 : vector<2x32xf32>
    %501 = arith.addf %499, %500 : vector<2x32xf32>
    %502 = arith.index_cast %c1_i32_231 : i32 to index
    %c0_244 = arith.constant 0 : index
    %c0_245 = arith.constant 0 : index
    %503 = vector.load %arg25[%502, %c0_244, %c0_245] : memref<8x2x32xf32, #tpu.memory_space<vmem>>, vector<1x2x32xf32>
    %504 = vector.shape_cast %503 : vector<1x2x32xf32> to vector<2x32xf32>
    %505 = vector.shape_cast %501 : vector<2x32xf32> to vector<1x2x32xf32>
    tpu.vector_store %arg25[%502, %c0_244, %c0_245], %505 {strides = array<i32>} : memref<8x2x32xf32, #tpu.memory_space<vmem>>, vector<1x2x32xf32>,
    %c2_i32_246 = arith.constant 2 : i32
    %cst_247 = arith.constant dense<0.000000e+00> : vector<2x32xf32>
    %506 = tpu.matmul %501, %409, %cst_247 {dimension_numbers = #tpu.dot_dimension_numbers<[1], [0], [0], [1], [0, 0, 1, 1], [], []>} : vector<2x32xf32>, vector<32x32xf32>, vector<2x32xf32> -> vector<2x32xf32>
    %507 = vector.broadcast %415 : vector<1x32xf32> to vector<2x32xf32>
    %508 = arith.addf %506, %507 : vector<2x32xf32>
    %cst_248 = arith.constant dense<0.000000e+00> : vector<2x32xf32>
    %509 = tpu.matmul %501, %411, %cst_248 {dimension_numbers = #tpu.dot_dimension_numbers<[1], [0], [0], [1], [0, 0, 1, 1], [], []>} : vector<2x32xf32>, vector<32x32xf32>, vector<2x32xf32> -> vector<2x32xf32>
    %510 = vector.broadcast %417 : vector<1x32xf32> to vector<2x32xf32>
    %511 = arith.addf %509, %510 : vector<2x32xf32>
    %cst_249 = arith.constant dense<0.000000e+00> : vector<2x32xf32>
    %512 = tpu.matmul %501, %413, %cst_249 {dimension_numbers = #tpu.dot_dimension_numbers<[1], [0], [0], [1], [0, 0, 1, 1], [], []>} : vector<2x32xf32>, vector<32x32xf32>, vector<2x32xf32> -> vector<2x32xf32>
    %513 = vector.broadcast %419 : vector<1x32xf32> to vector<2x32xf32>
    %514 = arith.addf %512, %513 : vector<2x32xf32>
    %515 = arith.index_cast %c2_i32_246 : i32 to index
    %c0_250 = arith.constant 0 : index
    %c0_251 = arith.constant 0 : index
    %516 = vector.load %arg22[%515, %c0_250, %c0_251] : memref<8x2x32xf32, #tpu.memory_space<vmem>>, vector<1x2x32xf32>
    %517 = vector.shape_cast %516 : vector<1x2x32xf32> to vector<2x32xf32>
    %518 = arith.addf %517, %508 : vector<2x32xf32>
    %519 = arith.negf %518 : vector<2x32xf32>
    %520 = math.exp %519 : vector<2x32xf32>
    %cst_252 = arith.constant 1.000000e+00 : f32
    %521 = vector.broadcast %cst_252 : f32 to vector<2x32xf32>
    %522 = arith.addf %521, %520 : vector<2x32xf32>
    %523 = arith.divf %521, %522 : vector<2x32xf32>
    %524 = arith.index_cast %c2_i32_246 : i32 to index
    %c0_253 = arith.constant 0 : index
    %c0_254 = arith.constant 0 : index
    %525 = vector.load %arg23[%524, %c0_253, %c0_254] : memref<8x2x32xf32, #tpu.memory_space<vmem>>, vector<1x2x32xf32>
    %526 = vector.shape_cast %525 : vector<1x2x32xf32> to vector<2x32xf32>
    %527 = arith.addf %526, %511 : vector<2x32xf32>
    %528 = arith.negf %527 : vector<2x32xf32>
    %529 = math.exp %528 : vector<2x32xf32>
    %cst_255 = arith.constant 1.000000e+00 : f32
    %530 = vector.broadcast %cst_255 : f32 to vector<2x32xf32>
    %531 = arith.addf %530, %529 : vector<2x32xf32>
    %532 = arith.divf %530, %531 : vector<2x32xf32>
    %533 = arith.index_cast %c2_i32_246 : i32 to index
    %c0_256 = arith.constant 0 : index
    %c0_257 = arith.constant 0 : index
    %534 = vector.load %arg24[%533, %c0_256, %c0_257] : memref<8x2x32xf32, #tpu.memory_space<vmem>>, vector<1x2x32xf32>
    %535 = vector.shape_cast %534 : vector<1x2x32xf32> to vector<2x32xf32>
    %536 = arith.mulf %523, %514 : vector<2x32xf32>
    %537 = arith.addf %535, %536 : vector<2x32xf32>
    %538 = math.tanh %537 : vector<2x32xf32>
    %cst_258 = arith.constant 1.000000e+00 : f32
    %539 = vector.broadcast %cst_258 : f32 to vector<2x32xf32>
    %540 = arith.subf %539, %532 : vector<2x32xf32>
    %541 = arith.mulf %540, %538 : vector<2x32xf32>
    %542 = arith.mulf %532, %501 : vector<2x32xf32>
    %543 = arith.addf %541, %542 : vector<2x32xf32>
    %544 = arith.index_cast %c2_i32_246 : i32 to index
    %c0_259 = arith.constant 0 : index
    %c0_260 = arith.constant 0 : index
    %545 = vector.load %arg25[%544, %c0_259, %c0_260] : memref<8x2x32xf32, #tpu.memory_space<vmem>>, vector<1x2x32xf32>
    %546 = vector.shape_cast %545 : vector<1x2x32xf32> to vector<2x32xf32>
    %547 = vector.shape_cast %543 : vector<2x32xf32> to vector<1x2x32xf32>
    tpu.vector_store %arg25[%544, %c0_259, %c0_260], %547 {strides = array<i32>} : memref<8x2x32xf32, #tpu.memory_space<vmem>>, vector<1x2x32xf32>,
    %c3_i32_261 = arith.constant 3 : i32
    %cst_262 = arith.constant dense<0.000000e+00> : vector<2x32xf32>
    %548 = tpu.matmul %543, %409, %cst_262 {dimension_numbers = #tpu.dot_dimension_numbers<[1], [0], [0], [1], [0, 0, 1, 1], [], []>} : vector<2x32xf32>, vector<32x32xf32>, vector<2x32xf32> -> vector<2x32xf32>
    %549 = vector.broadcast %415 : vector<1x32xf32> to vector<2x32xf32>
    %550 = arith.addf %548, %549 : vector<2x32xf32>
    %cst_263 = arith.constant dense<0.000000e+00> : vector<2x32xf32>
    %551 = tpu.matmul %543, %411, %cst_263 {dimension_numbers = #tpu.dot_dimension_numbers<[1], [0], [0], [1], [0, 0, 1, 1], [], []>} : vector<2x32xf32>, vector<32x32xf32>, vector<2x32xf32> -> vector<2x32xf32>
    %552 = vector.broadcast %417 : vector<1x32xf32> to vector<2x32xf32>
    %553 = arith.addf %551, %552 : vector<2x32xf32>
    %cst_264 = arith.constant dense<0.000000e+00> : vector<2x32xf32>
    %554 = tpu.matmul %543, %413, %cst_264 {dimension_numbers = #tpu.dot_dimension_numbers<[1], [0], [0], [1], [0, 0, 1, 1], [], []>} : vector<2x32xf32>, vector<32x32xf32>, vector<2x32xf32> -> vector<2x32xf32>
    %555 = vector.broadcast %419 : vector<1x32xf32> to vector<2x32xf32>
    %556 = arith.addf %554, %555 : vector<2x32xf32>
    %557 = arith.index_cast %c3_i32_261 : i32 to index
    %c0_265 = arith.constant 0 : index
    %c0_266 = arith.constant 0 : index
    %558 = vector.load %arg22[%557, %c0_265, %c0_266] : memref<8x2x32xf32, #tpu.memory_space<vmem>>, vector<1x2x32xf32>
    %559 = vector.shape_cast %558 : vector<1x2x32xf32> to vector<2x32xf32>
    %560 = arith.addf %559, %550 : vector<2x32xf32>
    %561 = arith.negf %560 : vector<2x32xf32>
    %562 = math.exp %561 : vector<2x32xf32>
    %cst_267 = arith.constant 1.000000e+00 : f32
    %563 = vector.broadcast %cst_267 : f32 to vector<2x32xf32>
    %564 = arith.addf %563, %562 : vector<2x32xf32>
    %565 = arith.divf %563, %564 : vector<2x32xf32>
    %566 = arith.index_cast %c3_i32_261 : i32 to index
    %c0_268 = arith.constant 0 : index
    %c0_269 = arith.constant 0 : index
    %567 = vector.load %arg23[%566, %c0_268, %c0_269] : memref<8x2x32xf32, #tpu.memory_space<vmem>>, vector<1x2x32xf32>
    %568 = vector.shape_cast %567 : vector<1x2x32xf32> to vector<2x32xf32>
    %569 = arith.addf %568, %553 : vector<2x32xf32>
    %570 = arith.negf %569 : vector<2x32xf32>
    %571 = math.exp %570 : vector<2x32xf32>
    %cst_270 = arith.constant 1.000000e+00 : f32
    %572 = vector.broadcast %cst_270 : f32 to vector<2x32xf32>
    %573 = arith.addf %572, %571 : vector<2x32xf32>
    %574 = arith.divf %572, %573 : vector<2x32xf32>
    %575 = arith.index_cast %c3_i32_261 : i32 to index
    %c0_271 = arith.constant 0 : index
    %c0_272 = arith.constant 0 : index
    %576 = vector.load %arg24[%575, %c0_271, %c0_272] : memref<8x2x32xf32, #tpu.memory_space<vmem>>, vector<1x2x32xf32>
    %577 = vector.shape_cast %576 : vector<1x2x32xf32> to vector<2x32xf32>
    %578 = arith.mulf %565, %556 : vector<2x32xf32>
    %579 = arith.addf %577, %578 : vector<2x32xf32>
    %580 = math.tanh %579 : vector<2x32xf32>
    %cst_273 = arith.constant 1.000000e+00 : f32
    %581 = vector.broadcast %cst_273 : f32 to vector<2x32xf32>
    %582 = arith.subf %581, %574 : vector<2x32xf32>
    %583 = arith.mulf %582, %580 : vector<2x32xf32>
    %584 = arith.mulf %574, %543 : vector<2x32xf32>
    %585 = arith.addf %583, %584 : vector<2x32xf32>
    %586 = arith.index_cast %c3_i32_261 : i32 to index
    %c0_274 = arith.constant 0 : index
    %c0_275 = arith.constant 0 : index
    %587 = vector.load %arg25[%586, %c0_274, %c0_275] : memref<8x2x32xf32, #tpu.memory_space<vmem>>, vector<1x2x32xf32>
    %588 = vector.shape_cast %587 : vector<1x2x32xf32> to vector<2x32xf32>
    %589 = vector.shape_cast %585 : vector<2x32xf32> to vector<1x2x32xf32>
    tpu.vector_store %arg25[%586, %c0_274, %c0_275], %589 {strides = array<i32>} : memref<8x2x32xf32, #tpu.memory_space<vmem>>, vector<1x2x32xf32>,
    %c4_i32_276 = arith.constant 4 : i32
    %cst_277 = arith.constant dense<0.000000e+00> : vector<2x32xf32>
    %590 = tpu.matmul %585, %409, %cst_277 {dimension_numbers = #tpu.dot_dimension_numbers<[1], [0], [0], [1], [0, 0, 1, 1], [], []>} : vector<2x32xf32>, vector<32x32xf32>, vector<2x32xf32> -> vector<2x32xf32>
    %591 = vector.broadcast %415 : vector<1x32xf32> to vector<2x32xf32>
    %592 = arith.addf %590, %591 : vector<2x32xf32>
    %cst_278 = arith.constant dense<0.000000e+00> : vector<2x32xf32>
    %593 = tpu.matmul %585, %411, %cst_278 {dimension_numbers = #tpu.dot_dimension_numbers<[1], [0], [0], [1], [0, 0, 1, 1], [], []>} : vector<2x32xf32>, vector<32x32xf32>, vector<2x32xf32> -> vector<2x32xf32>
    %594 = vector.broadcast %417 : vector<1x32xf32> to vector<2x32xf32>
    %595 = arith.addf %593, %594 : vector<2x32xf32>
    %cst_279 = arith.constant dense<0.000000e+00> : vector<2x32xf32>
    %596 = tpu.matmul %585, %413, %cst_279 {dimension_numbers = #tpu.dot_dimension_numbers<[1], [0], [0], [1], [0, 0, 1, 1], [], []>} : vector<2x32xf32>, vector<32x32xf32>, vector<2x32xf32> -> vector<2x32xf32>
    %597 = vector.broadcast %419 : vector<1x32xf32> to vector<2x32xf32>
    %598 = arith.addf %596, %597 : vector<2x32xf32>
    %599 = arith.index_cast %c4_i32_276 : i32 to index
    %c0_280 = arith.constant 0 : index
    %c0_281 = arith.constant 0 : index
    %600 = vector.load %arg22[%599, %c0_280, %c0_281] : memref<8x2x32xf32, #tpu.memory_space<vmem>>, vector<1x2x32xf32>
    %601 = vector.shape_cast %600 : vector<1x2x32xf32> to vector<2x32xf32>
    %602 = arith.addf %601, %592 : vector<2x32xf32>
    %603 = arith.negf %602 : vector<2x32xf32>
    %604 = math.exp %603 : vector<2x32xf32>
    %cst_282 = arith.constant 1.000000e+00 : f32
    %605 = vector.broadcast %cst_282 : f32 to vector<2x32xf32>
    %606 = arith.addf %605, %604 : vector<2x32xf32>
    %607 = arith.divf %605, %606 : vector<2x32xf32>
    %608 = arith.index_cast %c4_i32_276 : i32 to index
    %c0_283 = arith.constant 0 : index
    %c0_284 = arith.constant 0 : index
    %609 = vector.load %arg23[%608, %c0_283, %c0_284] : memref<8x2x32xf32, #tpu.memory_space<vmem>>, vector<1x2x32xf32>
    %610 = vector.shape_cast %609 : vector<1x2x32xf32> to vector<2x32xf32>
    %611 = arith.addf %610, %595 : vector<2x32xf32>
    %612 = arith.negf %611 : vector<2x32xf32>
    %613 = math.exp %612 : vector<2x32xf32>
    %cst_285 = arith.constant 1.000000e+00 : f32
    %614 = vector.broadcast %cst_285 : f32 to vector<2x32xf32>
    %615 = arith.addf %614, %613 : vector<2x32xf32>
    %616 = arith.divf %614, %615 : vector<2x32xf32>
    %617 = arith.index_cast %c4_i32_276 : i32 to index
    %c0_286 = arith.constant 0 : index
    %c0_287 = arith.constant 0 : index
    %618 = vector.load %arg24[%617, %c0_286, %c0_287] : memref<8x2x32xf32, #tpu.memory_space<vmem>>, vector<1x2x32xf32>
    %619 = vector.shape_cast %618 : vector<1x2x32xf32> to vector<2x32xf32>
    %620 = arith.mulf %607, %598 : vector<2x32xf32>
    %621 = arith.addf %619, %620 : vector<2x32xf32>
    %622 = math.tanh %621 : vector<2x32xf32>
    %cst_288 = arith.constant 1.000000e+00 : f32
    %623 = vector.broadcast %cst_288 : f32 to vector<2x32xf32>
    %624 = arith.subf %623, %616 : vector<2x32xf32>
    %625 = arith.mulf %624, %622 : vector<2x32xf32>
    %626 = arith.mulf %616, %585 : vector<2x32xf32>
    %627 = arith.addf %625, %626 : vector<2x32xf32>
    %628 = arith.index_cast %c4_i32_276 : i32 to index
    %c0_289 = arith.constant 0 : index
    %c0_290 = arith.constant 0 : index
    %629 = vector.load %arg25[%628, %c0_289, %c0_290] : memref<8x2x32xf32, #tpu.memory_space<vmem>>, vector<1x2x32xf32>
    %630 = vector.shape_cast %629 : vector<1x2x32xf32> to vector<2x32xf32>
    %631 = vector.shape_cast %627 : vector<2x32xf32> to vector<1x2x32xf32>
    tpu.vector_store %arg25[%628, %c0_289, %c0_290], %631 {strides = array<i32>} : memref<8x2x32xf32, #tpu.memory_space<vmem>>, vector<1x2x32xf32>,
    %c5_i32_291 = arith.constant 5 : i32
    %cst_292 = arith.constant dense<0.000000e+00> : vector<2x32xf32>
    %632 = tpu.matmul %627, %409, %cst_292 {dimension_numbers = #tpu.dot_dimension_numbers<[1], [0], [0], [1], [0, 0, 1, 1], [], []>} : vector<2x32xf32>, vector<32x32xf32>, vector<2x32xf32> -> vector<2x32xf32>
    %633 = vector.broadcast %415 : vector<1x32xf32> to vector<2x32xf32>
    %634 = arith.addf %632, %633 : vector<2x32xf32>
    %cst_293 = arith.constant dense<0.000000e+00> : vector<2x32xf32>
    %635 = tpu.matmul %627, %411, %cst_293 {dimension_numbers = #tpu.dot_dimension_numbers<[1], [0], [0], [1], [0, 0, 1, 1], [], []>} : vector<2x32xf32>, vector<32x32xf32>, vector<2x32xf32> -> vector<2x32xf32>
    %636 = vector.broadcast %417 : vector<1x32xf32> to vector<2x32xf32>
    %637 = arith.addf %635, %636 : vector<2x32xf32>
    %cst_294 = arith.constant dense<0.000000e+00> : vector<2x32xf32>
    %638 = tpu.matmul %627, %413, %cst_294 {dimension_numbers = #tpu.dot_dimension_numbers<[1], [0], [0], [1], [0, 0, 1, 1], [], []>} : vector<2x32xf32>, vector<32x32xf32>, vector<2x32xf32> -> vector<2x32xf32>
    %639 = vector.broadcast %419 : vector<1x32xf32> to vector<2x32xf32>
    %640 = arith.addf %638, %639 : vector<2x32xf32>
    %641 = arith.index_cast %c5_i32_291 : i32 to index
    %c0_295 = arith.constant 0 : index
    %c0_296 = arith.constant 0 : index
    %642 = vector.load %arg22[%641, %c0_295, %c0_296] : memref<8x2x32xf32, #tpu.memory_space<vmem>>, vector<1x2x32xf32>
    %643 = vector.shape_cast %642 : vector<1x2x32xf32> to vector<2x32xf32>
    %644 = arith.addf %643, %634 : vector<2x32xf32>
    %645 = arith.negf %644 : vector<2x32xf32>
    %646 = math.exp %645 : vector<2x32xf32>
    %cst_297 = arith.constant 1.000000e+00 : f32
    %647 = vector.broadcast %cst_297 : f32 to vector<2x32xf32>
    %648 = arith.addf %647, %646 : vector<2x32xf32>
    %649 = arith.divf %647, %648 : vector<2x32xf32>
    %650 = arith.index_cast %c5_i32_291 : i32 to index
    %c0_298 = arith.constant 0 : index
    %c0_299 = arith.constant 0 : index
    %651 = vector.load %arg23[%650, %c0_298, %c0_299] : memref<8x2x32xf32, #tpu.memory_space<vmem>>, vector<1x2x32xf32>
    %652 = vector.shape_cast %651 : vector<1x2x32xf32> to vector<2x32xf32>
    %653 = arith.addf %652, %637 : vector<2x32xf32>
    %654 = arith.negf %653 : vector<2x32xf32>
    %655 = math.exp %654 : vector<2x32xf32>
    %cst_300 = arith.constant 1.000000e+00 : f32
    %656 = vector.broadcast %cst_300 : f32 to vector<2x32xf32>
    %657 = arith.addf %656, %655 : vector<2x32xf32>
    %658 = arith.divf %656, %657 : vector<2x32xf32>
    %659 = arith.index_cast %c5_i32_291 : i32 to index
    %c0_301 = arith.constant 0 : index
    %c0_302 = arith.constant 0 : index
    %660 = vector.load %arg24[%659, %c0_301, %c0_302] : memref<8x2x32xf32, #tpu.memory_space<vmem>>, vector<1x2x32xf32>
    %661 = vector.shape_cast %660 : vector<1x2x32xf32> to vector<2x32xf32>
    %662 = arith.mulf %649, %640 : vector<2x32xf32>
    %663 = arith.addf %661, %662 : vector<2x32xf32>
    %664 = math.tanh %663 : vector<2x32xf32>
    %cst_303 = arith.constant 1.000000e+00 : f32
    %665 = vector.broadcast %cst_303 : f32 to vector<2x32xf32>
    %666 = arith.subf %665, %658 : vector<2x32xf32>
    %667 = arith.mulf %666, %664 : vector<2x32xf32>
    %668 = arith.mulf %658, %627 : vector<2x32xf32>
    %669 = arith.addf %667, %668 : vector<2x32xf32>
    %670 = arith.index_cast %c5_i32_291 : i32 to index
    %c0_304 = arith.constant 0 : index
    %c0_305 = arith.constant 0 : index
    %671 = vector.load %arg25[%670, %c0_304, %c0_305] : memref<8x2x32xf32, #tpu.memory_space<vmem>>, vector<1x2x32xf32>
    %672 = vector.shape_cast %671 : vector<1x2x32xf32> to vector<2x32xf32>
    %673 = vector.shape_cast %669 : vector<2x32xf32> to vector<1x2x32xf32>
    tpu.vector_store %arg25[%670, %c0_304, %c0_305], %673 {strides = array<i32>} : memref<8x2x32xf32, #tpu.memory_space<vmem>>, vector<1x2x32xf32>,
    %c6_i32_306 = arith.constant 6 : i32
    %cst_307 = arith.constant dense<0.000000e+00> : vector<2x32xf32>
    %674 = tpu.matmul %669, %409, %cst_307 {dimension_numbers = #tpu.dot_dimension_numbers<[1], [0], [0], [1], [0, 0, 1, 1], [], []>} : vector<2x32xf32>, vector<32x32xf32>, vector<2x32xf32> -> vector<2x32xf32>
    %675 = vector.broadcast %415 : vector<1x32xf32> to vector<2x32xf32>
    %676 = arith.addf %674, %675 : vector<2x32xf32>
    %cst_308 = arith.constant dense<0.000000e+00> : vector<2x32xf32>
    %677 = tpu.matmul %669, %411, %cst_308 {dimension_numbers = #tpu.dot_dimension_numbers<[1], [0], [0], [1], [0, 0, 1, 1], [], []>} : vector<2x32xf32>, vector<32x32xf32>, vector<2x32xf32> -> vector<2x32xf32>
    %678 = vector.broadcast %417 : vector<1x32xf32> to vector<2x32xf32>
    %679 = arith.addf %677, %678 : vector<2x32xf32>
    %cst_309 = arith.constant dense<0.000000e+00> : vector<2x32xf32>
    %680 = tpu.matmul %669, %413, %cst_309 {dimension_numbers = #tpu.dot_dimension_numbers<[1], [0], [0], [1], [0, 0, 1, 1], [], []>} : vector<2x32xf32>, vector<32x32xf32>, vector<2x32xf32> -> vector<2x32xf32>
    %681 = vector.broadcast %419 : vector<1x32xf32> to vector<2x32xf32>
    %682 = arith.addf %680, %681 : vector<2x32xf32>
    %683 = arith.index_cast %c6_i32_306 : i32 to index
    %c0_310 = arith.constant 0 : index
    %c0_311 = arith.constant 0 : index
    %684 = vector.load %arg22[%683, %c0_310, %c0_311] : memref<8x2x32xf32, #tpu.memory_space<vmem>>, vector<1x2x32xf32>
    %685 = vector.shape_cast %684 : vector<1x2x32xf32> to vector<2x32xf32>
    %686 = arith.addf %685, %676 : vector<2x32xf32>
    %687 = arith.negf %686 : vector<2x32xf32>
    %688 = math.exp %687 : vector<2x32xf32>
    %cst_312 = arith.constant 1.000000e+00 : f32
    %689 = vector.broadcast %cst_312 : f32 to vector<2x32xf32>
    %690 = arith.addf %689, %688 : vector<2x32xf32>
    %691 = arith.divf %689, %690 : vector<2x32xf32>
    %692 = arith.index_cast %c6_i32_306 : i32 to index
    %c0_313 = arith.constant 0 : index
    %c0_314 = arith.constant 0 : index
    %693 = vector.load %arg23[%692, %c0_313, %c0_314] : memref<8x2x32xf32, #tpu.memory_space<vmem>>, vector<1x2x32xf32>
    %694 = vector.shape_cast %693 : vector<1x2x32xf32> to vector<2x32xf32>
    %695 = arith.addf %694, %679 : vector<2x32xf32>
    %696 = arith.negf %695 : vector<2x32xf32>
    %697 = math.exp %696 : vector<2x32xf32>
    %cst_315 = arith.constant 1.000000e+00 : f32
    %698 = vector.broadcast %cst_315 : f32 to vector<2x32xf32>
    %699 = arith.addf %698, %697 : vector<2x32xf32>
    %700 = arith.divf %698, %699 : vector<2x32xf32>
    %701 = arith.index_cast %c6_i32_306 : i32 to index
    %c0_316 = arith.constant 0 : index
    %c0_317 = arith.constant 0 : index
    %702 = vector.load %arg24[%701, %c0_316, %c0_317] : memref<8x2x32xf32, #tpu.memory_space<vmem>>, vector<1x2x32xf32>
    %703 = vector.shape_cast %702 : vector<1x2x32xf32> to vector<2x32xf32>
    %704 = arith.mulf %691, %682 : vector<2x32xf32>
    %705 = arith.addf %703, %704 : vector<2x32xf32>
    %706 = math.tanh %705 : vector<2x32xf32>
    %cst_318 = arith.constant 1.000000e+00 : f32
    %707 = vector.broadcast %cst_318 : f32 to vector<2x32xf32>
    %708 = arith.subf %707, %700 : vector<2x32xf32>
    %709 = arith.mulf %708, %706 : vector<2x32xf32>
    %710 = arith.mulf %700, %669 : vector<2x32xf32>
    %711 = arith.addf %709, %710 : vector<2x32xf32>
    %712 = arith.index_cast %c6_i32_306 : i32 to index
    %c0_319 = arith.constant 0 : index
    %c0_320 = arith.constant 0 : index
    %713 = vector.load %arg25[%712, %c0_319, %c0_320] : memref<8x2x32xf32, #tpu.memory_space<vmem>>, vector<1x2x32xf32>
    %714 = vector.shape_cast %713 : vector<1x2x32xf32> to vector<2x32xf32>
    %715 = vector.shape_cast %711 : vector<2x32xf32> to vector<1x2x32xf32>
    tpu.vector_store %arg25[%712, %c0_319, %c0_320], %715 {strides = array<i32>} : memref<8x2x32xf32, #tpu.memory_space<vmem>>, vector<1x2x32xf32>,
    %c7_i32_321 = arith.constant 7 : i32
    %cst_322 = arith.constant dense<0.000000e+00> : vector<2x32xf32>
    %716 = tpu.matmul %711, %409, %cst_322 {dimension_numbers = #tpu.dot_dimension_numbers<[1], [0], [0], [1], [0, 0, 1, 1], [], []>} : vector<2x32xf32>, vector<32x32xf32>, vector<2x32xf32> -> vector<2x32xf32>
    %717 = vector.broadcast %415 : vector<1x32xf32> to vector<2x32xf32>
    %718 = arith.addf %716, %717 : vector<2x32xf32>
    %cst_323 = arith.constant dense<0.000000e+00> : vector<2x32xf32>
    %719 = tpu.matmul %711, %411, %cst_323 {dimension_numbers = #tpu.dot_dimension_numbers<[1], [0], [0], [1], [0, 0, 1, 1], [], []>} : vector<2x32xf32>, vector<32x32xf32>, vector<2x32xf32> -> vector<2x32xf32>
    %720 = vector.broadcast %417 : vector<1x32xf32> to vector<2x32xf32>
    %721 = arith.addf %719, %720 : vector<2x32xf32>
    %cst_324 = arith.constant dense<0.000000e+00> : vector<2x32xf32>
    %722 = tpu.matmul %711, %413, %cst_324 {dimension_numbers = #tpu.dot_dimension_numbers<[1], [0], [0], [1], [0, 0, 1, 1], [], []>} : vector<2x32xf32>, vector<32x32xf32>, vector<2x32xf32> -> vector<2x32xf32>
    %723 = vector.broadcast %419 : vector<1x32xf32> to vector<2x32xf32>
    %724 = arith.addf %722, %723 : vector<2x32xf32>
    %725 = arith.index_cast %c7_i32_321 : i32 to index
    %c0_325 = arith.constant 0 : index
    %c0_326 = arith.constant 0 : index
    %726 = vector.load %arg22[%725, %c0_325, %c0_326] : memref<8x2x32xf32, #tpu.memory_space<vmem>>, vector<1x2x32xf32>
    %727 = vector.shape_cast %726 : vector<1x2x32xf32> to vector<2x32xf32>
    %728 = arith.addf %727, %718 : vector<2x32xf32>
    %729 = arith.negf %728 : vector<2x32xf32>
    %730 = math.exp %729 : vector<2x32xf32>
    %cst_327 = arith.constant 1.000000e+00 : f32
    %731 = vector.broadcast %cst_327 : f32 to vector<2x32xf32>
    %732 = arith.addf %731, %730 : vector<2x32xf32>
    %733 = arith.divf %731, %732 : vector<2x32xf32>
    %734 = arith.index_cast %c7_i32_321 : i32 to index
    %c0_328 = arith.constant 0 : index
    %c0_329 = arith.constant 0 : index
    %735 = vector.load %arg23[%734, %c0_328, %c0_329] : memref<8x2x32xf32, #tpu.memory_space<vmem>>, vector<1x2x32xf32>
    %736 = vector.shape_cast %735 : vector<1x2x32xf32> to vector<2x32xf32>
    %737 = arith.addf %736, %721 : vector<2x32xf32>
    %738 = arith.negf %737 : vector<2x32xf32>
    %739 = math.exp %738 : vector<2x32xf32>
    %cst_330 = arith.constant 1.000000e+00 : f32
    %740 = vector.broadcast %cst_330 : f32 to vector<2x32xf32>
    %741 = arith.addf %740, %739 : vector<2x32xf32>
    %742 = arith.divf %740, %741 : vector<2x32xf32>
    %743 = arith.index_cast %c7_i32_321 : i32 to index
    %c0_331 = arith.constant 0 : index
    %c0_332 = arith.constant 0 : index
    %744 = vector.load %arg24[%743, %c0_331, %c0_332] : memref<8x2x32xf32, #tpu.memory_space<vmem>>, vector<1x2x32xf32>
    %745 = vector.shape_cast %744 : vector<1x2x32xf32> to vector<2x32xf32>
    %746 = arith.mulf %733, %724 : vector<2x32xf32>
    %747 = arith.addf %745, %746 : vector<2x32xf32>
    %748 = math.tanh %747 : vector<2x32xf32>
    %cst_333 = arith.constant 1.000000e+00 : f32
    %749 = vector.broadcast %cst_333 : f32 to vector<2x32xf32>
    %750 = arith.subf %749, %742 : vector<2x32xf32>
    %751 = arith.mulf %750, %748 : vector<2x32xf32>
    %752 = arith.mulf %742, %711 : vector<2x32xf32>
    %753 = arith.addf %751, %752 : vector<2x32xf32>
    %754 = arith.index_cast %c7_i32_321 : i32 to index
    %c0_334 = arith.constant 0 : index
    %c0_335 = arith.constant 0 : index
    %755 = vector.load %arg25[%754, %c0_334, %c0_335] : memref<8x2x32xf32, #tpu.memory_space<vmem>>, vector<1x2x32xf32>
    %756 = vector.shape_cast %755 : vector<1x2x32xf32> to vector<2x32xf32>
    %757 = vector.shape_cast %753 : vector<2x32xf32> to vector<1x2x32xf32>
    tpu.vector_store %arg25[%754, %c0_334, %c0_335], %757 {strides = array<i32>} : memref<8x2x32xf32, #tpu.memory_space<vmem>>, vector<1x2x32xf32>,
    %c8_i32_336 = arith.constant 8 : i32
    %c0_337 = arith.constant 0 : index
    %c0_338 = arith.constant 0 : index
    %c0_339 = arith.constant 0 : index
    %758 = vector.load %arg25[%c0_337, %c0_338, %c0_339] : memref<8x2x32xf32, #tpu.memory_space<vmem>>, vector<8x2x32xf32>
    %759 = tpu.transpose %758, [1, 0, 2] : vector<8x2x32xf32> -> vector<2x8x32xf32>
    %760 = vector.shape_cast %759 : vector<2x8x32xf32> to vector<16x32xf32>
    %c0_340 = arith.constant 0 : index
    %c0_341 = arith.constant 0 : index
    %761 = vector.load %arg11[%c0_340, %c0_341] : memref<32x32xf32, #tpu.memory_space<vmem>>, vector<32x32xf32>
    %cst_342 = arith.constant dense<0.000000e+00> : vector<2x32xf32>
    %762 = tpu.matmul %753, %761, %cst_342 {dimension_numbers = #tpu.dot_dimension_numbers<[1], [0], [0], [1], [0, 0, 1, 1], [], []>} : vector<2x32xf32>, vector<32x32xf32>, vector<2x32xf32> -> vector<2x32xf32>
    %c0_343 = arith.constant 0 : index
    %c0_344 = arith.constant 0 : index
    %763 = vector.load %arg14[%c0_343, %c0_344] : memref<1x32xf32, #tpu.memory_space<vmem>>, vector<1x32xf32>
    %764 = vector.broadcast %763 : vector<1x32xf32> to vector<2x32xf32>
    %765 = arith.addf %762, %764 : vector<2x32xf32>
    %c0_345 = arith.constant 0 : index
    %c0_346 = arith.constant 0 : index
    %766 = vector.load %arg12[%c0_345, %c0_346] : memref<32x32xf32, #tpu.memory_space<vmem>>, vector<32x32xf32>
    %cst_347 = arith.constant dense<0.000000e+00> : vector<16x32xf32>
    %767 = tpu.matmul %760, %766, %cst_347 {dimension_numbers = #tpu.dot_dimension_numbers<[1], [0], [0], [1], [0, 0, 1, 1], [], []>} : vector<16x32xf32>, vector<32x32xf32>, vector<16x32xf32> -> vector<16x32xf32>
    %c0_348 = arith.constant 0 : index
    %c0_349 = arith.constant 0 : index
    %768 = vector.load %arg15[%c0_348, %c0_349] : memref<1x32xf32, #tpu.memory_space<vmem>>, vector<1x32xf32>
    %769 = vector.broadcast %768 : vector<1x32xf32> to vector<16x32xf32>
    %770 = arith.addf %767, %769 : vector<16x32xf32>
    %771 = vector.shape_cast %770 : vector<16x32xf32> to vector<2x8x32xf32>
    %c0_350 = arith.constant 0 : index
    %c0_351 = arith.constant 0 : index
    %772 = vector.load %arg13[%c0_350, %c0_351] : memref<32x32xf32, #tpu.memory_space<vmem>>, vector<32x32xf32>
    %cst_352 = arith.constant dense<0.000000e+00> : vector<16x32xf32>
    %773 = tpu.matmul %760, %772, %cst_352 {dimension_numbers = #tpu.dot_dimension_numbers<[1], [0], [0], [1], [0, 0, 1, 1], [], []>} : vector<16x32xf32>, vector<32x32xf32>, vector<16x32xf32> -> vector<16x32xf32>
    %c0_353 = arith.constant 0 : index
    %c0_354 = arith.constant 0 : index
    %774 = vector.load %arg16[%c0_353, %c0_354] : memref<1x32xf32, #tpu.memory_space<vmem>>, vector<1x32xf32>
    %775 = vector.broadcast %774 : vector<1x32xf32> to vector<16x32xf32>
    %776 = arith.addf %773, %775 : vector<16x32xf32>
    %777 = vector.shape_cast %776 : vector<16x32xf32> to vector<2x8x32xf32>
    %c0_355 = arith.constant 0 : index
    %c0_356 = arith.constant 0 : index
    %778 = vector.load %arg19[%c0_355, %c0_356] : memref<4x32xf32, #tpu.memory_space<vmem>>, vector<4x32xf32>
    %779 = vector.shape_cast %765 : vector<2x32xf32> to vector<2x1x32xf32>
    %780 = vector.shape_cast %778 : vector<4x32xf32> to vector<1x4x32xf32>
    %781 = vector.broadcast %779 : vector<2x1x32xf32> to vector<2x4x32xf32>
    %782 = vector.broadcast %780 : vector<1x4x32xf32> to vector<2x4x32xf32>
    %783 = arith.mulf %781, %782 : vector<2x4x32xf32>
    %cst_357 = arith.constant 0.353553385 : f32
    %784 = vector.broadcast %cst_357 : f32 to vector<2x4x32xf32>
    %785 = arith.mulf %783, %784 : vector<2x4x32xf32>
    "tpu.trace_start"() <{level = 10 : i32, message = "bnh,bth->bnt"}> : () -> ()
    %cst_358 = arith.constant dense<0.000000e+00> : vector<2x4x8xf32>
    %786 = tpu.matmul %785, %771, %cst_358 {dimension_numbers = #tpu.dot_dimension_numbers<[2], [2], [1], [1], [0, 0, 0, 1, 1, 1], [0], [0]>} : vector<2x4x32xf32>, vector<2x8x32xf32>, vector<2x4x8xf32> -> vector<2x4x8xf32>
    "tpu.trace_stop"() : () -> ()
    %cst_359 = arith.constant dense<0xFF800000> : vector<2x4xf32>
    %787 = vector.multi_reduction <maximumf>, %786, %cst_359 [2] : vector<2x4x8xf32> to vector<2x4xf32>
    %788 = vector.shape_cast %787 : vector<2x4xf32> to vector<2x4x1xf32>
    %789 = vector.broadcast %788 : vector<2x4x1xf32> to vector<2x4x8xf32>
    %790 = arith.subf %786, %789 : vector<2x4x8xf32>
    %791 = math.exp %790 : vector<2x4x8xf32>
    %cst_360 = arith.constant dense<0.000000e+00> : vector<2x4xf32>
    %792 = vector.multi_reduction <add>, %791, %cst_360 [2] : vector<2x4x8xf32> to vector<2x4xf32>
    %793 = vector.shape_cast %792 : vector<2x4xf32> to vector<2x4x1xf32>
    %794 = vector.broadcast %793 : vector<2x4x1xf32> to vector<2x4x8xf32>
    %795 = arith.divf %791, %794 : vector<2x4x8xf32>
    "tpu.trace_start"() <{level = 10 : i32, message = "bnt,bth->bnh"}> : () -> ()
    %cst_361 = arith.constant dense<0.000000e+00> : vector<2x4x32xf32>
    %796 = tpu.matmul %795, %777, %cst_361 {dimension_numbers = #tpu.dot_dimension_numbers<[2], [1], [1], [2], [0, 0, 0, 1, 1, 2], [0], [0]>} : vector<2x4x8xf32>, vector<2x8x32xf32>, vector<2x4x32xf32> -> vector<2x4x32xf32>
    "tpu.trace_stop"() : () -> ()
    %797 = vector.shape_cast %778 : vector<4x32xf32> to vector<1x4x32xf32>
    %798 = vector.broadcast %797 : vector<1x4x32xf32> to vector<2x4x32xf32>
    %799 = arith.mulf %796, %798 : vector<2x4x32xf32>
    %cst_362 = arith.constant dense<0.000000e+00> : vector<2x32xf32>
    %800 = vector.multi_reduction <add>, %799, %cst_362 [1] : vector<2x4x32xf32> to vector<2x32xf32>
    %c0_363 = arith.constant 0 : index
    %c0_364 = arith.constant 0 : index
    %801 = vector.load %arg17[%c0_363, %c0_364] : memref<32x32xf32, #tpu.memory_space<vmem>>, vector<32x32xf32>
    %cst_365 = arith.constant dense<0.000000e+00> : vector<2x32xf32>
    %802 = tpu.matmul %800, %801, %cst_365 {dimension_numbers = #tpu.dot_dimension_numbers<[1], [0], [0], [1], [0, 0, 1, 1], [], []>} : vector<2x32xf32>, vector<32x32xf32>, vector<2x32xf32> -> vector<2x32xf32>
    %c0_366 = arith.constant 0 : index
    %c0_367 = arith.constant 0 : index
    %803 = vector.load %arg18[%c0_366, %c0_367] : memref<1x32xf32, #tpu.memory_space<vmem>>, vector<1x32xf32>
    %804 = vector.broadcast %803 : vector<1x32xf32> to vector<2x32xf32>
    %805 = arith.addf %802, %804 : vector<2x32xf32>
    %c0_368 = arith.constant 0 : index
    %c0_369 = arith.constant 0 : index
    %806 = vector.load %arg20[%c0_368, %c0_369] : memref<2x32xf32, #tpu.memory_space<vmem>>, vector<2x32xf32>
    tpu.vector_store %arg20[%c0_368, %c0_369], %805 {strides = array<i32>} : memref<2x32xf32, #tpu.memory_space<vmem>>, vector<2x32xf32>,
    %cst_370 = arith.constant dense<0.000000e+00> : vector<2x8xf32>
    %807 = vector.multi_reduction <add>, %795, %cst_370 [1] : vector<2x4x8xf32> to vector<2x8xf32>
    %cst_371 = arith.constant 2.500000e-01 : f32
    %808 = vector.broadcast %cst_371 : f32 to vector<2x8xf32>
    %809 = arith.mulf %807, %808 : vector<2x8xf32>
    %c0_372 = arith.constant 0 : index
    %c0_373 = arith.constant 0 : index
    %810 = vector.load %arg21[%c0_372, %c0_373] : memref<2x8xf32, #tpu.memory_space<vmem>>, vector<2x8xf32>
    tpu.vector_store %arg21[%c0_372, %c0_373], %809 {strides = array<i32>} : memref<2x8xf32, #tpu.memory_space<vmem>>, vector<2x8xf32>,
    return
  }
  func.func @transform_0(%arg0: i32) -> (i32, i32, i32) {
    %c0_i32 = arith.constant 0 : i32
    %c0_i32_0 = arith.constant 0 : i32
    %c0_i32_1 = arith.constant 0 : i32
    return %c0_i32, %arg0, %c0_i32_0 : i32, i32, i32
  }
  func.func @transform_1(%arg0: i32) -> (i32, i32, i32) {
    %c0_i32 = arith.constant 0 : i32
    %c0_i32_0 = arith.constant 0 : i32
    %c0_i32_1 = arith.constant 0 : i32
    return %c0_i32, %arg0, %c0_i32_0 : i32, i32, i32
  }
  func.func @transform_2(%arg0: i32) -> (i32, i32, i32) {
    %c0_i32 = arith.constant 0 : i32
    %c0_i32_0 = arith.constant 0 : i32
    %c0_i32_1 = arith.constant 0 : i32
    %c0_i32_2 = arith.constant 0 : i32
    return %c0_i32, %c0_i32_0, %c0_i32_1 : i32, i32, i32
  }
  func.func @transform_3(%arg0: i32) -> (i32, i32, i32) {
    %c0_i32 = arith.constant 0 : i32
    %c0_i32_0 = arith.constant 0 : i32
    %c0_i32_1 = arith.constant 0 : i32
    %c0_i32_2 = arith.constant 0 : i32
    return %c0_i32, %c0_i32_0, %c0_i32_1 : i32, i32, i32
  }
  func.func @transform_4(%arg0: i32) -> (i32, i32, i32) {
    %c0_i32 = arith.constant 0 : i32
    %c0_i32_0 = arith.constant 0 : i32
    %c0_i32_1 = arith.constant 0 : i32
    %c0_i32_2 = arith.constant 0 : i32
    return %c0_i32, %c0_i32_0, %c0_i32_1 : i32, i32, i32
  }
  func.func @transform_5(%arg0: i32) -> (i32, i32, i32) {
    %c0_i32 = arith.constant 0 : i32
    %c0_i32_0 = arith.constant 0 : i32
    %c0_i32_1 = arith.constant 0 : i32
    %c0_i32_2 = arith.constant 0 : i32
    return %c0_i32, %c0_i32_0, %c0_i32_1 : i32, i32, i32
  }
  func.func @transform_6(%arg0: i32) -> (i32, i32, i32) {
    %c0_i32 = arith.constant 0 : i32
    %c0_i32_0 = arith.constant 0 : i32
    %c0_i32_1 = arith.constant 0 : i32
    %c0_i32_2 = arith.constant 0 : i32
    return %c0_i32, %c0_i32_0, %c0_i32_1 : i32, i32, i32
  }
  func.func @transform_7(%arg0: i32) -> (i32, i32, i32) {
    %c0_i32 = arith.constant 0 : i32
    %c0_i32_0 = arith.constant 0 : i32
    %c0_i32_1 = arith.constant 0 : i32
    %c0_i32_2 = arith.constant 0 : i32
    return %c0_i32, %c0_i32_0, %c0_i32_1 : i32, i32, i32
  }
  func.func @transform_8(%arg0: i32) -> (i32, i32, i32) {
    %c0_i32 = arith.constant 0 : i32
    %c0_i32_0 = arith.constant 0 : i32
    %c0_i32_1 = arith.constant 0 : i32
    %c0_i32_2 = arith.constant 0 : i32
    return %c0_i32, %c0_i32_0, %c0_i32_1 : i32, i32, i32
  }
  func.func @transform_9(%arg0: i32) -> (i32, i32, i32) {
    %c0_i32 = arith.constant 0 : i32
    %c0_i32_0 = arith.constant 0 : i32
    %c0_i32_1 = arith.constant 0 : i32
    %c0_i32_2 = arith.constant 0 : i32
    return %c0_i32, %c0_i32_0, %c0_i32_1 : i32, i32, i32
  }
  func.func @transform_10(%arg0: i32) -> (i32, i32) {
    %c0_i32 = arith.constant 0 : i32
    %c0_i32_0 = arith.constant 0 : i32
    %c0_i32_1 = arith.constant 0 : i32
    return %c0_i32, %c0_i32_0 : i32, i32
  }
  func.func @transform_11(%arg0: i32) -> (i32, i32) {
    %c0_i32 = arith.constant 0 : i32
    %c0_i32_0 = arith.constant 0 : i32
    %c0_i32_1 = arith.constant 0 : i32
    return %c0_i32, %c0_i32_0 : i32, i32
  }
  func.func @transform_12(%arg0: i32) -> (i32, i32) {
    %c0_i32 = arith.constant 0 : i32
    %c0_i32_0 = arith.constant 0 : i32
    %c0_i32_1 = arith.constant 0 : i32
    return %c0_i32, %c0_i32_0 : i32, i32
  }
  func.func @transform_13(%arg0: i32) -> (i32, i32) {
    %c0_i32 = arith.constant 0 : i32
    %c0_i32_0 = arith.constant 0 : i32
    %c0_i32_1 = arith.constant 0 : i32
    return %c0_i32, %c0_i32_0 : i32, i32
  }
  func.func @transform_14(%arg0: i32) -> (i32, i32) {
    %c0_i32 = arith.constant 0 : i32
    %c0_i32_0 = arith.constant 0 : i32
    %c0_i32_1 = arith.constant 0 : i32
    return %c0_i32, %c0_i32_0 : i32, i32
  }
  func.func @transform_15(%arg0: i32) -> (i32, i32) {
    %c0_i32 = arith.constant 0 : i32
    %c0_i32_0 = arith.constant 0 : i32
    %c0_i32_1 = arith.constant 0 : i32
    return %c0_i32, %c0_i32_0 : i32, i32
  }
  func.func @transform_16(%arg0: i32) -> (i32, i32) {
    %c0_i32 = arith.constant 0 : i32
    %c0_i32_0 = arith.constant 0 : i32
    %c0_i32_1 = arith.constant 0 : i32
    return %c0_i32, %c0_i32_0 : i32, i32
  }
  func.func @transform_17(%arg0: i32) -> (i32, i32) {
    %c0_i32 = arith.constant 0 : i32
    %c0_i32_0 = arith.constant 0 : i32
    %c0_i32_1 = arith.constant 0 : i32
    return %c0_i32, %c0_i32_0 : i32, i32
  }
  func.func @transform_18(%arg0: i32) -> (i32, i32) {
    %c0_i32 = arith.constant 0 : i32
    %c0_i32_0 = arith.constant 0 : i32
    %c0_i32_1 = arith.constant 0 : i32
    return %c0_i32, %c0_i32_0 : i32, i32
  }
  func.func @transform_19(%arg0: i32) -> (i32, i32) {
    %c0_i32 = arith.constant 0 : i32
    %c0_i32_0 = arith.constant 0 : i32
    return %arg0, %c0_i32 : i32, i32
  }
  func.func @transform_20(%arg0: i32) -> (i32, i32) {
    %c0_i32 = arith.constant 0 : i32
    %c0_i32_0 = arith.constant 0 : i32
    return %arg0, %c0_i32 : i32, i32
  }
}

</mosaic_0001>

<bundles_post_ra>
// kernel: tpu_custom_call.1
= control target key start
LH: loop header
LB: loop body
LE: loop exit
PB: predicated region body
PF: predicated region fallthrough
CT: control target
= control target key end

     0   :  { %s4678_s0 = inlined_call_operand.hbm [shape: f32[8,2,16], index: 0, kind: input, shape index: {}]   ;;  %s4679_s1 = inlined_call_operand.hbm [shape: f32[2,2,32], index: 1, kind: input, shape index: {}]   ;;  %s4680_s2 = inlined_call_operand.hbm [shape: f32[3,16,32], index: 2, kind: input, shape index: {}]   ;;  %s4681_s3 = inlined_call_operand.hbm [shape: f32[3,32,32], index: 3, kind: input, shape index: {}]   ;;  %s4682_s4 = inlined_call_operand.vmem [shape: f32[3,1,32], index: 4, kind: input, shape index: {}]   ;;  %s4683_s5 = inlined_call_operand.hbm [shape: f32[3,1,32], index: 5, kind: input, shape index: {}]   ;;  %s4684_s6 = inlined_call_operand.hbm [shape: f32[3,32,32], index: 6, kind: input, shape index: {}]   ;;  %s4685_s7 = inlined_call_operand.hbm [shape: f32[3,32,32], index: 7, kind: input, shape index: {}]   ;;  %s4686_s8 = inlined_call_operand.hbm [shape: f32[3,1,32], index: 8, kind: input, shape index: {}]   ;;  %s4687_s9 = inlined_call_operand.hbm [shape: f32[3,1,32], index: 9, kind: input, shape index: {}]   ;;  %s4688_s10 = inlined_call_operand.hbm [shape: f32[32,32], index: 10, kind: input, shape index: {}]   ;;  %s4689_s11 = inlined_call_operand.hbm [shape: f32[32,32], index: 11, kind: input, shape index: {}]   ;;  %s4690_s12 = inlined_call_operand.hbm [shape: f32[32,32], index: 12, kind: input, shape index: {}]   ;;  %s4691_s13 = inlined_call_operand.vmem [shape: f32[1,32], index: 13, kind: input, shape index: {}]   ;;  %s4692_s14 = inlined_call_operand.vmem [shape: f32[1,32], index: 14, kind: input, shape index: {}]   ;;  %s4693_s15 = inlined_call_operand.vmem [shape: f32[1,32], index: 15, kind: input, shape index: {}]   ;;  %s4694_s16 = inlined_call_operand.hbm [shape: f32[32,32], index: 16, kind: input, shape index: {}]   ;;  %s4695_s17 = inlined_call_operand.vmem [shape: f32[1,32], index: 17, kind: input, shape index: {}]   ;;  %s4696_s18 = inlined_call_operand.vmem [shape: f32[4,32], index: 18, kind: input, shape index: {}]   ;;  %s4697_s19 = inlined_call_operand.hbm [shape: f32[2,32], index: 19, kind: output, shape index: {0}]   ;;  %s4698_s20 = inlined_call_operand.hbm [shape: f32[2,8], index: 20, kind: output, shape index: {1}]  }
   0x1   :  { %4704 = sst [smem:[#allocation39_spill]] %s4678_s0 }
   0x2   :  { %4705 = sst [smem:[#allocation40_spill]] %s4679_s1 }
   0x3   :  { %4706 = sst [smem:[#allocation41_spill]] %s4680_s2 }
   0x4   :  { %4707 = sst [smem:[#allocation42_spill]] %s4681_s3 }
   0x5   :  { %4708 = sst [smem:[#allocation43_spill]] %s4682_s4 }
   0x6   :  { %26 = vsyncpa [#allocation7], 0 }
   0x7   :  { %27 = vsyncpa [#allocation10], 0 }
   0x8   :  { %28 = vsyncpa [#allocation13], 0 }
   0x9   :  { %29 = vsyncpa [#allocation16], 0 }
   0xa   :  { %30 = vsyncpa [#allocation19], 0 }
   0xb   :  { %31 = vsyncpa [#allocation22], 0 }
   0xc   :  { %32 = vsyncpa [#allocation25], 0 }
   0xd   :  { %33 = vsyncpa [#allocation8], 0 }
   0xe   :  { %34 = vsyncpa [#allocation29], 0  ;;  %s4709_s23 = sld [smem:[#allocation40_spill]]  ;;  %s3783_s2 = smov [#allocation9]  }
   0xf   :  { %s54_s25 = sshll.u32 %s3783_s2, 4  ;;  %s4700_s3 = smov 32   ;;  %s55_s25 = int_to_ptr.vmem [resolvable:$true] %s54_s25 }
  0x10   :  { %s4701_s26 = smov 2   ;;  %s4710_s4 = sld [smem:[#allocation42_spill]] }
  0x11   :  { %s3786_s30 = smov [#allocation12]   ;;  %s106_s22 = sshll.u32 %s4684_s6, 4  ;;  %s107_s22 = int_to_ptr.hbm [resolvable:$true] %s106_s22 }
  0x12   :  { %s80_s0 = sshll.u32 %s3786_s30, 4  ;;  %s3788_s2 = smov 8   ;;  %s81_s0 = int_to_ptr.vmem [resolvable:$true] %s80_s0 }
  0x13   :  { %s3790_s6 = smov [#allocation18]   ;;  %s184_s27 = sshll.u32 %s4690_s12, 4  ;;  %s185_s27 = int_to_ptr.hbm [resolvable:$true] %s184_s27 }
  0x14   :  { %s52_s24 = sshll.u32 %s4709_s23, 4  ;;  %s3787_s23 = smov 128   ;;  %s53_s24 = int_to_ptr.hbm [resolvable:$true] %s52_s24 }
  0x15   :  { %60 = dma.hbm_to_vmem [thread:$0]  %s53_s24, 64, %s55_s25, [#allocation10], %s4700_s3, %s4700_s3, %s4701_s26  }
  0x16   :  { %s78_s29 = sshll.u32 %s4710_s4, 4  ;;  %s3789_s24 = smov [#allocation15]   ;;  %s79_s29 = int_to_ptr.hbm [resolvable:$true] %s78_s29 }
  0x17   :  { %86 = dma.hbm_to_vmem [thread:$0]  %s79_s29, 1536, %s81_s0, [#allocation13], %s3787_s23, %s3787_s23, %s3788_s2  }
  0x18   :  { %s108_s25 = sshll.u32 %s3789_s24, 4  ;;  %s132_s4 = sshll.u32 %s4686_s8, 4  ;;  %s109_s25 = int_to_ptr.vmem [resolvable:$true] %s108_s25  ;;  %s133_s4 = int_to_ptr.hbm [resolvable:$true] %s132_s4 }
  0x19   :  { %114 = dma.hbm_to_vmem [thread:$0]  %s107_s22, 1536, %s109_s25, [#allocation16], %s3787_s23, %s3787_s23, %s3788_s2  }
  0x1a   :  { %s134_s30 = sshll.u32 %s3790_s6, 4  ;;  %s158_s3 = sshll.u32 %s4688_s10, 4  ;;  %s135_s30 = int_to_ptr.vmem [resolvable:$true] %s134_s30  ;;  %s159_s3 = int_to_ptr.hbm [resolvable:$true] %s158_s3 }
  0x1b   :  { %s4702_s29 = smov 16   ;;  %s3792_s0 = smov 1  }
  0x1c   :  { %140 = dma.hbm_to_vmem [thread:$0]  %s133_s4, 48, %s135_s30, [#allocation19], %s4702_s29, %s4702_s29, %s3792_s0  }
  0x1d   :  { %s3793_s22 = smov [#allocation21]   ;;  %s3794_s10 = smov [#allocation24]  }
  0x1e   :  { %s160_s25 = sshll.u32 %s3793_s22, 4  ;;  %s186_s28 = sshll.u32 %s3794_s10, 4  ;;  %s161_s25 = int_to_ptr.vmem [resolvable:$true] %s160_s25  ;;  %s187_s28 = int_to_ptr.vmem [resolvable:$true] %s186_s28 }
  0x1f   :  { %166 = dma.hbm_to_vmem [thread:$0]  %s159_s3, 512, %s161_s25, [#allocation22], %s3787_s23, %s3787_s23, %s3788_s2  }
  0x20   :  { %s4711_s1 = sld [smem:[#allocation39_spill]]  ;;  %s3795_s24 = smov [#allocation6]  }
  0x21   :  { %192 = dma.hbm_to_vmem [thread:$0]  %s185_s27, 512, %s187_s28, [#allocation25], %s3787_s23, %s3787_s23, %s3788_s2  }
  0x22   :  { %s4712_s30 = sld [smem:[#allocation41_spill]]  ;;  %s41_s22 = sshll.u32 %s3795_s24, 4  ;;  %s42_s22 = int_to_ptr.vmem [resolvable:$true] %s41_s22 }
  0x23   :  { %s4713_s3 = smov 2   ;;  %s4714_s25 = smov 32  }
  0x24   :  { %s3796_s10 = smov [#allocation11]   ;;  %s93_s29 = sshll.u32 %s4683_s5, 4  ;;  %s94_s29 = int_to_ptr.hbm [resolvable:$true] %s93_s29 }
  0x25   :  { %s67_s6 = sshll.u32 %s3796_s10, 4  ;;  %s119_s12 = sshll.u32 %s4685_s7, 4  ;;  %s68_s6 = int_to_ptr.vmem [resolvable:$true] %s67_s6  ;;  %s120_s12 = int_to_ptr.hbm [resolvable:$true] %s119_s12 }
  0x26   :  { %s39_s26 = sshll.u32 %s4711_s1, 4  ;;  %s3797_s4 = smov [#allocation14]   ;;  %s40_s26 = int_to_ptr.hbm [resolvable:$true] %s39_s26 }
  0x27   :  { %47 = dma.hbm_to_vmem [thread:$0]  %s40_s26, 256, %s42_s22, [#allocation7], %s4714_s25, %s4714_s25, %s4713_s3  }
  0x28   :  { %s65_s8 = sshll.u32 %s4712_s30, 4  ;;  %s95_s30 = sshll.u32 %s3797_s4, 4  ;;  %s66_s8 = int_to_ptr.hbm [resolvable:$true] %s65_s8  ;;  %s96_s30 = int_to_ptr.vmem [resolvable:$true] %s95_s30 }
  0x29   :  { %73 = dma.hbm_to_vmem [thread:$0]  %s66_s8, 768, %s68_s6, [#allocation10], %s3787_s23, %s3787_s23, %s3788_s2  }
  0x2a   :  { %s4715_s26 = smov 16   ;;  %s3798_s24 = smov [#allocation17]  }
  0x2b   :  { %101 = dma.hbm_to_vmem [thread:$0]  %s94_s29, 48, %s96_s30, [#allocation13], %s4715_s26, %s4715_s26, %s3792_s0  }
  0x2c   :  { %s121_s5 = sshll.u32 %s3798_s24, 4  ;;  %s145_s25 = sshll.u32 %s4687_s9, 4  ;;  %s122_s5 = int_to_ptr.vmem [resolvable:$true] %s121_s5  ;;  %s146_s25 = int_to_ptr.hbm [resolvable:$true] %s145_s25 }
  0x2d   :  { %127 = dma.hbm_to_vmem [thread:$0]  %s120_s12, 1536, %s122_s5, [#allocation16], %s3787_s23, %s3787_s23, %s3788_s2  }
  0x2e   :  { %s171_s10 = sshll.u32 %s4689_s11, 4  ;;  %s3799_s6 = smov [#allocation20]   ;;  %s172_s10 = int_to_ptr.hbm [resolvable:$true] %s171_s10 }
  0x2f   :  { %s147_s21 = sshll.u32 %s3799_s6, 4  ;;  %s3800_s29 = smov [#allocation23]   ;;  %s148_s21 = int_to_ptr.vmem [resolvable:$true] %s147_s21 }
  0x30   :  { %153 = dma.hbm_to_vmem [thread:$0]  %s146_s25, 48, %s148_s21, [#allocation19], %s4715_s26, %s4715_s26, %s3792_s0  }
  0x31   :  { %s173_s9 = sshll.u32 %s3800_s29, 4  ;;  %s203_s28 = sshll.u32 %s4694_s16, 4  ;;  %s174_s9 = int_to_ptr.vmem [resolvable:$true] %s173_s9  ;;  %s204_s28 = int_to_ptr.hbm [resolvable:$true] %s203_s28 }
  0x32   :  { %179 = dma.hbm_to_vmem [thread:$0]  %s172_s10, 512, %s174_s9, [#allocation22], %s3787_s23, %s3787_s23, %s3788_s2  }
  0x33   :  { %s3801_s11 = smov [#allocation26]  }
  0x34   :  { %s205_s12 = sshll.u32 %s3801_s11, 4  ;;  %s206_s12 = int_to_ptr.vmem [resolvable:$true] %s205_s12 }
  0x35   :  { %211 = dma.hbm_to_vmem [thread:$0]  %s204_s28, 512, %s206_s12, [#allocation25], %s3787_s23, %s3787_s23, %s3788_s2  }
  0x36   :  { %3765 = dma.done.wait [#allocation7], 256  }
  0x37   :  { %3766 = vsyncadd [#allocation7], 4294967040 }
  0x38   :  { %3767 = dma.done.wait [#allocation10], 832  }
  0x39   :  { %3768 = vsyncadd [#allocation10], 4294966464 }
  0x3a   :  { %3769 = dma.done.wait [#allocation13], 1584  }
  0x3b   :  { %3770 = vsyncadd [#allocation13], 4294965712 }
  0x3c   :  { %3771 = dma.done.wait [#allocation16], 3072  }
  0x3d   :  { %3772 = vsyncadd [#allocation16], 4294964224 }
  0x3e   :  { %3773 = dma.done.wait [#allocation19], 96  }
  0x3f   :  { %3774 = vsyncadd [#allocation19], 4294967200 }
  0x40   :  { %3775 = dma.done.wait [#allocation22], 1024  }
  0x41   :  { %3776 = vsyncadd [#allocation22], 4294966272 }
  0x42   :  { %3777 = dma.done.wait [#allocation25], 1024  }
  0x43   :  { %3778 = vsyncadd [#allocation25], 4294966272  ;;  %v3989_v0 = vld [vmem:[#allocation12 + $0x18] sm:$0xff]  ;;  %v3991_v2 = vld [vmem:[#allocation12 + $0x10] sm:$0xff]  ;;  %vm529_vm0 = vcmask 261120   ;;  %vm307_vm1 = vcmask 130048  }
  0x44   :  { %v277_v1 = vld [vmem:[#allocation11 + $0x8] sm:$0xff]  ;;  %545 = vmatpush.msra.mxu3 %v3989_v0  ;;  %v276_v3 = vld [vmem:[#allocation11] sm:$0xff]  ;;  %v3996_v5 = vld [vmem:[#allocation12 + $0x8] sm:$0xff]  ;;  %s4716_s2 = sld [smem:[#allocation43_spill]]  ;;  %vm349_vm2 = vcmask 254976   ;;  %s3059_s6 = sshll.u32 %s4698_s20, 4  ;;  %s3060_s6 = int_to_ptr.hbm [resolvable:$true] %s3059_s6 }
  0x45   :  { %326 = vmatpush.msra.mxu0 %v277_v1  ;;  %v3994_v4 = vld [vmem:[#allocation6] sm:$0x3]  ;;  %v3998_v6 = vld [vmem:[#allocation6 + $0x2] sm:$0x3]  ;;  %v4000_v7 = vld [vmem:[#allocation6 + $0x4] sm:$0x3] }
  0x46   :  { %546 = vmatpush.msra.mxu3 %v3991_v2  ;;  %v4003_v8 = vld [vmem:[#allocation6 + $0x6] sm:$0x3]  ;;  %290 = vst [vmem:[#allocation1] ss:$4 sm:$0xff] %v3994_v4  ;;  %v360_v10 = vld [vmem:[#allocation11 + $0x18] sm:$0xff]  ;;  %v4013_v13 = vld [vmem:[#allocation12 + $0x38] sm:$0xff] }
  0x47   :  { %327 = vmatpush.msra.mxu0 %v276_v3  ;;  %292 = vst [vmem:[#allocation1 + $0x1] ss:$4 sm:$0xff] %v3998_v6  ;;  %v4007_v9 = vld [vmem:[#allocation12] sm:$0xff]  ;;  %v4011_v12 = vld [vmem:[#allocation9] sm:$0x3]  ;;  %401 = vmatpush.msra.mxu1 %v360_v10  ;;  %v434_v14 = vld [vmem:[#allocation11 + $0x28] sm:$0xff] }
  0x48   :  { %v359_v11 = vld [vmem:[#allocation11 + $0x10] sm:$0xff]  ;;  %547 = vmatpush.msra.mxu3 %v3996_v5  ;;  %294 = vst [vmem:[#allocation1 + $0x2] ss:$4 sm:$0xff] %v4000_v7  ;;  %475 = vmatpush.msra.mxu2 %v434_v14  ;;  %v433_v15 = vld [vmem:[#allocation11 + $0x20] sm:$0xff]  ;;  %v4016_v16 = vld [vmem:[#allocation12 + $0x58] sm:$0xff]  ;;  %s3805_s9 = smov [#allocation27]  }
  0x49   :  { %296 = vst [vmem:[#allocation1 + $0x3] ss:$4 sm:$0xff] %v4003_v8  ;;  %v4018_v17 = vld [vmem:[#allocation6 + $0x8] sm:$0x3]  ;;  %402 = vmatpush.msra.mxu1 %v359_v11  ;;  %v4021_v18 = vld [vmem:[#allocation6 + $0xa] sm:$0x3]  ;;  %591 = vmatpush.msrb.mxu0 %v4016_v16 }
  0x4a   :  { %548 = vmatpush.msra.mxu3 %v4007_v9  ;;  %v4023_v19 = vld [vmem:[#allocation6 + $0xc] sm:$0x3]  ;;  %v4027_v20 = vld [vmem:[#allocation12 + $0x30] sm:$0xff]  ;;  %476 = vmatpush.msra.mxu2 %v433_v15  ;;  %v4029_v21 = vld [vmem:[#allocation6 + $0xe] sm:$0x3]  ;;  %s3046_s1 = sshll.u32 %s3805_s9, 4  ;;  %s3047_s1 = int_to_ptr.vmem [resolvable:$true] %s3046_s1 }
  0x4b   :  { %3088 = vmatmul.msk.f32.vlgmr.msra.gmra.mxu3 %vm529_vm0, %v4011_v12  ;;  %298 = vst [vmem:[#allocation1 + $0x20] ss:$4 sm:$0xff] %v4018_v17  ;;  %v4032_v22 = vld [vmem:[#allocation12 + $0x50] sm:$0xff]  ;;  %v4035_v23 = vld [vmem:[#allocation12 + $0x28] sm:$0xff]  ;;  %v4041_v25 = vld [vmem:[#allocation12 + $0x20] sm:$0xff]  ;;  %665 = vmatpush.msrb.mxu1 %v3989_v0  ;;  %s3048_s11 = sshll.u32 %s4697_s19, 4  ;;  %s3049_s11 = int_to_ptr.hbm [resolvable:$true] %s3048_s11 }
  0x4c   :  { %568 = vmatpush.msrb.mxu3 %v4013_v13  ;;  %300 = vst [vmem:[#allocation1 + $0x21] ss:$4 sm:$0xff] %v4021_v18  ;;  %v4039_v24 = vld [vmem:[#allocation12 + $0x48] sm:$0xff]  ;;  %v4044_v26 = vld [vmem:[#allocation12 + $0x40] sm:$0xff]  ;;  %685 = vmatpush.msrb.mxu2 %v4013_v13  ;;  %v3209_v31 = vld [vmem:[%s4716_s2] ss:$0 sm:$0xff] }
  0x4d   :  { %302 = vst [vmem:[#allocation1 + $0x22] ss:$4 sm:$0xff] %v4023_v19  ;;  %592 = vmatpush.msrb.mxu0 %v4032_v22  ;;  %666 = vmatpush.msrb.mxu1 %v3991_v2  ;;  %v4108_v34 = vld [vmem:[#allocation14] ss:$0 sm:$0xff]  ;;  %v4118_v40 = vld [vmem:[%s4716_s2 + $0x1] ss:$0 sm:$0xff] }
  0x4e   :  { %569 = vmatpush.msrb.mxu3 %v4027_v20  ;;  %304 = vst [vmem:[#allocation1 + $0x23] ss:$4 sm:$0xff] %v4029_v21  ;;  %686 = vmatpush.msrb.mxu2 %v4027_v20  ;;  %v4122_v51 = vld [vmem:[#allocation14 + $0x1] ss:$0 sm:$0xff]  ;;  %v4140_v63 = vld [vmem:[%s4716_s2 + $0x2] ss:$0 sm:$0xff] }
  0x4f   :  { %593 = vmatpush.msrb.mxu0 %v4039_v24  ;;  %667 = vmatpush.msrb.mxu1 %v3996_v5 }
  0x50   :  { %v305_v27 = vld.sshfl [vmem:[#allocation1] sm:$0xff pattern:$0x73625140]  ;;  %570 = vmatpush.msrb.mxu3 %v4035_v23  ;;  %687 = vmatpush.msrb.mxu2 %v4035_v23 }
  0x51   :  { %3080 = vmatmul.msk.f32.vlgmr.msra.gmra.mxu0 %vm307_vm1, %v305_v27  ;;  %366 = vst [vmem:[#allocation1] ss:$4 sm:$0xff] %v3994_v4  ;;  %668 = vmatpush.msrb.mxu1 %v4007_v9 }
  0x52   :  { %368 = vst [vmem:[#allocation1 + $0x1] ss:$4 sm:$0xff] %v3998_v6  ;;  %571 = vmatpush.msrb.mxu3 %v4041_v25  ;;  %594 = vmatpush.msrb.mxu0 %v4044_v26 }
  0x53   :  { %370 = vst [vmem:[#allocation1 + $0x2] ss:$4 sm:$0xff] %v4000_v7  ;;  %3089 = vmatmul.msk.f32.vlgmr.msrb.gmra.mxu3 %vm529_vm0, %v4011_v12  ;;  %688 = vmatpush.msrb.mxu2 %v4041_v25 }
  0x54   :  { %372 = vst [vmem:[#allocation1 + $0x3] ss:$4 sm:$0xff] %v4003_v8  ;;  %705 = vmatpush.msra.mxu3 %v4016_v16  ;;  %783 = vmatpush.msra.mxu0 %v3989_v0 }
  0x55   :  { %v306_v28 = vld.sshfl [vmem:[#allocation1 + $0x20] sm:$0xff pattern:$0x73625140] }
  0x56   :  { %374 = vst [vmem:[#allocation1 + $0x20] ss:$4 sm:$0xff] %v4018_v17  ;;  %706 = vmatpush.msra.mxu3 %v4032_v22  ;;  %784 = vmatpush.msra.mxu0 %v3991_v2 }
  0x57   :  { %376 = vst [vmem:[#allocation1 + $0x21] ss:$4 sm:$0xff] %v4021_v18 }
  0x58   :  { %378 = vst [vmem:[#allocation1 + $0x22] ss:$4 sm:$0xff] %v4023_v19  ;;  %707 = vmatpush.msra.mxu3 %v4039_v24  ;;  %785 = vmatpush.msra.mxu0 %v3996_v5 }
  0x59   :  { %3081 = vmatmul.msk.f32.gmra.mxu0 %vm307_vm1, %v306_v28  ;;  %380 = vst [vmem:[#allocation1 + $0x23] ss:$4 sm:$0xff] %v4029_v21 }
  0x5a   :  { %708 = vmatpush.msra.mxu3 %v4044_v26  ;;  %786 = vmatpush.msra.mxu0 %v4007_v9 }
  0x5b   :  { %v381_v29 = vld.sshfl [vmem:[#allocation1] sm:$0xff pattern:$0x73625140] }
  0x5c   :  { %901 = vmatpush.msrb.mxu3 %v3989_v0  ;;  %3083 = vmatmul.msk.f32.vlgmr.msra.gmra.mxu1 %vm307_vm1, %v381_v29  ;;  %440 = vst [vmem:[#allocation1] ss:$4 sm:$0xff] %v3994_v4 }
  0x5d   :  { %442 = vst [vmem:[#allocation1 + $0x1] ss:$4 sm:$0xff] %v3998_v6  ;;  %803 = vmatpush.msra.mxu1 %v4013_v13 }
  0x5e   :  { %902 = vmatpush.msrb.mxu3 %v3991_v2  ;;  %444 = vst [vmem:[#allocation1 + $0x2] ss:$4 sm:$0xff] %v4000_v7 }
  0x5f   :  { %446 = vst [vmem:[#allocation1 + $0x3] ss:$4 sm:$0xff] %v4003_v8  ;;  %804 = vmatpush.msra.mxu1 %v4027_v20 }
  0x60   :  { %903 = vmatpush.msrb.mxu3 %v3996_v5  ;;  %v382_v49 = vld.sshfl [vmem:[#allocation1 + $0x20] sm:$0xff pattern:$0x73625140] }
  0x61   :  { %3090 = vmatmul.msk.f32.vlgmr.msrb.gmra.mxu0 %vm529_vm0, %v4011_v12  ;;  %805 = vmatpush.msra.mxu1 %v4035_v23  ;;  %448 = vst [vmem:[#allocation1 + $0x20] ss:$4 sm:$0xff] %v4018_v17  ;;  %v4146_v17 = vld [vmem:[#allocation14 + $0x2] ss:$0 sm:$0xff] }
  0x62   :  { %921 = vmatpush.msrb.mxu0 %v4013_v13  ;;  %904 = vmatpush.msrb.mxu3 %v4007_v9  ;;  %450 = vst [vmem:[#allocation1 + $0x21] ss:$4 sm:$0xff] %v4021_v18 }
  0x63   :  { %806 = vmatpush.msra.mxu1 %v4041_v25  ;;  %452 = vst [vmem:[#allocation1 + $0x22] ss:$4 sm:$0xff] %v4023_v19 }
  0x64   :  { %922 = vmatpush.msrb.mxu0 %v4027_v20  ;;  %3084 = vmatmul.msk.f32.gmra.mxu1 %vm307_vm1, %v382_v49  ;;  %454 = vst [vmem:[#allocation1 + $0x23] ss:$4 sm:$0xff] %v4029_v21 }
  0x66   :  { %v455_v30 = vld.sshfl [vmem:[#allocation1] sm:$0xff pattern:$0x73625140]  ;;  %923 = vmatpush.msrb.mxu0 %v4035_v23 }
  0x67   :  { %3086 = vmatmul.msk.f32.vlgmr.msra.gmra.mxu2 %vm307_vm1, %v455_v30 }
  0x68   :  { %823 = vmatpush.msra.mxu2 %v4016_v16  ;;  %924 = vmatpush.msrb.mxu0 %v4041_v25 }
  0x6a   :  { %824 = vmatpush.msra.mxu2 %v4032_v22 }
  0x6b   :  { %v456_v6 = vld.sshfl [vmem:[#allocation1 + $0x20] sm:$0xff pattern:$0x73625140] }
  0x6c   :  { %825 = vmatpush.msra.mxu2 %v4039_v24 }
  0x6e   :  { %826 = vmatpush.msra.mxu2 %v4044_v26 }
  0x6f   :  { %3087 = vmatmul.msk.f32.gmra.mxu2 %vm307_vm1, %v456_v6 }
  0xce   :  { %v329_v32 = vpop.f32.mrf.mxu0  ;;  %v550_v38 = vpop.f32.mrf.mxu3 }
  0xcf   :  { %v330_v33 = vadd.f32 %v3209_v31, %v329_v32  ;;  %v551_v39 = vadd.f32 %v4108_v34, %v550_v38 }
  0xd1   :  { %v337_v35 = vrot.slane %v330_v33, 2  ;;  %v338_v36 = vrot.slane %v330_v33, 4  ;;  %v339_v37 = vrot.slane %v330_v33, 6  ;;  %350 = vst.msk [vmem:[#allocation2] sm:$0x3] %vm349_vm2, %v330_v33 }
  0xd3   :  { %351 = vst.msk [vmem:[#allocation2 + $0x2] sm:$0x3] %vm349_vm2, %v337_v35 }
  0xd4   :  { %352 = vst.msk [vmem:[#allocation2 + $0x4] sm:$0x3] %vm349_vm2, %v338_v36 }
  0xd5   :  { %353 = vst.msk [vmem:[#allocation2 + $0x6] sm:$0x3] %vm349_vm2, %v339_v37 }
  0xd6   :  { %v332_v41 = vpop.f32.mrf.mxu0  ;;  %v573_v55 = vpop.f32.mrf.mxu3 }
  0xd7   :  { %v333_v42 = vadd.f32 %v3209_v31, %v332_v41  ;;  %v574_v57 = vadd.f32 %v4122_v51, %v573_v55 }
  0xd8   :  { %v599_v43 = vld [vmem:[#allocation2] sm:$0x3] }
  0xd9   :  { %v404_v44 = vpop.f32.mrf.mxu1  ;;  %v600_v45 = vadd.f32 %v599_v43, %v551_v39  ;;  %v340_v46 = vrot.slane %v333_v42, 2  ;;  %v341_v47 = vrot.slane %v333_v42, 4  ;;  %354 = vst.msk [vmem:[#allocation2 + $0x8] sm:$0x3] %vm349_vm2, %v333_v42  ;;  %v342_v56 = vrot.slane %v333_v42, 6 }
  0xda   :  { %v405_v48 = vadd.f32 %v4118_v40, %v404_v44  ;;  %v714_v6 = vld [vmem:[#allocation2 + $0x2] sm:$0x3] }
  0xdb   :  { %v3091_v50 = vmul.f32 -1.442695, %v600_v45  ;;  %355 = vst.msk [vmem:[#allocation2 + $0xa] sm:$0x3] %vm349_vm2, %v340_v46 }
  0xdc   :  { %v412_v52 = vrot.slane %v405_v48, 2  ;;  %v413_v53 = vrot.slane %v405_v48, 4  ;;  %v414_v54 = vrot.slane %v405_v48, 6  ;;  %424 = vst.msk [vmem:[#allocation3] sm:$0x3] %vm349_vm2, %v405_v48 }
  0xdd   :  { %3225 = vpow2.f32 %v3091_v50  ;;  %356 = vst.msk [vmem:[#allocation2 + $0xc] sm:$0x3] %vm349_vm2, %v341_v47 }
  0xde   :  { %425 = vst.msk [vmem:[#allocation3 + $0x2] sm:$0x3] %vm349_vm2, %v412_v52  ;;  %v596_v19 = vpop.f32.mrf.mxu0 }
  0xdf   :  { %426 = vst.msk [vmem:[#allocation3 + $0x4] sm:$0x3] %vm349_vm2, %v413_v53  ;;  %v597_v29 = vadd.f32 %v4146_v17, %v596_v19 }
  0xe0   :  { %427 = vst.msk [vmem:[#allocation3 + $0x6] sm:$0x3] %vm349_vm2, %v414_v54 }
  0xe1   :  { %357 = vst.msk [vmem:[#allocation2 + $0xe] sm:$0x3] %vm349_vm2, %v342_v56  ;;  %v407_v55 = vpop.f32.mrf.mxu1 }
  0xe2   :  { %v408_v56 = vadd.f32 %v4118_v40, %v407_v55 }
  0xe3   :  { %v3226_v58 = vpop.eup %3225  ;;  %v620_v59 = vld [vmem:[#allocation3] sm:$0x3] }
  0xe4   :  { %v604_v60 = vadd.f32 1.0, %v3226_v58  ;;  %v621_v61 = vadd.f32 %v620_v59, %v574_v57  ;;  %v415_v57 = vrot.slane %v408_v56, 2  ;;  %v416_v58 = vrot.slane %v408_v56, 4  ;;  %428 = vst.msk [vmem:[#allocation3 + $0x8] sm:$0x3] %vm349_vm2, %v408_v56 }
  0xe5   :  { %v417_v59 = vrot.slane %v408_v56, 6 }
  0xe6   :  { %3227 = vrcp.f32 %v604_v60  ;;  %v3092_v62 = vmul.f32 -1.442695, %v621_v61  ;;  %v616_v21 = vand.u32 2147483648, %v604_v60  ;;  %v614_v28 = vand.u32 2147483647, %v604_v60 }
  0xe7   :  { %vm610_vm4 = vweird.f32 %v604_v60  ;;  %429 = vst.msk [vmem:[#allocation3 + $0xa] sm:$0x3] %vm349_vm2, %v415_v57 }
  0xe8   :  { %3229 = vpow2.f32 %v3092_v62  ;;  %v617_v31 = vor.u32 1.1754944e-38, %v616_v21  ;;  %vm615_vm6 = vcmp.eq.f32.partialorder %v614_v28, 8.507059e+37  ;;  %430 = vst.msk [vmem:[#allocation3 + $0xc] sm:$0x3] %vm349_vm2, %v416_v58 }
  0xe9   :  { %431 = vst.msk [vmem:[#allocation3 + $0xe] sm:$0x3] %vm349_vm2, %v417_v59 }
  0xea   :  { %v478_v1 = vpop.f32.mrf.mxu2 }
  0xeb   :  { %v479_v3 = vadd.f32 %v4140_v63, %v478_v1 }
  0xec   :  { %v3228_v4 = vpop.eup %3227 }
  0xed   :  { %v486_v7 = vrot.slane %v479_v3, 2  ;;  %v487_v8 = vrot.slane %v479_v3, 4  ;;  %v488_v10 = vrot.slane %v479_v3, 6  ;;  %498 = vst.msk [vmem:[#allocation4] sm:$0x3] %vm349_vm2, %v479_v3  ;;  %v606_v11 = vmul.f32 %v3228_v4, %v604_v60 }
  0xee   :  { %v3230_v14 = vpop.eup %3229  ;;  %vm611_vm3 = vweird.f32 %v3228_v4 }
  0xef   :  { %v625_v15 = vadd.f32 1.0, %v3230_v14  ;;  %499 = vst.msk [vmem:[#allocation4 + $0x2] sm:$0x3] %vm349_vm2, %v486_v7  ;;  %v607_v18 = vsub.f32 1.0, %v606_v11  ;;  %vm612_vm5 = vmor %vm610_vm4, %vm611_vm3  ;;  %v736_v11 = vld [vmem:[#allocation3 + $0x2] sm:$0x3] }
  0xf0   :  { %500 = vst.msk [vmem:[#allocation4 + $0x4] sm:$0x3] %vm349_vm2, %v487_v8 }
  0xf1   :  { %3231 = vrcp.f32 %v625_v15  ;;  %501 = vst.msk [vmem:[#allocation4 + $0x6] sm:$0x3] %vm349_vm2, %v488_v10  ;;  %v608_v27 = vmul.f32 %v3228_v4, %v607_v18  ;;  %v637_v42 = vand.u32 2147483648, %v625_v15  ;;  %v635_v44 = vand.u32 2147483647, %v625_v15 }
  0xf2   :  { %vm631_vm8 = vweird.f32 %v625_v15  ;;  %v481_v60 = vpop.f32.mrf.mxu2 }
  0xf3   :  { %v609_v30 = vadd.f32 %v3228_v4, %v608_v27  ;;  %v638_v46 = vor.u32 1.1754944e-38, %v637_v42  ;;  %vm636_vm10 = vcmp.eq.f32.partialorder %v635_v44, 8.507059e+37  ;;  %v482_v61 = vadd.f32 %v4140_v63, %v481_v60 }
  0xf4   :  { %v641_v35 = vld [vmem:[#allocation4] sm:$0x3] }
  0xf5   :  { %v613_v32 = vsel %vm612_vm5, %v3228_v4, %v609_v30  ;;  %v489_v62 = vrot.slane %v482_v61, 2  ;;  %v490_v1 = vrot.slane %v482_v61, 4  ;;  %v491_v3 = vrot.slane %v482_v61, 6  ;;  %502 = vst.msk [vmem:[#allocation4 + $0x8] sm:$0x3] %vm349_vm2, %v482_v61 }
  0xf6   :  { %v618_v33 = vsel %vm615_vm6, %v617_v31, %v613_v32 }
  0xf7   :  { %v3232_v36 = vpop.eup %3231  ;;  %v642_v37 = vmul.f32 %v618_v33, %v597_v29  ;;  %503 = vst.msk [vmem:[#allocation4 + $0xa] sm:$0x3] %vm349_vm2, %v489_v62 }
  0xf8   :  { %v627_v38 = vmul.f32 %v3232_v36, %v625_v15  ;;  %vm632_vm7 = vweird.f32 %v3232_v36  ;;  %504 = vst.msk [vmem:[#allocation4 + $0xc] sm:$0x3] %vm349_vm2, %v490_v1 }
  0xf9   :  { %v643_v39 = vadd.f32 %v642_v37, %v641_v35  ;;  %vm633_vm9 = vmor %vm631_vm8, %vm632_vm7  ;;  %505 = vst.msk [vmem:[#allocation4 + $0xe] sm:$0x3] %vm349_vm2, %v491_v3 }
  0xfa   :  { %v628_v41 = vsub.f32 1.0, %v627_v38 }
  0xfb   :  { %3233 = vtanh.f32 %v643_v39 }
  0xfc   :  { %v629_v43 = vmul.f32 %v3232_v36, %v628_v41 }
  0xfe   :  { %v630_v45 = vadd.f32 %v3232_v36, %v629_v43 }
 0x100   :  { %v634_v47 = vsel %vm633_vm9, %v3232_v36, %v630_v45 }
 0x101   :  { %v3234_v48 = vpop.eup %3233  ;;  %v639_v49 = vsel %vm636_vm10, %v638_v46, %v634_v47 }
 0x102   :  { %v645_v50 = vsub.f32 1.0, %v639_v49  ;;  %v647_v53 = vmul.f32 %v639_v49, %v4011_v12  ;;  %v758_v49 = vld [vmem:[#allocation4 + $0x2] sm:$0x3] }
 0x104   :  { %v646_v52 = vmul.f32 %v3234_v48, %v645_v50 }
 0x106   :  { %v4152_v54 = vadd.f32 %v647_v53, %v646_v52 }
 0x108   :  { %649 = vst.msk [vmem:[#allocation5] sm:$0x3] %vm349_vm2, %v4152_v54  ;;  %3093 = vmatmul.msk.f32.vlgmr.msrb.gmra.mxu1 %vm529_vm0, %v4152_v54  ;;  %3094 = vmatmul.msk.f32.vlgmr.msrb.gmra.mxu2 %vm529_vm0, %v4152_v54 }
 0x109   :  { %3095 = vmatmul.msk.f32.vlgmr.msra.gmra.mxu3 %vm529_vm0, %v4152_v54  ;;  %941 = vmatpush.msrb.mxu1 %v4016_v16 }
 0x10a   :  { %1019 = vmatpush.msrb.mxu2 %v3989_v0  ;;  %1039 = vmatpush.msra.mxu3 %v4013_v13 }
 0x10b   :  { %942 = vmatpush.msrb.mxu1 %v4032_v22 }
 0x10c   :  { %1020 = vmatpush.msrb.mxu2 %v3991_v2  ;;  %1040 = vmatpush.msra.mxu3 %v4027_v20 }
 0x10d   :  { %943 = vmatpush.msrb.mxu1 %v4039_v24 }
 0x10e   :  { %1021 = vmatpush.msrb.mxu2 %v3996_v5  ;;  %1041 = vmatpush.msra.mxu3 %v4035_v23 }
 0x10f   :  { %v4171_v12 = vld [vmem:[#allocation5] sm:$0x3]  ;;  %944 = vmatpush.msrb.mxu1 %v4044_v26 }
 0x110   :  { %1500 = vst [vmem:[#allocation1] ss:$4 sm:$0xff] %v4171_v12  ;;  %1022 = vmatpush.msrb.mxu2 %v4007_v9  ;;  %1042 = vmatpush.msra.mxu3 %v4041_v25 }
 0x185   :  { %v670_v40 = vpop.f32.mrf.mxu1 }
 0x186   :  { %v671_v4 = vadd.f32 %v4108_v34, %v670_v40 }
 0x188   :  { %v715_v7 = vadd.f32 %v714_v6, %v671_v4  ;;  %v832_v4 = vld [vmem:[#allocation2 + $0x4] sm:$0x3]  ;;  %v854_v6 = vld [vmem:[#allocation3 + $0x4] sm:$0x3] }
 0x18a   :  { %v3096_v8 = vmul.f32 -1.442695, %v715_v7 }
 0x18b   :  { %v690_v10 = vpop.f32.mrf.mxu2 }
 0x18c   :  { %3235 = vpow2.f32 %v3096_v8  ;;  %v691_v63 = vadd.f32 %v4122_v51, %v690_v10  ;;  %v710_v36 = vpop.f32.mrf.mxu3 }
 0x18d   :  { %v711_v42 = vadd.f32 %v4146_v17, %v710_v36 }
 0x18e   :  { %v737_v14 = vadd.f32 %v736_v11, %v691_v63 }
 0x190   :  { %v3097_v15 = vmul.f32 -1.442695, %v737_v14 }
 0x192   :  { %v3236_v18 = vpop.eup %3235  ;;  %3237 = vpow2.f32 %v3097_v15 }
 0x193   :  { %v719_v19 = vadd.f32 1.0, %v3236_v18 }
 0x195   :  { %3239 = vrcp.f32 %v719_v19  ;;  %v731_v31 = vand.u32 2147483648, %v719_v19  ;;  %v729_v33 = vand.u32 2147483647, %v719_v19  ;;  %vm725_vm12 = vweird.f32 %v719_v19 }
 0x197   :  { %v732_v39 = vor.u32 1.1754944e-38, %v731_v31  ;;  %vm730_vm14 = vcmp.eq.f32.partialorder %v729_v33, 8.507059e+37 }
 0x198   :  { %v3238_v21 = vpop.eup %3237 }
 0x199   :  { %v741_v27 = vadd.f32 1.0, %v3238_v21 }
 0x19b   :  { %v3240_v28 = vpop.eup %3239  ;;  %3241 = vrcp.f32 %v741_v27  ;;  %v753_v46 = vand.u32 2147483648, %v741_v27  ;;  %v751_v48 = vand.u32 2147483647, %v741_v27  ;;  %vm747_vm1 = vweird.f32 %v741_v27 }
 0x19c   :  { %v721_v29 = vmul.f32 %v3240_v28, %v719_v19  ;;  %vm726_vm11 = vweird.f32 %v3240_v28 }
 0x19d   :  { %vm727_vm13 = vmor %vm725_vm12, %vm726_vm11  ;;  %v754_v53 = vor.u32 1.1754944e-38, %v753_v46  ;;  %vm752_vm4 = vcmp.eq.f32.partialorder %v751_v48, 8.507059e+37 }
 0x19e   :  { %v722_v30 = vsub.f32 1.0, %v721_v29 }
 0x1a0   :  { %v723_v32 = vmul.f32 %v3240_v28, %v722_v30 }
 0x1a1   :  { %v3242_v35 = vpop.eup %3241 }
 0x1a2   :  { %v743_v37 = vmul.f32 %v3242_v35, %v741_v27  ;;  %v724_v38 = vadd.f32 %v3240_v28, %v723_v32  ;;  %vm748_vm15 = vweird.f32 %v3242_v35 }
 0x1a3   :  { %vm749_vm3 = vmor %vm747_vm1, %vm748_vm15 }
 0x1a4   :  { %v744_v41 = vsub.f32 1.0, %v743_v37  ;;  %v728_v43 = vsel %vm727_vm13, %v3240_v28, %v724_v38 }
 0x1a5   :  { %v733_v44 = vsel %vm730_vm14, %v732_v39, %v728_v43 }
 0x1a6   :  { %v745_v45 = vmul.f32 %v3242_v35, %v744_v41  ;;  %v759_v47 = vmul.f32 %v733_v44, %v711_v42 }
 0x1a8   :  { %v746_v50 = vadd.f32 %v3242_v35, %v745_v45  ;;  %v760_v52 = vadd.f32 %v759_v47, %v758_v49  ;;  %v876_v47 = vld [vmem:[#allocation4 + $0x4] sm:$0x3] }
 0x1aa   :  { %v750_v55 = vsel %vm749_vm3, %v3242_v35, %v746_v50  ;;  %3243 = vtanh.f32 %v760_v52 }
 0x1ab   :  { %v755_v56 = vsel %vm752_vm4, %v754_v53, %v750_v55 }
 0x1ac   :  { %v762_v57 = vsub.f32 1.0, %v755_v56  ;;  %v764_v60 = vmul.f32 %v755_v56, %v4152_v54 }
 0x1b0   :  { %v3244_v58 = vpop.eup %3243 }
 0x1b1   :  { %v763_v59 = vmul.f32 %v3244_v58, %v762_v57 }
 0x1b3   :  { %v4191_v61 = vadd.f32 %v764_v60, %v763_v59 }
 0x1b5   :  { %767 = vst.msk [vmem:[#allocation5 + $0x2] sm:$0x3] %vm349_vm2, %v4191_v61  ;;  %3098 = vmatmul.msk.f32.vlgmr.msra.gmra.mxu0 %vm529_vm0, %v4191_v61  ;;  %3099 = vmatmul.msk.f32.vlgmr.msra.gmra.mxu1 %vm529_vm0, %v4191_v61 }
 0x1b6   :  { %3100 = vmatmul.msk.f32.vlgmr.msra.gmra.mxu2 %vm529_vm0, %v4191_v61  ;;  %1059 = vmatpush.msra.mxu0 %v4016_v16 }
 0x1b7   :  { %1137 = vmatpush.msra.mxu1 %v3989_v0  ;;  %1157 = vmatpush.msra.mxu2 %v4013_v13 }
 0x1b8   :  { %1060 = vmatpush.msra.mxu0 %v4032_v22 }
 0x1b9   :  { %1138 = vmatpush.msra.mxu1 %v3991_v2  ;;  %1158 = vmatpush.msra.mxu2 %v4027_v20 }
 0x1ba   :  { %1061 = vmatpush.msra.mxu0 %v4039_v24 }
 0x1bb   :  { %1139 = vmatpush.msra.mxu1 %v3996_v5  ;;  %1159 = vmatpush.msra.mxu2 %v4035_v23 }
 0x1bc   :  { %v4210_v54 = vld [vmem:[#allocation5 + $0x2] sm:$0x3]  ;;  %1062 = vmatpush.msra.mxu0 %v4044_v26 }
 0x1bd   :  { %1502 = vst [vmem:[#allocation1 + $0x1] ss:$4 sm:$0xff] %v4210_v54  ;;  %1140 = vmatpush.msra.mxu1 %v4007_v9  ;;  %1160 = vmatpush.msra.mxu2 %v4041_v25 }
 0x232   :  { %v788_v62 = vpop.f32.mrf.mxu0  ;;  %v808_v1 = vpop.f32.mrf.mxu1 }
 0x233   :  { %v789_v3 = vadd.f32 %v4108_v34, %v788_v62  ;;  %v809_v40 = vadd.f32 %v4122_v51, %v808_v1  ;;  %v972_v62 = vld [vmem:[#allocation3 + $0x6] sm:$0x3] }
 0x235   :  { %v833_v7 = vadd.f32 %v832_v4, %v789_v3  ;;  %v855_v8 = vadd.f32 %v854_v6, %v809_v40  ;;  %v950_v6 = vld [vmem:[#allocation2 + $0x6] sm:$0x3] }
 0x237   :  { %v3101_v10 = vmul.f32 -1.442695, %v833_v7  ;;  %v3102_v63 = vmul.f32 -1.442695, %v855_v8 }
 0x239   :  { %3245 = vpow2.f32 %v3101_v10  ;;  %v828_v36 = vpop.f32.mrf.mxu2 }
 0x23a   :  { %3247 = vpow2.f32 %v3102_v63  ;;  %v829_v39 = vadd.f32 %v4146_v17, %v828_v36 }
 0x23f   :  { %v3246_v11 = vpop.eup %3245 }
 0x240   :  { %v3248_v14 = vpop.eup %3247  ;;  %v837_v15 = vadd.f32 1.0, %v3246_v11 }
 0x241   :  { %v859_v18 = vadd.f32 1.0, %v3248_v14 }
 0x242   :  { %3249 = vrcp.f32 %v837_v15  ;;  %v849_v31 = vand.u32 2147483648, %v837_v15  ;;  %v847_v33 = vand.u32 2147483647, %v837_v15  ;;  %vm843_vm6 = vweird.f32 %v837_v15 }
 0x243   :  { %3251 = vrcp.f32 %v859_v18  ;;  %v871_v44 = vand.u32 2147483648, %v859_v18  ;;  %vm865_vm10 = vweird.f32 %v859_v18  ;;  %v869_v46 = vand.u32 2147483647, %v859_v18 }
 0x244   :  { %v850_v38 = vor.u32 1.1754944e-38, %v849_v31  ;;  %vm848_vm8 = vcmp.eq.f32.partialorder %v847_v33, 8.507059e+37 }
 0x245   :  { %v872_v50 = vor.u32 1.1754944e-38, %v871_v44  ;;  %vm870_vm12 = vcmp.eq.f32.partialorder %v869_v46, 8.507059e+37 }
 0x248   :  { %v3250_v19 = vpop.eup %3249 }
 0x249   :  { %v3252_v21 = vpop.eup %3251  ;;  %v839_v27 = vmul.f32 %v3250_v19, %v837_v15  ;;  %vm844_vm5 = vweird.f32 %v3250_v19 }
 0x24a   :  { %v861_v28 = vmul.f32 %v3252_v21, %v859_v18  ;;  %vm845_vm7 = vmor %vm843_vm6, %vm844_vm5  ;;  %vm866_vm9 = vweird.f32 %v3252_v21 }
 0x24b   :  { %v840_v29 = vsub.f32 1.0, %v839_v27  ;;  %vm867_vm11 = vmor %vm865_vm10, %vm866_vm9 }
 0x24c   :  { %v862_v30 = vsub.f32 1.0, %v861_v28 }
 0x24d   :  { %v841_v32 = vmul.f32 %v3250_v19, %v840_v29 }
 0x24e   :  { %v863_v35 = vmul.f32 %v3252_v21, %v862_v30 }
 0x24f   :  { %v842_v37 = vadd.f32 %v3250_v19, %v841_v32 }
 0x250   :  { %v864_v43 = vadd.f32 %v3252_v21, %v863_v35 }
 0x251   :  { %v846_v41 = vsel %vm845_vm7, %v3250_v19, %v842_v37 }
 0x252   :  { %v851_v42 = vsel %vm848_vm8, %v850_v38, %v846_v41  ;;  %v868_v49 = vsel %vm867_vm11, %v3252_v21, %v864_v43 }
 0x253   :  { %v877_v45 = vmul.f32 %v851_v42, %v829_v39  ;;  %v873_v52 = vsel %vm870_vm12, %v872_v50, %v868_v49 }
 0x254   :  { %v880_v53 = vsub.f32 1.0, %v873_v52  ;;  %v882_v57 = vmul.f32 %v873_v52, %v4191_v61 }
 0x255   :  { %v878_v48 = vadd.f32 %v877_v45, %v876_v47  ;;  %v994_v45 = vld [vmem:[#allocation4 + $0x6] sm:$0x3] }
 0x257   :  { %3253 = vtanh.f32 %v878_v48 }
 0x25d   :  { %v3254_v55 = vpop.eup %3253 }
 0x25e   :  { %v881_v56 = vmul.f32 %v3254_v55, %v880_v53 }
 0x260   :  { %v4220_v58 = vadd.f32 %v882_v57, %v881_v56 }
 0x262   :  { %885 = vst.msk [vmem:[#allocation5 + $0x4] sm:$0x3] %vm349_vm2, %v4220_v58  ;;  %3103 = vmatmul.msk.f32.vlgmr.msrb.gmra.mxu3 %vm529_vm0, %v4220_v58  ;;  %3104 = vmatmul.msk.f32.vlgmr.msrb.gmra.mxu0 %vm529_vm0, %v4220_v58 }
 0x263   :  { %3105 = vmatmul.msk.f32.vlgmr.msrb.gmra.mxu1 %vm529_vm0, %v4220_v58  ;;  %1177 = vmatpush.msrb.mxu3 %v4016_v16 }
 0x264   :  { %1255 = vmatpush.msrb.mxu0 %v3989_v0  ;;  %1275 = vmatpush.msrb.mxu1 %v4013_v13 }
 0x265   :  { %1178 = vmatpush.msrb.mxu3 %v4032_v22 }
 0x266   :  { %1256 = vmatpush.msrb.mxu0 %v3991_v2  ;;  %1276 = vmatpush.msrb.mxu1 %v4027_v20 }
 0x267   :  { %1179 = vmatpush.msrb.mxu3 %v4039_v24 }
 0x268   :  { %1257 = vmatpush.msrb.mxu0 %v3996_v5  ;;  %1277 = vmatpush.msrb.mxu1 %v4035_v23 }
 0x269   :  { %v4239_v59 = vld [vmem:[#allocation5 + $0x4] sm:$0x3]  ;;  %1180 = vmatpush.msrb.mxu3 %v4044_v26 }
 0x26a   :  { %1504 = vst [vmem:[#allocation1 + $0x2] ss:$4 sm:$0xff] %v4239_v59  ;;  %1258 = vmatpush.msrb.mxu0 %v4007_v9  ;;  %1278 = vmatpush.msrb.mxu1 %v4041_v25 }
 0x2df   :  { %v926_v60 = vpop.f32.mrf.mxu0 }
 0x2e0   :  { %v927_v61 = vadd.f32 %v4122_v51, %v926_v60  ;;  %v946_v33 = vpop.f32.mrf.mxu1 }
 0x2e1   :  { %v947_v37 = vadd.f32 %v4146_v17, %v946_v33 }
 0x2e2   :  { %v973_v1 = vadd.f32 %v972_v62, %v927_v61 }
 0x2e4   :  { %v3107_v3 = vmul.f32 -1.442695, %v973_v1 }
 0x2e5   :  { %v906_v40 = vpop.f32.mrf.mxu3 }
 0x2e6   :  { %3255 = vpow2.f32 %v3107_v3  ;;  %v907_v4 = vadd.f32 %v4108_v34, %v906_v40 }
 0x2e8   :  { %v951_v7 = vadd.f32 %v950_v6, %v907_v4 }
 0x2ea   :  { %v3106_v8 = vmul.f32 -1.442695, %v951_v7 }
 0x2ec   :  { %v3256_v10 = vpop.eup %3255  ;;  %3257 = vpow2.f32 %v3106_v8 }
 0x2ed   :  { %v977_v63 = vadd.f32 1.0, %v3256_v10 }
 0x2ef   :  { %3259 = vrcp.f32 %v977_v63  ;;  %v989_v42 = vand.u32 2147483648, %v977_v63  ;;  %vm983_vm4 = vweird.f32 %v977_v63  ;;  %v987_v44 = vand.u32 2147483647, %v977_v63 }
 0x2f1   :  { %v990_v48 = vor.u32 1.1754944e-38, %v989_v42  ;;  %vm988_vm6 = vcmp.eq.f32.partialorder %v987_v44, 8.507059e+37  ;;  %v3394_v42 = vld [vmem:[#allocation12 + $0x50] sm:$0xff] }
 0x2f2   :  { %v3258_v11 = vpop.eup %3257 }
 0x2f3   :  { %v955_v14 = vadd.f32 1.0, %v3258_v11 }
 0x2f5   :  { %3261 = vrcp.f32 %v955_v14  ;;  %v3260_v15 = vpop.eup %3259  ;;  %v967_v29 = vand.u32 2147483648, %v955_v14  ;;  %v965_v31 = vand.u32 2147483647, %v955_v14  ;;  %vm961_vm14 = vweird.f32 %v955_v14 }
 0x2f6   :  { %v979_v18 = vmul.f32 %v3260_v15, %v977_v63  ;;  %vm984_vm3 = vweird.f32 %v3260_v15 }
 0x2f7   :  { %v968_v36 = vor.u32 1.1754944e-38, %v967_v29  ;;  %vm966_vm1 = vcmp.eq.f32.partialorder %v965_v31, 8.507059e+37  ;;  %vm985_vm5 = vmor %vm983_vm4, %vm984_vm3  ;;  %v1112_v29 = vld [vmem:[#allocation4 + $0x8] sm:$0x3] }
 0x2f8   :  { %v980_v27 = vsub.f32 1.0, %v979_v18 }
 0x2fa   :  { %v981_v32 = vmul.f32 %v3260_v15, %v980_v27 }
 0x2fb   :  { %v3262_v19 = vpop.eup %3261 }
 0x2fc   :  { %v957_v21 = vmul.f32 %v3262_v19, %v955_v14  ;;  %vm962_vm13 = vweird.f32 %v3262_v19  ;;  %v982_v41 = vadd.f32 %v3260_v15, %v981_v32 }
 0x2fd   :  { %vm963_vm15 = vmor %vm961_vm14, %vm962_vm13 }
 0x2fe   :  { %v958_v28 = vsub.f32 1.0, %v957_v21  ;;  %v986_v47 = vsel %vm985_vm5, %v3260_v15, %v982_v41  ;;  %v3393_v41 = vld [vmem:[#allocation12 + $0x58] sm:$0xff] }
 0x2ff   :  { %v991_v49 = vsel %vm988_vm6, %v990_v48, %v986_v47  ;;  %v1186_v48 = vld [vmem:[#allocation2 + $0xa] sm:$0x3] }
 0x300   :  { %v959_v30 = vmul.f32 %v3262_v19, %v958_v28  ;;  %v998_v50 = vsub.f32 1.0, %v991_v49  ;;  %v1000_v55 = vmul.f32 %v991_v49, %v4220_v58 }
 0x302   :  { %v960_v35 = vadd.f32 %v3262_v19, %v959_v30 }
 0x304   :  { %v964_v38 = vsel %vm963_vm15, %v3262_v19, %v960_v35 }
 0x305   :  { %v969_v39 = vsel %vm966_vm1, %v968_v36, %v964_v38 }
 0x306   :  { %v995_v43 = vmul.f32 %v969_v39, %v947_v37 }
 0x308   :  { %v996_v46 = vadd.f32 %v995_v43, %v994_v45  ;;  %v3395_v43 = vld [vmem:[#allocation12 + $0x48] sm:$0xff]  ;;  %v3396_v45 = vld [vmem:[#allocation12 + $0x40] sm:$0xff] }
 0x30a   :  { %3263 = vtanh.f32 %v996_v46 }
 0x310   :  { %v3264_v52 = vpop.eup %3263 }
 0x311   :  { %v999_v53 = vmul.f32 %v3264_v52, %v998_v50 }
 0x313   :  { %v4249_v56 = vadd.f32 %v1000_v55, %v999_v53  ;;  %v1208_v55 = vld [vmem:[#allocation3 + $0xa] sm:$0x3] }
 0x315   :  { %1003 = vst.msk [vmem:[#allocation5 + $0x6] sm:$0x3] %vm349_vm2, %v4249_v56  ;;  %3108 = vmatmul.msk.f32.vlgmr.msrb.gmra.mxu2 %vm529_vm0, %v4249_v56  ;;  %3109 = vmatmul.msk.f32.vlgmr.msra.gmra.mxu3 %vm529_vm0, %v4249_v56 }
 0x316   :  { %3110 = vmatmul.msk.f32.vlgmr.msra.gmra.mxu0 %vm529_vm0, %v4249_v56  ;;  %1295 = vmatpush.msrb.mxu2 %v4016_v16 }
 0x317   :  { %1373 = vmatpush.msra.mxu3 %v3989_v0  ;;  %1393 = vmatpush.msra.mxu0 %v4013_v13 }
 0x318   :  { %1296 = vmatpush.msrb.mxu2 %v4032_v22  ;;  %v1090_v22 = vld [vmem:[#allocation3 + $0x8] sm:$0x3] }
 0x319   :  { %1374 = vmatpush.msra.mxu3 %v3991_v2  ;;  %1394 = vmatpush.msra.mxu0 %v4027_v20  ;;  %v1068_v20 = vld [vmem:[#allocation2 + $0x8] sm:$0x3] }
 0x31a   :  { %1297 = vmatpush.msrb.mxu2 %v4039_v24 }
 0x31b   :  { %1375 = vmatpush.msra.mxu3 %v3996_v5  ;;  %1395 = vmatpush.msra.mxu0 %v4035_v23 }
 0x31c   :  { %v1479_v57 = vld [vmem:[#allocation5 + $0x6] sm:$0x3]  ;;  %1298 = vmatpush.msrb.mxu2 %v4044_v26 }
 0x31d   :  { %1506 = vst [vmem:[#allocation1 + $0x3] ss:$4 sm:$0xff] %v1479_v57  ;;  %1376 = vmatpush.msra.mxu3 %v4007_v9  ;;  %1396 = vmatpush.msra.mxu0 %v4041_v25 }
 0x324   :  { %v4271_v0 = vld.sshfl [vmem:[#allocation1] sm:$0xff pattern:$0x73625140] }
 0x325   :  { %1576 = vst [vmem:[#allocation1] ss:$4 sm:$0xff] %v4171_v12 }
 0x326   :  { %1578 = vst [vmem:[#allocation1 + $0x1] ss:$4 sm:$0xff] %v4210_v54 }
 0x327   :  { %1580 = vst [vmem:[#allocation1 + $0x2] ss:$4 sm:$0xff] %v4239_v59 }
 0x328   :  { %1582 = vst [vmem:[#allocation1 + $0x3] ss:$4 sm:$0xff] %v1479_v57 }
 0x32f   :  { %v4276_v2 = vld.sshfl [vmem:[#allocation1] sm:$0xff pattern:$0x73625140] }
 0x330   :  { %1652 = vst [vmem:[#allocation1] ss:$4 sm:$0xff] %v4171_v12 }
 0x331   :  { %1654 = vst [vmem:[#allocation1 + $0x1] ss:$4 sm:$0xff] %v4210_v54 }
 0x332   :  { %1656 = vst [vmem:[#allocation1 + $0x2] ss:$4 sm:$0xff] %v4239_v59 }
 0x333   :  { %1658 = vst [vmem:[#allocation1 + $0x3] ss:$4 sm:$0xff] %v1479_v57 }
 0x393   :  { %v1064_v8 = vpop.f32.mrf.mxu0 }
 0x394   :  { %v1065_v14 = vadd.f32 %v4146_v17, %v1064_v8 }
 0x398   :  { %v1024_v5 = vpop.f32.mrf.mxu2  ;;  %v1044_v9 = vpop.f32.mrf.mxu3 }
 0x399   :  { %v1025_v13 = vadd.f32 %v4108_v34, %v1024_v5  ;;  %v1045_v16 = vadd.f32 %v4122_v51, %v1044_v9 }
 0x39b   :  { %v1069_v23 = vadd.f32 %v1068_v20, %v1025_v13  ;;  %v1091_v24 = vadd.f32 %v1090_v22, %v1045_v16  ;;  %v1487_v13 = vld [vmem:[#allocation15 + $0x18] sm:$0xff]  ;;  %v1486_v22 = vld [vmem:[#allocation15 + $0x10] sm:$0xff] }
 0x39d   :  { %v3111_v25 = vmul.f32 -1.442695, %v1069_v23  ;;  %v3112_v26 = vmul.f32 -1.442695, %v1091_v24  ;;  %v1485_v23 = vld [vmem:[#allocation15 + $0x8] sm:$0xff] }
 0x39f   :  { %3265 = vpow2.f32 %v3111_v25  ;;  %v1484_v25 = vld [vmem:[#allocation15] sm:$0xff] }
 0x3a0   :  { %3267 = vpow2.f32 %v3112_v26 }
 0x3a5   :  { %v3266_v12 = vpop.eup %3265 }
 0x3a6   :  { %v3268_v58 = vpop.eup %3267  ;;  %v1073_v54 = vadd.f32 1.0, %v3266_v12 }
 0x3a7   :  { %v1095_v60 = vadd.f32 1.0, %v3268_v58 }
 0x3a8   :  { %3269 = vrcp.f32 %v1073_v54  ;;  %v1085_v40 = vand.u32 2147483648, %v1073_v54  ;;  %v1083_v7 = vand.u32 2147483647, %v1073_v54  ;;  %vm1079_vm8 = vweird.f32 %v1073_v54 }
 0x3a9   :  { %3271 = vrcp.f32 %v1095_v60  ;;  %v1107_v27 = vand.u32 2147483648, %v1095_v60  ;;  %vm1101_vm12 = vweird.f32 %v1095_v60  ;;  %v1105_v28 = vand.u32 2147483647, %v1095_v60 }
 0x3aa   :  { %v1086_v11 = vor.u32 1.1754944e-38, %v1085_v40  ;;  %vm1084_vm10 = vcmp.eq.f32.partialorder %v1083_v7, 8.507059e+37 }
 0x3ab   :  { %v1108_v32 = vor.u32 1.1754944e-38, %v1107_v27  ;;  %vm1106_vm14 = vcmp.eq.f32.partialorder %v1105_v28, 8.507059e+37 }
 0x3ae   :  { %v3270_v59 = vpop.eup %3269 }
 0x3af   :  { %v3272_v61 = vpop.eup %3271  ;;  %v1075_v62 = vmul.f32 %v3270_v59, %v1073_v54  ;;  %vm1080_vm7 = vweird.f32 %v3270_v59 }
 0x3b0   :  { %v1097_v1 = vmul.f32 %v3272_v61, %v1095_v60  ;;  %vm1081_vm9 = vmor %vm1079_vm8, %vm1080_vm7  ;;  %vm1102_vm11 = vweird.f32 %v3272_v61 }
 0x3b1   :  { %v1076_v3 = vsub.f32 1.0, %v1075_v62  ;;  %vm1103_vm13 = vmor %vm1101_vm12, %vm1102_vm11 }
 0x3b2   :  { %v1098_v4 = vsub.f32 1.0, %v1097_v1 }
 0x3b3   :  { %v1077_v6 = vmul.f32 %v3270_v59, %v1076_v3 }
 0x3b4   :  { %v1099_v10 = vmul.f32 %v3272_v61, %v1098_v4 }
 0x3b5   :  { %v1078_v63 = vadd.f32 %v3270_v59, %v1077_v6 }
 0x3b6   :  { %v1100_v19 = vadd.f32 %v3272_v61, %v1099_v10 }
 0x3b7   :  { %v1082_v15 = vsel %vm1081_vm9, %v3270_v59, %v1078_v63 }
 0x3b8   :  { %v1087_v18 = vsel %vm1084_vm10, %v1086_v11, %v1082_v15  ;;  %v1104_v31 = vsel %vm1103_vm13, %v3272_v61, %v1100_v19  ;;  %v1230_v11 = vld [vmem:[#allocation4 + $0xa] sm:$0x3] }
 0x3b9   :  { %v1113_v21 = vmul.f32 %v1087_v18, %v1065_v14  ;;  %v1109_v33 = vsel %vm1106_vm14, %v1108_v32, %v1104_v31 }
 0x3ba   :  { %v1116_v35 = vsub.f32 1.0, %v1109_v33  ;;  %v1118_v38 = vmul.f32 %v1109_v33, %v4249_v56 }
 0x3bb   :  { %v1114_v30 = vadd.f32 %v1113_v21, %v1112_v29 }
 0x3bd   :  { %3273 = vtanh.f32 %v1114_v30 }
 0x3c3   :  { %v3274_v36 = vpop.eup %3273 }
 0x3c4   :  { %v1117_v37 = vmul.f32 %v3274_v36, %v1116_v35  ;;  %v4317_v35 = vld [vmem:[#allocation14] ss:$0 sm:$0xff] }
 0x3c6   :  { %v4285_v39 = vadd.f32 %v1118_v38, %v1117_v37  ;;  %v1304_v38 = vld [vmem:[#allocation2 + $0xc] sm:$0x3] }
 0x3c8   :  { %1121 = vst.msk [vmem:[#allocation5 + $0x8] sm:$0x3] %vm349_vm2, %v4285_v39  ;;  %3113 = vmatmul.msk.f32.vlgmr.msra.gmra.mxu1 %vm529_vm0, %v4285_v39  ;;  %3114 = vmatmul.msk.f32.vlgmr.msra.gmra.mxu2 %vm529_vm0, %v4285_v39 }
 0x3c9   :  { %3115 = vmatmul.msk.f32.vlgmr.msrb.gmra.mxu3 %vm529_vm0, %v4285_v39  ;;  %1413 = vmatpush.msra.mxu1 %v3393_v41 }
 0x3ca   :  { %1533 = vmatpush.msra.mxu2 %v1487_v13 }
 0x3cb   :  { %1414 = vmatpush.msra.mxu1 %v3394_v42 }
 0x3cc   :  { %1534 = vmatpush.msra.mxu2 %v1486_v22  ;;  %v1569_v22 = vld [vmem:[#allocation15 + $0x30] sm:$0xff] }
 0x3cd   :  { %1415 = vmatpush.msra.mxu1 %v3395_v43 }
 0x3ce   :  { %1535 = vmatpush.msra.mxu2 %v1485_v23  ;;  %v4333_v23 = vld [vmem:[#allocation17 + $0x10] sm:$0xff] }
 0x3cf   :  { %v4295_v44 = vld [vmem:[#allocation5 + $0x8] sm:$0x3]  ;;  %1416 = vmatpush.msra.mxu1 %v3396_v45 }
 0x3d0   :  { %1508 = vst [vmem:[#allocation1 + $0x20] ss:$4 sm:$0xff] %v4295_v44  ;;  %1536 = vmatpush.msra.mxu2 %v1484_v25  ;;  %v1568_v25 = vld [vmem:[#allocation15 + $0x28] sm:$0xff] }
 0x445   :  { %v1142_v46 = vpop.f32.mrf.mxu1 }
 0x446   :  { %v1143_v47 = vadd.f32 %v4108_v34, %v1142_v46 }
 0x448   :  { %v1187_v49 = vadd.f32 %v1186_v48, %v1143_v47 }
 0x44a   :  { %v3116_v50 = vmul.f32 -1.442695, %v1187_v49  ;;  %v4321_v49 = vld [vmem:[#allocation18] ss:$0 sm:$0xff] }
 0x44b   :  { %v1162_v52 = vpop.f32.mrf.mxu2 }
 0x44c   :  { %3275 = vpow2.f32 %v3116_v50  ;;  %v1163_v53 = vadd.f32 %v4122_v51, %v1162_v52  ;;  %v1182_v59 = vpop.f32.mrf.mxu3 }
 0x44d   :  { %v1183_v40 = vadd.f32 %v4146_v17, %v1182_v59 }
 0x44e   :  { %v1209_v56 = vadd.f32 %v1208_v55, %v1163_v53 }
 0x450   :  { %v3117_v57 = vmul.f32 -1.442695, %v1209_v56 }
 0x452   :  { %v3276_v5 = vpop.eup %3275  ;;  %3277 = vpow2.f32 %v3117_v57  ;;  %v1570_v57 = vld [vmem:[#allocation15 + $0x38] sm:$0xff] }
 0x453   :  { %v1191_v9 = vadd.f32 1.0, %v3276_v5  ;;  %v1646_v5 = vld [vmem:[#allocation15 + $0x58] sm:$0xff]  ;;  %1609 = vmatpush.msrb.mxu3 %v1570_v57 }
 0x455   :  { %3279 = vrcp.f32 %v1191_v9  ;;  %v1203_v12 = vand.u32 2147483648, %v1191_v9  ;;  %v1201_v54 = vand.u32 2147483647, %v1191_v9  ;;  %vm1197_vm1 = vweird.f32 %v1191_v9  ;;  %1610 = vmatpush.msrb.mxu3 %v1569_v22 }
 0x457   :  { %v1204_v1 = vor.u32 1.1754944e-38, %v1203_v12  ;;  %vm1202_vm4 = vcmp.eq.f32.partialorder %v1201_v54, 8.507059e+37  ;;  %v1567_v54 = vld [vmem:[#allocation15 + $0x20] sm:$0xff]  ;;  %1611 = vmatpush.msrb.mxu3 %v1568_v25 }
 0x458   :  { %v3278_v16 = vpop.eup %3277 }
 0x459   :  { %v1213_v20 = vadd.f32 1.0, %v3278_v16  ;;  %1612 = vmatpush.msrb.mxu3 %v1567_v54 }
 0x45b   :  { %v3280_v34 = vpop.eup %3279  ;;  %3281 = vrcp.f32 %v1213_v20  ;;  %v1225_v8 = vand.u32 2147483648, %v1213_v20  ;;  %v1223_v63 = vand.u32 2147483647, %v1213_v20  ;;  %vm1219_vm6 = vweird.f32 %v1213_v20 }
 0x45c   :  { %v1193_v24 = vmul.f32 %v3280_v34, %v1191_v9  ;;  %vm1198_vm15 = vweird.f32 %v3280_v34  ;;  %v4328_v9 = vld [vmem:[#allocation17 + $0x18] sm:$0xff] }
 0x45d   :  { %vm1199_vm3 = vmor %vm1197_vm1, %vm1198_vm15  ;;  %v1226_v18 = vor.u32 1.1754944e-38, %v1225_v8  ;;  %vm1224_vm8 = vcmp.eq.f32.partialorder %v1223_v63, 8.507059e+37 }
 0x45e   :  { %v1194_v26 = vsub.f32 1.0, %v1193_v24 }
 0x460   :  { %v1195_v58 = vmul.f32 %v3280_v34, %v1194_v26  ;;  %v1644_v26 = vld [vmem:[#allocation15 + $0x48] sm:$0xff] }
 0x461   :  { %v3282_v60 = vpop.eup %3281 }
 0x462   :  { %v1215_v61 = vmul.f32 %v3282_v60, %v1213_v20  ;;  %v1196_v62 = vadd.f32 %v3280_v34, %v1195_v58  ;;  %vm1220_vm5 = vweird.f32 %v3282_v60  ;;  %v4338_v58 = vld [vmem:[#allocation17 + $0x8] sm:$0xff] }
 0x463   :  { %vm1221_vm7 = vmor %vm1219_vm6, %vm1220_vm5 }
 0x464   :  { %v1216_v3 = vsub.f32 1.0, %v1215_v61  ;;  %v1200_v4 = vsel %vm1199_vm3, %v3280_v34, %v1196_v62  ;;  %v1645_v34 = vld [vmem:[#allocation15 + $0x50] sm:$0xff]  ;;  %v1643_v61 = vld [vmem:[#allocation15 + $0x40] sm:$0xff] }
 0x465   :  { %v1205_v6 = vsel %vm1202_vm4, %v1204_v1, %v1200_v4  ;;  %v4340_v62 = vld [vmem:[#allocation17] sm:$0xff] }
 0x466   :  { %v1217_v7 = vmul.f32 %v3282_v60, %v1216_v3  ;;  %v1231_v10 = vmul.f32 %v1205_v6, %v1183_v40 }
 0x468   :  { %v1218_v14 = vadd.f32 %v3282_v60, %v1217_v7  ;;  %v1232_v15 = vadd.f32 %v1231_v10, %v1230_v11  ;;  %v4344_v7 = vld [vmem:[#allocation14 + $0x2] ss:$0 sm:$0xff] }
 0x46a   :  { %v1222_v19 = vsel %vm1221_vm7, %v3282_v60, %v1218_v14  ;;  %3283 = vtanh.f32 %v1232_v15 }
 0x46b   :  { %v1227_v21 = vsel %vm1224_vm8, %v1226_v18, %v1222_v19  ;;  %v1348_v19 = vld [vmem:[#allocation4 + $0xc] sm:$0x3] }
 0x46c   :  { %v1234_v27 = vsub.f32 1.0, %v1227_v21  ;;  %v1236_v29 = vmul.f32 %v1227_v21, %v4285_v39  ;;  %v1326_v39 = vld [vmem:[#allocation3 + $0xc] sm:$0x3] }
 0x470   :  { %v3284_v17 = vpop.eup %3283 }
 0x471   :  { %v1235_v28 = vmul.f32 %v3284_v17, %v1234_v27 }
 0x473   :  { %v4302_v30 = vadd.f32 %v1236_v29, %v1235_v28 }
 0x475   :  { %1239 = vst.msk [vmem:[#allocation5 + $0xa] sm:$0x3] %vm349_vm2, %v4302_v30  ;;  %3118 = vmatmul.msk.f32.vlgmr.msrb.gmra.mxu0 %vm529_vm0, %v4302_v30  ;;  %3119 = vmatmul.msk.f32.vlgmr.msrb.gmra.mxu1 %vm529_vm0, %v4302_v30 }
 0x476   :  { %3120 = vmatmul.msk.f32.vlgmr.msrb.gmra.mxu2 %vm529_vm0, %v4302_v30  ;;  %1685 = vmatpush.msrb.mxu0 %v1646_v5 }
 0x477   :  { %1757 = vmatpush.msrb.mxu1 %v4328_v9 }
 0x478   :  { %1686 = vmatpush.msrb.mxu0 %v1645_v34 }
 0x479   :  { %1758 = vmatpush.msrb.mxu1 %v4333_v23 }
 0x47a   :  { %1687 = vmatpush.msrb.mxu0 %v1644_v26 }
 0x47b   :  { %1759 = vmatpush.msrb.mxu1 %v4338_v58 }
 0x47c   :  { %v4312_v31 = vld [vmem:[#allocation5 + $0xa] sm:$0x3]  ;;  %1688 = vmatpush.msrb.mxu0 %v1643_v61 }
 0x47d   :  { %1510 = vst [vmem:[#allocation1 + $0x21] ss:$4 sm:$0xff] %v4312_v31  ;;  %1760 = vmatpush.msrb.mxu1 %v4340_v62 }
 0x47e   :  { %3128 = vmatmul.msk.f32.vlgmr.msra.gmra.mxu2 %vm529_vm0, %v4271_v0 }
 0x4f2   :  { %v1260_v32 = vpop.f32.mrf.mxu0  ;;  %v1280_v33 = vpop.f32.mrf.mxu1 }
 0x4f3   :  { %v1261_v36 = vadd.f32 %v4317_v35, %v1260_v32  ;;  %v1281_v37 = vadd.f32 %v4122_v51, %v1280_v33 }
 0x4f5   :  { %v1305_v41 = vadd.f32 %v1304_v38, %v1261_v36  ;;  %v1327_v42 = vadd.f32 %v1326_v39, %v1281_v37  ;;  %v4353_v38 = vld [vmem:[#allocation17 + $0x38] sm:$0xff]  ;;  %v4363_v39 = vld [vmem:[#allocation17 + $0x30] sm:$0xff] }
 0x4f7   :  { %v3121_v43 = vmul.f32 -1.442695, %v1305_v41  ;;  %v3122_v45 = vmul.f32 -1.442695, %v1327_v42  ;;  %v4374_v41 = vld [vmem:[#allocation9 + $0x2] sm:$0x3] }
 0x4f9   :  { %3285 = vpow2.f32 %v3121_v43  ;;  %v1300_v46 = vpop.f32.mrf.mxu2  ;;  %v1667_v43 = vld.sshfl [vmem:[#allocation1] sm:$0xff pattern:$0x73625140] }
 0x4fa   :  { %3287 = vpow2.f32 %v3122_v45  ;;  %v1301_v8 = vadd.f32 %v4344_v7, %v1300_v46  ;;  %v4380_v45 = vld [vmem:[#allocation17 + $0x20] sm:$0xff]  ;;  %v3399_v46 = vld [vmem:[#allocation14 + $0x1] ss:$0 sm:$0xff] }
 0x4ff   :  { %v3286_v47 = vpop.eup %3285 }
 0x500   :  { %v3288_v48 = vpop.eup %3287  ;;  %v1309_v0 = vadd.f32 1.0, %v3286_v47 }
 0x501   :  { %v4323_v50 = vadd.f32 1.0, %v3288_v48  ;;  %v1538_v52 = vpop.f32.mrf.mxu2  ;;  %v1444_v48 = vld [vmem:[#allocation3 + $0xe] sm:$0x3] }
 0x502   :  { %3289 = vrcp.f32 %v1309_v0  ;;  %v1539_v51 = vadd.f32 %v4321_v49, %v1538_v52  ;;  %v1321_v59 = vand.u32 2147483648, %v1309_v0  ;;  %v1319_v3 = vand.u32 2147483647, %v1309_v0  ;;  %v4397_v52 = vld [vmem:[#allocation18 + $0x2] ss:$0 sm:$0xff] }
 0x503   :  { %3291 = vrcp.f32 %v4323_v50  ;;  %vm1315_vm10 = vweird.f32 %v1309_v0  ;;  %v1343_v14 = vand.u32 2147483648, %v4323_v50  ;;  %vm1337_vm14 = vweird.f32 %v4323_v50 }
 0x504   :  { %v1546_v53 = vrot.slane %v1539_v51, 2  ;;  %v1547_v55 = vrot.slane %v1539_v51, 4  ;;  %v1548_v56 = vrot.slane %v1539_v51, 6  ;;  %1558 = vst.msk [vmem:[#allocation2] sm:$0x3] %vm349_vm2, %v1539_v51  ;;  %v1322_v6 = vor.u32 1.1754944e-38, %v1321_v59 }
 0x505   :  { %vm1320_vm12 = vcmp.eq.f32.partialorder %v1319_v3, 8.507059e+37  ;;  %v1341_v18 = vand.u32 2147483647, %v4323_v50  ;;  %v1344_v17 = vor.u32 1.1754944e-38, %v1343_v14 }
 0x506   :  { %1559 = vst.msk [vmem:[#allocation2 + $0x2] sm:$0x3] %vm349_vm2, %v1546_v53 }
 0x507   :  { %1560 = vst.msk [vmem:[#allocation2 + $0x4] sm:$0x3] %vm349_vm2, %v1547_v55  ;;  %vm1342_vm1 = vcmp.eq.f32.partialorder %v1341_v18, 8.507059e+37  ;;  %v1422_v55 = vld [vmem:[#allocation2 + $0xe] sm:$0x3] }
 0x508   :  { %v3290_v13 = vpop.eup %3289  ;;  %1561 = vst.msk [vmem:[#allocation2 + $0x6] sm:$0x3] %vm349_vm2, %v1548_v56 }
 0x509   :  { %v3292_v16 = vpop.eup %3291  ;;  %v1311_v20 = vmul.f32 %v3290_v13, %v1309_v0  ;;  %vm1316_vm9 = vweird.f32 %v3290_v13 }
 0x50a   :  { %v1333_v24 = vmul.f32 %v3292_v16, %v4323_v50  ;;  %vm1317_vm11 = vmor %vm1315_vm10, %vm1316_vm9  ;;  %vm1338_vm13 = vweird.f32 %v3292_v16 }
 0x50b   :  { %v1312_v12 = vsub.f32 1.0, %v1311_v20  ;;  %vm1339_vm15 = vmor %vm1337_vm14, %vm1338_vm13 }
 0x50c   :  { %v1334_v60 = vsub.f32 1.0, %v1333_v24 }
 0x50d   :  { %v1313_v1 = vmul.f32 %v3290_v13, %v1312_v12 }
 0x50e   :  { %v1335_v40 = vmul.f32 %v3292_v16, %v1334_v60 }
 0x50f   :  { %v1314_v4 = vadd.f32 %v3290_v13, %v1313_v1  ;;  %v4412_v1 = vld [vmem:[#allocation17 + $0x58] sm:$0xff] }
 0x510   :  { %v1336_v11 = vadd.f32 %v3292_v16, %v1335_v40  ;;  %1803 = vmatpush.msrb.mxu2 %v4412_v1 }
 0x511   :  { %v1318_v10 = vsel %vm1317_vm11, %v3290_v13, %v1314_v4  ;;  %v4401_v13 = vld [vmem:[#allocation18 + $0x1] ss:$0 sm:$0xff] }
 0x512   :  { %v1323_v63 = vsel %vm1320_vm12, %v1322_v6, %v1318_v10  ;;  %v1340_v27 = vsel %vm1339_vm15, %v3292_v16, %v1336_v11 }
 0x513   :  { %v1349_v15 = vmul.f32 %v1323_v63, %v1301_v8  ;;  %v1345_v28 = vsel %vm1342_vm1, %v1344_v17, %v1340_v27 }
 0x514   :  { %v1352_v29 = vsub.f32 1.0, %v1345_v28  ;;  %v1354_v36 = vmul.f32 %v1345_v28, %v4302_v30  ;;  %v4368_v30 = vld [vmem:[#allocation17 + $0x28] sm:$0xff] }
 0x515   :  { %v1350_v21 = vadd.f32 %v1349_v15, %v1348_v19 }
 0x517   :  { %3293 = vtanh.f32 %v1350_v21 }
 0x51d   :  { %v3294_v32 = vpop.eup %3293 }
 0x51e   :  { %v1353_v33 = vmul.f32 %v3294_v32, %v1352_v29 }
 0x520   :  { %v4351_v37 = vadd.f32 %v1354_v36, %v1353_v33 }
 0x522   :  { %1357 = vst.msk [vmem:[#allocation5 + $0xc] sm:$0x3] %vm349_vm2, %v4351_v37  ;;  %3123 = vmatmul.msk.f32.vlgmr.msra.gmra.mxu3 %vm529_vm0, %v4351_v37  ;;  %3124 = vmatmul.msk.f32.vlgmr.msra.gmra.mxu0 %vm529_vm0, %v4351_v37 }
 0x523   :  { %3125 = vmatmul.msk.f32.vlgmr.msra.gmra.mxu1 %vm529_vm0, %v4351_v37  ;;  %1877 = vmatpush.msra.mxu3 %v4328_v9 }
 0x524   :  { %1780 = vmatpush.msra.mxu1 %v4353_v38  ;;  %1897 = vmatpush.msra.mxu0 %v4353_v38 }
 0x525   :  { %1878 = vmatpush.msra.mxu3 %v4333_v23 }
 0x526   :  { %1781 = vmatpush.msra.mxu1 %v4363_v39  ;;  %1898 = vmatpush.msra.mxu0 %v4363_v39 }
 0x527   :  { %1879 = vmatpush.msra.mxu3 %v4338_v58 }
 0x528   :  { %1782 = vmatpush.msra.mxu1 %v4368_v30  ;;  %1899 = vmatpush.msra.mxu0 %v4368_v30 }
 0x529   :  { %v4378_v42 = vld [vmem:[#allocation5 + $0xc] sm:$0x3]  ;;  %1880 = vmatpush.msra.mxu3 %v4340_v62 }
 0x52a   :  { %1512 = vst [vmem:[#allocation1 + $0x22] ss:$4 sm:$0xff] %v4378_v42  ;;  %3130 = vmatmul.msk.f32.vlgmr.msrb.gmra.mxu3 %vm529_vm0, %v4276_v2  ;;  %3132 = vmatmul.msk.f32.vlgmr.msrb.gmra.mxu0 %vm529_vm0, %v1667_v43  ;;  %v1466_v43 = vld [vmem:[#allocation4 + $0xe] sm:$0x3] }
 0x52b   :  { %3134 = vmatmul.msk.f32.vlgmr.msrb.gmra.mxu1 %vm529_vm0, %v4374_v41  ;;  %1900 = vmatpush.msra.mxu0 %v4380_v45 }
 0x52c   :  { %1783 = vmatpush.msra.mxu1 %v4380_v45  ;;  %2011 = vmatpush.msrb.mxu3 %v4353_v38 }
 0x52d   :  { %2031 = vmatpush.msrb.mxu0 %v4412_v1 }
 0x52e   :  { %2012 = vmatpush.msrb.mxu3 %v4363_v39  ;;  %1917 = vmatpush.msrb.mxu1 %v4412_v1 }
 0x530   :  { %2013 = vmatpush.msrb.mxu3 %v4368_v30 }
 0x532   :  { %2014 = vmatpush.msrb.mxu3 %v4380_v45 }
 0x533   :  { %3135 = vmatmul.msk.f32.vlgmr.msra.gmra.mxu1 %vm529_vm0, %v4374_v41 }
 0x59f   :  { %v1398_v2 = vpop.f32.mrf.mxu0 }
 0x5a0   :  { %v1399_v47 = vadd.f32 %v3399_v46, %v1398_v2  ;;  %v1418_v18 = vpop.f32.mrf.mxu1  ;;  %v4418_v46 = vld [vmem:[#allocation17 + $0x50] sm:$0xff] }
 0x5a1   :  { %v1419_v27 = vadd.f32 %v4344_v7, %v1418_v18  ;;  %1804 = vmatpush.msrb.mxu2 %v4418_v46  ;;  %1918 = vmatpush.msrb.mxu1 %v4418_v46 }
 0x5a2   :  { %v1445_v0 = vadd.f32 %v1444_v48, %v1399_v47  ;;  %v4420_v47 = vld [vmem:[#allocation17 + $0x48] sm:$0xff]  ;;  %2032 = vmatpush.msrb.mxu0 %v4418_v46 }
 0x5a3   :  { %1805 = vmatpush.msrb.mxu2 %v4420_v47  ;;  %1919 = vmatpush.msrb.mxu1 %v4420_v47 }
 0x5a4   :  { %v3127_v50 = vmul.f32 -1.442695, %v1445_v0  ;;  %v4424_v0 = vld [vmem:[#allocation17 + $0x40] sm:$0xff]  ;;  %2033 = vmatpush.msrb.mxu0 %v4420_v47 }
 0x5a5   :  { %v1378_v51 = vpop.f32.mrf.mxu3  ;;  %1806 = vmatpush.msrb.mxu2 %v4424_v0  ;;  %1920 = vmatpush.msrb.mxu1 %v4424_v0 }
 0x5a6   :  { %3295 = vpow2.f32 %v3127_v50  ;;  %v1379_v53 = vadd.f32 %v4317_v35, %v1378_v51  ;;  %2034 = vmatpush.msrb.mxu0 %v4424_v0 }
 0x5a7   :  { %v1690_v56 = vpop.f32.mrf.mxu0  ;;  %1991 = vmatpush.msra.mxu2 %v4328_v9  ;;  %2105 = vmatpush.msra.mxu1 %v4328_v9 }
 0x5a8   :  { %v1423_v57 = vadd.f32 %v1422_v55, %v1379_v53  ;;  %v1691_v5 = vadd.f32 %v4397_v52, %v1690_v56 }
 0x5a9   :  { %1992 = vmatpush.msra.mxu2 %v4333_v23  ;;  %2106 = vmatpush.msra.mxu1 %v4333_v23 }
 0x5aa   :  { %v3126_v16 = vmul.f32 -1.442695, %v1423_v57  ;;  %v1698_v20 = vrot.slane %v1691_v5, 2  ;;  %v1699_v22 = vrot.slane %v1691_v5, 4  ;;  %v1700_v34 = vrot.slane %v1691_v5, 6 }
 0x5ab   :  { %1710 = vst.msk [vmem:[#allocation4] sm:$0x3] %vm349_vm2, %v1691_v5  ;;  %1993 = vmatpush.msra.mxu2 %v4338_v58  ;;  %2107 = vmatpush.msra.mxu1 %v4338_v58 }
 0x5ac   :  { %v3296_v24 = vpop.eup %3295  ;;  %3297 = vpow2.f32 %v3126_v16  ;;  %1711 = vst.msk [vmem:[#allocation4 + $0x2] sm:$0x3] %vm349_vm2, %v1698_v20 }
 0x5ad   :  { %v1449_v25 = vadd.f32 1.0, %v3296_v24  ;;  %1712 = vst.msk [vmem:[#allocation4 + $0x4] sm:$0x3] %vm349_vm2, %v1699_v22  ;;  %v1614_v35 = vpop.f32.mrf.mxu3  ;;  %1994 = vmatpush.msra.mxu2 %v4340_v62  ;;  %2108 = vmatpush.msra.mxu1 %v4340_v62  ;;  %v4458_v22 = vld [vmem:[#allocation20] ss:$0 sm:$0xff] }
 0x5ae   :  { %1713 = vst.msk [vmem:[#allocation4 + $0x6] sm:$0x3] %vm349_vm2, %v1700_v34  ;;  %v1615_v26 = vadd.f32 %v4401_v13, %v1614_v35  ;;  %v1762_v34 = vpop.f32.mrf.mxu1 }
 0x5af   :  { %3299 = vrcp.f32 %v1449_v25  ;;  %v1461_v32 = vand.u32 2147483648, %v1449_v25  ;;  %vm1455_vm8 = vweird.f32 %v1449_v25  ;;  %v1459_v36 = vand.u32 2147483647, %v1449_v25 }
 0x5b0   :  { %v1622_v12 = vrot.slane %v1615_v26, 2  ;;  %v1623_v54 = vrot.slane %v1615_v26, 4  ;;  %v1624_v60 = vrot.slane %v1615_v26, 6  ;;  %1634 = vst.msk [vmem:[#allocation3] sm:$0x3] %vm349_vm2, %v1615_v26  ;;  %v1763_v24 = vadd.f32 %v4458_v22, %v1762_v34 }
 0x5b1   :  { %v1462_v7 = vor.u32 1.1754944e-38, %v1461_v32  ;;  %vm1460_vm10 = vcmp.eq.f32.partialorder %v1459_v36, 8.507059e+37 }
 0x5b2   :  { %v3298_v59 = vpop.eup %3297  ;;  %1635 = vst.msk [vmem:[#allocation3 + $0x2] sm:$0x3] %vm349_vm2, %v1622_v12 }
 0x5b3   :  { %v1427_v61 = vadd.f32 1.0, %v3298_v59  ;;  %1636 = vst.msk [vmem:[#allocation3 + $0x4] sm:$0x3] %vm349_vm2, %v1623_v54 }
 0x5b4   :  { %1637 = vst.msk [vmem:[#allocation3 + $0x6] sm:$0x3] %vm349_vm2, %v1624_v60 }
 0x5b5   :  { %3301 = vrcp.f32 %v1427_v61  ;;  %v3300_v3 = vpop.eup %3299  ;;  %v1439_v63 = vand.u32 2147483648, %v1427_v61  ;;  %v1437_v14 = vand.u32 2147483647, %v1427_v61  ;;  %vm1433_vm4 = vweird.f32 %v1427_v61 }
 0x5b6   :  { %v1451_v40 = vmul.f32 %v3300_v3, %v1449_v25  ;;  %vm1456_vm7 = vweird.f32 %v3300_v3  ;;  %v4461_v25 = vld [vmem:[#allocation20 + $0x1] ss:$0 sm:$0xff] }
 0x5b7   :  { %v1440_v21 = vor.u32 1.1754944e-38, %v1439_v63  ;;  %vm1438_vm6 = vcmp.eq.f32.partialorder %v1437_v14, 8.507059e+37  ;;  %vm1457_vm9 = vmor %vm1455_vm8, %vm1456_vm7  ;;  %v1832_v12 = vld [vmem:[#allocation3] sm:$0x3] }
 0x5b8   :  { %v1452_v8 = vsub.f32 1.0, %v1451_v40 }
 0x5ba   :  { %v1453_v15 = vmul.f32 %v3300_v3, %v1452_v8 }
 0x5bb   :  { %v3302_v4 = vpop.eup %3301 }
 0x5bc   :  { %v1429_v6 = vmul.f32 %v3302_v4, %v1427_v61  ;;  %vm1434_vm3 = vweird.f32 %v3302_v4  ;;  %v1454_v28 = vadd.f32 %v3300_v3, %v1453_v15 }
 0x5bd   :  { %vm1435_vm5 = vmor %vm1433_vm4, %vm1434_vm3 }
 0x5be   :  { %v1430_v10 = vsub.f32 1.0, %v1429_v6  ;;  %v1458_v48 = vsel %vm1457_vm9, %v3300_v3, %v1454_v28 }
 0x5bf   :  { %v1463_v50 = vsel %vm1460_vm10, %v1462_v7, %v1458_v48 }
 0x5c0   :  { %v1431_v11 = vmul.f32 %v3302_v4, %v1430_v10  ;;  %v1470_v51 = vsub.f32 1.0, %v1463_v50  ;;  %v1472_v55 = vmul.f32 %v1463_v50, %v4351_v37 }
 0x5c2   :  { %v1432_v19 = vadd.f32 %v3302_v4, %v1431_v11 }
 0x5c4   :  { %v1436_v17 = vsel %vm1435_vm5, %v3302_v4, %v1432_v19 }
 0x5c5   :  { %v1441_v29 = vsel %vm1438_vm6, %v1440_v21, %v1436_v17 }
 0x5c6   :  { %v1467_v33 = vmul.f32 %v1441_v29, %v1419_v27  ;;  %v4467_v29 = vld [vmem:[#allocation20 + $0x2] ss:$0 sm:$0xff] }
 0x5c8   :  { %v1468_v2 = vadd.f32 %v1467_v33, %v1466_v43 }
 0x5ca   :  { %3303 = vtanh.f32 %v1468_v2 }
 0x5d0   :  { %v3304_v53 = vpop.eup %3303 }
 0x5d1   :  { %v1471_v56 = vmul.f32 %v3304_v53, %v1470_v51 }
 0x5d3   :  { %v1473_v57 = vadd.f32 %v1472_v55, %v1471_v56 }
 0x5d5   :  { %1475 = vst.msk [vmem:[#allocation5 + $0xe] sm:$0x3] %vm349_vm2, %v1473_v57  ;;  %v1853_v57 = vld [vmem:[#allocation4] sm:$0x3] }
 0x5dc   :  { %v1483_v5 = vld [vmem:[#allocation5 + $0xe] sm:$0x3] }
 0x5dd   :  { %1514 = vst [vmem:[#allocation1 + $0x23] ss:$4 sm:$0xff] %v1483_v5 }
 0x5e4   :  { %v1516_v16 = vld.sshfl [vmem:[#allocation1 + $0x20] sm:$0xff pattern:$0x73625140] }
 0x5e5   :  { %3129 = vmatmul.msk.f32.gmra.mxu2 %vm529_vm0, %v1516_v16  ;;  %1584 = vst [vmem:[#allocation1 + $0x20] ss:$4 sm:$0xff] %v4295_v44 }
 0x5e6   :  { %1586 = vst [vmem:[#allocation1 + $0x21] ss:$4 sm:$0xff] %v4312_v31 }
 0x5e7   :  { %1588 = vst [vmem:[#allocation1 + $0x22] ss:$4 sm:$0xff] %v4378_v42 }
 0x5e8   :  { %1590 = vst [vmem:[#allocation1 + $0x23] ss:$4 sm:$0xff] %v1483_v5 }
 0x5ed   :  { %3136 = vmatmul.msk.f32.vlgmr.msrb.gmra.mxu2 %vm529_vm0, %v4374_v41 }
 0x5ee   :  { %2125 = vmatpush.msrb.mxu2 %v4353_v38 }
 0x5ef   :  { %v1592_v37 = vld.sshfl [vmem:[#allocation1 + $0x20] sm:$0xff pattern:$0x73625140] }
 0x5f0   :  { %3131 = vmatmul.msk.f32.gmra.mxu3 %vm529_vm0, %v1592_v37  ;;  %1660 = vst [vmem:[#allocation1 + $0x20] ss:$4 sm:$0xff] %v4295_v44  ;;  %2126 = vmatpush.msrb.mxu2 %v4363_v39  ;;  %v1811_v44 = vld [vmem:[#allocation2] sm:$0x3] }
 0x5f1   :  { %1662 = vst [vmem:[#allocation1 + $0x21] ss:$4 sm:$0xff] %v4312_v31  ;;  %v1812_v35 = vadd.f32 %v1811_v44, %v1763_v24  ;;  %v1785_v31 = vpop.f32.mrf.mxu1 }
 0x5f2   :  { %1664 = vst [vmem:[#allocation1 + $0x22] ss:$4 sm:$0xff] %v4378_v42  ;;  %2127 = vmatpush.msrb.mxu2 %v4368_v30  ;;  %v1786_v42 = vadd.f32 %v4461_v25, %v1785_v31 }
 0x5f3   :  { %1666 = vst [vmem:[#allocation1 + $0x23] ss:$4 sm:$0xff] %v1483_v5  ;;  %v3137_v26 = vmul.f32 -1.442695, %v1812_v35 }
 0x5f4   :  { %2128 = vmatpush.msrb.mxu2 %v4380_v45  ;;  %v1833_v54 = vadd.f32 %v1832_v12, %v1786_v42 }
 0x5f5   :  { %3305 = vpow2.f32 %v3137_v26 }
 0x5f6   :  { %v3138_v60 = vmul.f32 -1.442695, %v1833_v54 }
 0x5f8   :  { %3307 = vpow2.f32 %v3138_v60 }
 0x5fa   :  { %v1668_v20 = vld.sshfl [vmem:[#allocation1 + $0x20] sm:$0xff pattern:$0x73625140] }
 0x5fb   :  { %3133 = vmatmul.msk.f32.gmra.mxu0 %vm529_vm0, %v1668_v20  ;;  %v3306_v59 = vpop.eup %3305 }
 0x5fc   :  { %v1816_v61 = vadd.f32 1.0, %v3306_v59 }
 0x5fe   :  { %v3308_v3 = vpop.eup %3307  ;;  %3309 = vrcp.f32 %v1816_v61  ;;  %v1828_v28 = vand.u32 2147483648, %v1816_v61  ;;  %vm1822_vm12 = vweird.f32 %v1816_v61  ;;  %v1826_v32 = vand.u32 2147483647, %v1816_v61 }
 0x5ff   :  { %v1837_v40 = vadd.f32 1.0, %v3308_v3  ;;  %v1946_v3 = vld [vmem:[#allocation3 + $0x2] sm:$0x3] }
 0x600   :  { %v1829_v43 = vor.u32 1.1754944e-38, %v1828_v28  ;;  %vm1827_vm14 = vcmp.eq.f32.partialorder %v1826_v32, 8.507059e+37 }
 0x601   :  { %3311 = vrcp.f32 %v1837_v40  ;;  %v1849_v50 = vand.u32 2147483648, %v1837_v40  ;;  %vm1843_vm1 = vweird.f32 %v1837_v40  ;;  %v1847_v56 = vand.u32 2147483647, %v1837_v40 }
 0x603   :  { %v1850_v24 = vor.u32 1.1754944e-38, %v1849_v50  ;;  %vm1848_vm4 = vcmp.eq.f32.partialorder %v1847_v56, 8.507059e+37 }
 0x604   :  { %v3310_v4 = vpop.eup %3309 }
 0x605   :  { %v1818_v6 = vmul.f32 %v3310_v4, %v1816_v61  ;;  %vm1823_vm11 = vweird.f32 %v3310_v4 }
 0x606   :  { %vm1824_vm13 = vmor %vm1822_vm12, %vm1823_vm11 }
 0x607   :  { %v3312_v8 = vpop.eup %3311  ;;  %v1819_v10 = vsub.f32 1.0, %v1818_v6 }
 0x608   :  { %v1839_v63 = vmul.f32 %v3312_v8, %v1837_v40  ;;  %vm1844_vm15 = vweird.f32 %v3312_v8 }
 0x609   :  { %v1820_v11 = vmul.f32 %v3310_v4, %v1819_v10  ;;  %vm1845_vm3 = vmor %vm1843_vm1, %vm1844_vm15  ;;  %v1925_v10 = vld [vmem:[#allocation2 + $0x2] sm:$0x3] }
 0x60a   :  { %v1840_v18 = vsub.f32 1.0, %v1839_v63 }
 0x60b   :  { %v1821_v17 = vadd.f32 %v3310_v4, %v1820_v11 }
 0x60c   :  { %v1841_v33 = vmul.f32 %v3312_v8, %v1840_v18 }
 0x60e   :  { %v1842_v7 = vadd.f32 %v3312_v8, %v1841_v33 }
 0x610   :  { %v1846_v34 = vsel %vm1845_vm3, %v3312_v8, %v1842_v7 }
 0x611   :  { %v1851_v35 = vsel %vm1848_vm4, %v1850_v24, %v1846_v34 }
 0x612   :  { %v1857_v12 = vsub.f32 1.0, %v1851_v35  ;;  %v1859_v59 = vmul.f32 %v1851_v35, %v4374_v41 }
 0x668   :  { %v1541_v14 = vpop.f32.mrf.mxu2 }
 0x669   :  { %v1542_v15 = vadd.f32 %v4321_v49, %v1541_v14  ;;  %v1825_v49 = vsel %vm1824_vm13, %v3310_v4, %v1821_v17 }
 0x66a   :  { %v1830_v48 = vsel %vm1827_vm14, %v1829_v43, %v1825_v49 }
 0x66b   :  { %v1549_v19 = vrot.slane %v1542_v15, 2  ;;  %v1550_v21 = vrot.slane %v1542_v15, 4  ;;  %v1551_v27 = vrot.slane %v1542_v15, 6  ;;  %1562 = vst.msk [vmem:[#allocation2 + $0x8] sm:$0x3] %vm349_vm2, %v1542_v15 }
 0x66d   :  { %1563 = vst.msk [vmem:[#allocation2 + $0xa] sm:$0x3] %vm349_vm2, %v1549_v19 }
 0x66e   :  { %1564 = vst.msk [vmem:[#allocation2 + $0xc] sm:$0x3] %vm349_vm2, %v1550_v21 }
 0x66f   :  { %1565 = vst.msk [vmem:[#allocation2 + $0xe] sm:$0x3] %vm349_vm2, %v1551_v27 }
 0x670   :  { %v1808_v36 = vpop.f32.mrf.mxu2 }
 0x671   :  { %v1809_v2 = vadd.f32 %v4467_v29, %v1808_v36 }
 0x673   :  { %v1617_v51 = vpop.f32.mrf.mxu3  ;;  %v1854_v53 = vmul.f32 %v1830_v48, %v1809_v2 }
 0x674   :  { %v1618_v55 = vadd.f32 %v4401_v13, %v1617_v51 }
 0x675   :  { %v1855_v5 = vadd.f32 %v1854_v53, %v1853_v57 }
 0x676   :  { %v1625_v16 = vrot.slane %v1618_v55, 2  ;;  %v1626_v37 = vrot.slane %v1618_v55, 4  ;;  %v1627_v20 = vrot.slane %v1618_v55, 6  ;;  %1638 = vst.msk [vmem:[#allocation3 + $0x8] sm:$0x3] %vm349_vm2, %v1618_v55 }
 0x677   :  { %3313 = vtanh.f32 %v1855_v5 }
 0x678   :  { %1639 = vst.msk [vmem:[#allocation3 + $0xa] sm:$0x3] %vm349_vm2, %v1625_v16  ;;  %v1693_v44 = vpop.f32.mrf.mxu0 }
 0x679   :  { %1640 = vst.msk [vmem:[#allocation3 + $0xc] sm:$0x3] %vm349_vm2, %v1626_v37  ;;  %v1694_v13 = vadd.f32 %v4397_v52, %v1693_v44  ;;  %v1967_v37 = vld [vmem:[#allocation4 + $0x2] sm:$0x3] }
 0x67a   :  { %1641 = vst.msk [vmem:[#allocation3 + $0xe] sm:$0x3] %vm349_vm2, %v1627_v20 }
 0x67b   :  { %v1701_v31 = vrot.slane %v1694_v13, 2  ;;  %v1702_v42 = vrot.slane %v1694_v13, 4  ;;  %v1703_v26 = vrot.slane %v1694_v13, 6  ;;  %1714 = vst.msk [vmem:[#allocation4 + $0x8] sm:$0x3] %vm349_vm2, %v1694_v13 }
 0x67d   :  { %v3314_v54 = vpop.eup %3313  ;;  %1715 = vst.msk [vmem:[#allocation4 + $0xa] sm:$0x3] %vm349_vm2, %v1701_v31 }
 0x67e   :  { %v1858_v60 = vmul.f32 %v3314_v54, %v1857_v12  ;;  %1716 = vst.msk [vmem:[#allocation4 + $0xc] sm:$0x3] %vm349_vm2, %v1702_v42 }
 0x67f   :  { %1717 = vst.msk [vmem:[#allocation4 + $0xe] sm:$0x3] %vm349_vm2, %v1703_v26 }
 0x680   :  { %v4483_v61 = vadd.f32 %v1859_v59, %v1858_v60 }
 0x682   :  { %1861 = vst.msk [vmem:[#allocation5] sm:$0x3] %vm349_vm2, %v4483_v61  ;;  %3139 = vmatmul.msk.f32.vlgmr.msra.gmra.mxu3 %vm529_vm0, %v4483_v61  ;;  %3140 = vmatmul.msk.f32.vlgmr.msra.gmra.mxu0 %vm529_vm0, %v4483_v61 }
 0x683   :  { %3141 = vmatmul.msk.f32.vlgmr.msrb.gmra.mxu1 %vm529_vm0, %v4483_v61  ;;  %2145 = vmatpush.msra.mxu3 %v4412_v1 }
 0x684   :  { %2219 = vmatpush.msra.mxu0 %v4328_v9  ;;  %2239 = vmatpush.msrb.mxu1 %v4353_v38 }
 0x685   :  { %2146 = vmatpush.msra.mxu3 %v4418_v46 }
 0x686   :  { %2220 = vmatpush.msra.mxu0 %v4333_v23  ;;  %2240 = vmatpush.msrb.mxu1 %v4363_v39 }
 0x687   :  { %2147 = vmatpush.msra.mxu3 %v4420_v47 }
 0x688   :  { %2221 = vmatpush.msra.mxu0 %v4338_v58  ;;  %2241 = vmatpush.msrb.mxu1 %v4368_v30 }
 0x689   :  { %2148 = vmatpush.msra.mxu3 %v4424_v0 }
 0x68a   :  { %2222 = vmatpush.msra.mxu0 %v4340_v62  ;;  %2242 = vmatpush.msrb.mxu1 %v4380_v45 }
 0x6ff   :  { %v1902_v41 = vpop.f32.mrf.mxu0 }
 0x700   :  { %v1903_v52 = vadd.f32 %v4461_v25, %v1902_v41  ;;  %v1922_v48 = vpop.f32.mrf.mxu1  ;;  %v2060_v41 = vld [vmem:[#allocation3 + $0x4] sm:$0x3] }
 0x701   :  { %v1923_v51 = vadd.f32 %v4467_v29, %v1922_v48 }
 0x702   :  { %v1947_v40 = vadd.f32 %v1946_v3, %v1903_v52 }
 0x704   :  { %v3143_v4 = vmul.f32 -1.442695, %v1947_v40 }
 0x705   :  { %v1882_v6 = vpop.f32.mrf.mxu3 }
 0x706   :  { %3315 = vpow2.f32 %v3143_v4  ;;  %v1883_v8 = vadd.f32 %v4458_v22, %v1882_v6 }
 0x708   :  { %v1926_v63 = vadd.f32 %v1925_v10, %v1883_v8 }
 0x70a   :  { %v3142_v11 = vmul.f32 -1.442695, %v1926_v63 }
 0x70c   :  { %v3316_v14 = vpop.eup %3315  ;;  %3317 = vpow2.f32 %v3142_v11 }
 0x70d   :  { %v1951_v15 = vadd.f32 1.0, %v3316_v14 }
 0x70f   :  { %3319 = vrcp.f32 %v1951_v15  ;;  %v1963_v57 = vand.u32 2147483648, %v1951_v15  ;;  %vm1957_vm10 = vweird.f32 %v1951_v15  ;;  %v1961_v16 = vand.u32 2147483647, %v1951_v15 }
 0x711   :  { %v1964_v24 = vor.u32 1.1754944e-38, %v1963_v57  ;;  %vm1962_vm12 = vcmp.eq.f32.partialorder %v1961_v16, 8.507059e+37 }
 0x712   :  { %v3318_v18 = vpop.eup %3317 }
 0x713   :  { %v1930_v19 = vadd.f32 1.0, %v3318_v18 }
 0x715   :  { %3321 = vrcp.f32 %v1930_v19  ;;  %v3320_v21 = vpop.eup %3319  ;;  %v1942_v49 = vand.u32 2147483648, %v1930_v19  ;;  %v1940_v43 = vand.u32 2147483647, %v1930_v19  ;;  %vm1936_vm6 = vweird.f32 %v1930_v19 }
 0x716   :  { %v1953_v27 = vmul.f32 %v3320_v21, %v1951_v15  ;;  %vm1958_vm9 = vweird.f32 %v3320_v21 }
 0x717   :  { %v1943_v50 = vor.u32 1.1754944e-38, %v1942_v49  ;;  %vm1941_vm8 = vcmp.eq.f32.partialorder %v1940_v43, 8.507059e+37  ;;  %vm1959_vm11 = vmor %vm1957_vm10, %vm1958_vm9 }
 0x718   :  { %v1954_v32 = vsub.f32 1.0, %v1953_v27 }
 0x71a   :  { %v1955_v2 = vmul.f32 %v3320_v21, %v1954_v32 }
 0x71b   :  { %v3322_v17 = vpop.eup %3321 }
 0x71c   :  { %v1932_v28 = vmul.f32 %v3322_v17, %v1930_v19  ;;  %vm1937_vm5 = vweird.f32 %v3322_v17  ;;  %v1956_v56 = vadd.f32 %v3320_v21, %v1955_v2 }
 0x71d   :  { %vm1938_vm7 = vmor %vm1936_vm6, %vm1937_vm5 }
 0x71e   :  { %v1933_v33 = vsub.f32 1.0, %v1932_v28  ;;  %v1960_v34 = vsel %vm1959_vm11, %v3320_v21, %v1956_v56 }
 0x71f   :  { %v1965_v44 = vsel %vm1962_vm12, %v1964_v24, %v1960_v34 }
 0x720   :  { %v1934_v36 = vmul.f32 %v3322_v17, %v1933_v33  ;;  %v1971_v35 = vsub.f32 1.0, %v1965_v44  ;;  %v1973_v42 = vmul.f32 %v1965_v44, %v4483_v61  ;;  %v2039_v61 = vld [vmem:[#allocation2 + $0x4] sm:$0x3] }
 0x722   :  { %v1935_v7 = vadd.f32 %v3322_v17, %v1934_v36 }
 0x724   :  { %v1939_v53 = vsel %vm1938_vm7, %v3322_v17, %v1935_v7 }
 0x725   :  { %v1944_v55 = vsel %vm1941_vm8, %v1943_v50, %v1939_v53 }
 0x726   :  { %v1968_v5 = vmul.f32 %v1944_v55, %v1923_v51  ;;  %v2081_v55 = vld [vmem:[#allocation4 + $0x4] sm:$0x3] }
 0x728   :  { %v1969_v20 = vadd.f32 %v1968_v5, %v1967_v37 }
 0x72a   :  { %3323 = vtanh.f32 %v1969_v20 }
 0x730   :  { %v3324_v13 = vpop.eup %3323 }
 0x731   :  { %v1972_v31 = vmul.f32 %v3324_v13, %v1971_v35  ;;  %v2153_v13 = vld [vmem:[#allocation2 + $0x6] sm:$0x3] }
 0x733   :  { %v4509_v26 = vadd.f32 %v1973_v42, %v1972_v31 }
 0x735   :  { %1975 = vst.msk [vmem:[#allocation5 + $0x2] sm:$0x3] %vm349_vm2, %v4509_v26  ;;  %3144 = vmatmul.msk.f32.vlgmr.msra.gmra.mxu2 %vm529_vm0, %v4509_v26  ;;  %3145 = vmatmul.msk.f32.vlgmr.msrb.gmra.mxu3 %vm529_vm0, %v4509_v26 }
 0x736   :  { %3146 = vmatmul.msk.f32.vlgmr.msrb.gmra.mxu0 %vm529_vm0, %v4509_v26  ;;  %2259 = vmatpush.msra.mxu2 %v4412_v1 }
 0x737   :  { %2333 = vmatpush.msrb.mxu3 %v4328_v9  ;;  %2353 = vmatpush.msrb.mxu0 %v4353_v38 }
 0x738   :  { %2260 = vmatpush.msra.mxu2 %v4418_v46 }
 0x739   :  { %2334 = vmatpush.msrb.mxu3 %v4333_v23  ;;  %2354 = vmatpush.msrb.mxu0 %v4363_v39 }
 0x73a   :  { %2261 = vmatpush.msra.mxu2 %v4420_v47 }
 0x73b   :  { %2335 = vmatpush.msrb.mxu3 %v4338_v58  ;;  %2355 = vmatpush.msrb.mxu0 %v4368_v30 }
 0x73c   :  { %2262 = vmatpush.msra.mxu2 %v4424_v0 }
 0x73d   :  { %2336 = vmatpush.msrb.mxu3 %v4340_v62  ;;  %2356 = vmatpush.msrb.mxu0 %v4380_v45 }
 0x7b3   :  { %v2036_v32 = vpop.f32.mrf.mxu0 }
 0x7b4   :  { %v2037_v43 = vadd.f32 %v4467_v29, %v2036_v32 }
 0x7b8   :  { %v1996_v12 = vpop.f32.mrf.mxu2  ;;  %v2016_v54 = vpop.f32.mrf.mxu3 }
 0x7b9   :  { %v1997_v60 = vadd.f32 %v4458_v22, %v1996_v12  ;;  %v2017_v59 = vadd.f32 %v4461_v25, %v2016_v54  ;;  %v2174_v12 = vld [vmem:[#allocation3 + $0x6] sm:$0x3] }
 0x7bb   :  { %v2040_v52 = vadd.f32 %v2039_v61, %v1997_v60  ;;  %v2061_v3 = vadd.f32 %v2060_v41, %v2017_v59 }
 0x7bd   :  { %v3147_v40 = vmul.f32 -1.442695, %v2040_v52  ;;  %v3148_v4 = vmul.f32 -1.442695, %v2061_v3 }
 0x7bf   :  { %3325 = vpow2.f32 %v3147_v40 }
 0x7c0   :  { %3327 = vpow2.f32 %v3148_v4 }
 0x7c5   :  { %v3326_v6 = vpop.eup %3325 }
 0x7c6   :  { %v3328_v8 = vpop.eup %3327  ;;  %v2044_v10 = vadd.f32 1.0, %v3326_v6 }
 0x7c7   :  { %v2065_v63 = vadd.f32 1.0, %v3328_v8 }
 0x7c8   :  { %3329 = vrcp.f32 %v2044_v10  ;;  %v2056_v21 = vand.u32 2147483648, %v2044_v10  ;;  %v2054_v28 = vand.u32 2147483647, %v2044_v10  ;;  %vm2050_vm14 = vweird.f32 %v2044_v10 }
 0x7c9   :  { %3331 = vrcp.f32 %v2065_v63  ;;  %v2077_v51 = vand.u32 2147483648, %v2065_v63  ;;  %vm2071_vm4 = vweird.f32 %v2065_v63  ;;  %v2075_v53 = vand.u32 2147483647, %v2065_v63 }
 0x7ca   :  { %v2057_v36 = vor.u32 1.1754944e-38, %v2056_v21  ;;  %vm2055_vm1 = vcmp.eq.f32.partialorder %v2054_v28, 8.507059e+37 }
 0x7cb   :  { %v2078_v5 = vor.u32 1.1754944e-38, %v2077_v51  ;;  %vm2076_vm6 = vcmp.eq.f32.partialorder %v2075_v53, 8.507059e+37 }
 0x7ce   :  { %v3330_v11 = vpop.eup %3329 }
 0x7cf   :  { %v3332_v14 = vpop.eup %3331  ;;  %v2046_v15 = vmul.f32 %v3330_v11, %v2044_v10  ;;  %vm2051_vm13 = vweird.f32 %v3330_v11 }
 0x7d0   :  { %v2067_v18 = vmul.f32 %v3332_v14, %v2065_v63  ;;  %vm2052_vm15 = vmor %vm2050_vm14, %vm2051_vm13  ;;  %vm2072_vm3 = vweird.f32 %v3332_v14 }
 0x7d1   :  { %v2047_v19 = vsub.f32 1.0, %v2046_v15  ;;  %vm2073_vm5 = vmor %vm2071_vm4, %vm2072_vm3 }
 0x7d2   :  { %v2068_v27 = vsub.f32 1.0, %v2067_v18 }
 0x7d3   :  { %v2048_v17 = vmul.f32 %v3330_v11, %v2047_v19 }
 0x7d4   :  { %v2069_v33 = vmul.f32 %v3332_v14, %v2068_v27 }
 0x7d5   :  { %v2049_v49 = vadd.f32 %v3330_v11, %v2048_v17 }
 0x7d6   :  { %v2070_v7 = vadd.f32 %v3332_v14, %v2069_v33 }
 0x7d7   :  { %v2053_v2 = vsel %vm2052_vm15, %v3330_v11, %v2049_v49  ;;  %v2195_v49 = vld [vmem:[#allocation4 + $0x6] sm:$0x3] }
 0x7d8   :  { %v2058_v48 = vsel %vm2055_vm1, %v2057_v36, %v2053_v2  ;;  %v2074_v57 = vsel %vm2073_vm5, %v3332_v14, %v2070_v7 }
 0x7d9   :  { %v2082_v50 = vmul.f32 %v2058_v48, %v2037_v43  ;;  %v2079_v16 = vsel %vm2076_vm6, %v2078_v5, %v2074_v57  ;;  %v3400_v57 = vld [vmem:[#allocation17 + $0x18] sm:$0xff]  ;;  %v3401_v5 = vld [vmem:[#allocation17 + $0x10] sm:$0xff] }
 0x7da   :  { %v2085_v37 = vsub.f32 1.0, %v2079_v16  ;;  %v2087_v24 = vmul.f32 %v2079_v16, %v4509_v26  ;;  %v3402_v16 = vld [vmem:[#allocation17 + $0x8] sm:$0xff] }
 0x7db   :  { %v2083_v56 = vadd.f32 %v2082_v50, %v2081_v55 }
 0x7dd   :  { %3333 = vtanh.f32 %v2083_v56 }
 0x7e3   :  { %v3334_v20 = vpop.eup %3333 }
 0x7e4   :  { %v2086_v34 = vmul.f32 %v3334_v20, %v2085_v37 }
 0x7e6   :  { %v4535_v44 = vadd.f32 %v2087_v24, %v2086_v34  ;;  %v2267_v24 = vld [vmem:[#allocation2 + $0x8] sm:$0x3] }
 0x7e8   :  { %2089 = vst.msk [vmem:[#allocation5 + $0x4] sm:$0x3] %vm349_vm2, %v4535_v44  ;;  %3149 = vmatmul.msk.f32.vlgmr.msra.gmra.mxu1 %vm529_vm0, %v4535_v44  ;;  %3150 = vmatmul.msk.f32.vlgmr.msrb.gmra.mxu2 %vm529_vm0, %v4535_v44 }
 0x7e9   :  { %3151 = vmatmul.msk.f32.vlgmr.msra.gmra.mxu3 %vm529_vm0, %v4535_v44  ;;  %2373 = vmatpush.msra.mxu1 %v4412_v1 }
 0x7ea   :  { %2447 = vmatpush.msrb.mxu2 %v4328_v9  ;;  %2467 = vmatpush.msra.mxu3 %v4353_v38 }
 0x7eb   :  { %2374 = vmatpush.msra.mxu1 %v4418_v46 }
 0x7ec   :  { %2448 = vmatpush.msrb.mxu2 %v4333_v23  ;;  %2468 = vmatpush.msra.mxu3 %v4363_v39 }
 0x7ed   :  { %2375 = vmatpush.msra.mxu1 %v4420_v47 }
 0x7ee   :  { %2449 = vmatpush.msrb.mxu2 %v4338_v58  ;;  %2469 = vmatpush.msra.mxu3 %v4368_v30 }
 0x7ef   :  { %2376 = vmatpush.msra.mxu1 %v4424_v0 }
 0x7f0   :  { %2450 = vmatpush.msrb.mxu2 %v4340_v62  ;;  %2470 = vmatpush.msra.mxu3 %v4380_v45 }
 0x865   :  { %v2110_v9 = vpop.f32.mrf.mxu1 }
 0x866   :  { %v2111_v35 = vadd.f32 %v4458_v22, %v2110_v9 }
 0x868   :  { %v2154_v31 = vadd.f32 %v2153_v13, %v2111_v35 }
 0x86a   :  { %v3152_v23 = vmul.f32 -1.442695, %v2154_v31 }
 0x86b   :  { %v2130_v42 = vpop.f32.mrf.mxu2 }
 0x86c   :  { %3335 = vpow2.f32 %v3152_v23  ;;  %v2131_v26 = vadd.f32 %v4461_v25, %v2130_v42  ;;  %v2150_v63 = vpop.f32.mrf.mxu3 }
 0x86d   :  { %v2151_v19 = vadd.f32 %v4467_v29, %v2150_v63 }
 0x86e   :  { %v2175_v58 = vadd.f32 %v2174_v12, %v2131_v26 }
 0x870   :  { %v3153_v54 = vmul.f32 -1.442695, %v2175_v58 }
 0x872   :  { %v3336_v60 = vpop.eup %3335  ;;  %3337 = vpow2.f32 %v3153_v54 }
 0x873   :  { %v2158_v59 = vadd.f32 1.0, %v3336_v60 }
 0x875   :  { %3339 = vrcp.f32 %v2158_v59  ;;  %v2170_v4 = vand.u32 2147483648, %v2158_v59  ;;  %v2168_v8 = vand.u32 2147483647, %v2158_v59  ;;  %vm2164_vm8 = vweird.f32 %v2158_v59 }
 0x877   :  { %v2171_v15 = vor.u32 1.1754944e-38, %v2170_v4  ;;  %vm2169_vm10 = vcmp.eq.f32.partialorder %v2168_v8, 8.507059e+37 }
 0x878   :  { %v3338_v61 = vpop.eup %3337 }
 0x879   :  { %v2179_v41 = vadd.f32 1.0, %v3338_v61 }
 0x87b   :  { %v3340_v52 = vpop.eup %3339  ;;  %3341 = vrcp.f32 %v2179_v41  ;;  %v2191_v28 = vand.u32 2147483648, %v2179_v41  ;;  %v2189_v33 = vand.u32 2147483647, %v2179_v41  ;;  %vm2185_vm12 = vweird.f32 %v2179_v41 }
 0x87c   :  { %v2160_v3 = vmul.f32 %v3340_v52, %v2158_v59  ;;  %vm2165_vm7 = vweird.f32 %v3340_v52 }
 0x87d   :  { %vm2166_vm9 = vmor %vm2164_vm8, %vm2165_vm7  ;;  %v2192_v2 = vor.u32 1.1754944e-38, %v2191_v28  ;;  %vm2190_vm14 = vcmp.eq.f32.partialorder %v2189_v33, 8.507059e+37 }
 0x87e   :  { %v2161_v40 = vsub.f32 1.0, %v2160_v3 }
 0x880   :  { %v2162_v6 = vmul.f32 %v3340_v52, %v2161_v40 }
 0x881   :  { %v3342_v10 = vpop.eup %3341 }
 0x882   :  { %v2181_v11 = vmul.f32 %v3342_v10, %v2179_v41  ;;  %v2163_v14 = vadd.f32 %v3340_v52, %v2162_v6  ;;  %vm2186_vm11 = vweird.f32 %v3342_v10 }
 0x883   :  { %vm2187_vm13 = vmor %vm2185_vm12, %vm2186_vm11 }
 0x884   :  { %v2182_v18 = vsub.f32 1.0, %v2181_v11  ;;  %v2167_v21 = vsel %vm2166_vm9, %v3340_v52, %v2163_v14 }
 0x885   :  { %v2172_v27 = vsel %vm2169_vm10, %v2171_v15, %v2167_v21  ;;  %v2309_v15 = vld [vmem:[#allocation4 + $0x8] sm:$0x3] }
 0x886   :  { %v2183_v17 = vmul.f32 %v3342_v10, %v2182_v18  ;;  %v2196_v32 = vmul.f32 %v2172_v27, %v2151_v19 }
 0x888   :  { %v2184_v36 = vadd.f32 %v3342_v10, %v2183_v17  ;;  %v2197_v43 = vadd.f32 %v2196_v32, %v2195_v49 }
 0x88a   :  { %v2188_v48 = vsel %vm2187_vm13, %v3342_v10, %v2184_v36  ;;  %3343 = vtanh.f32 %v2197_v43 }
 0x88b   :  { %v2193_v7 = vsel %vm2190_vm14, %v2192_v2, %v2188_v48  ;;  %v2402_v2 = vld [vmem:[#allocation3 + $0xa] sm:$0x3] }
 0x88c   :  { %v2199_v50 = vsub.f32 1.0, %v2193_v7  ;;  %v2201_v55 = vmul.f32 %v2193_v7, %v4535_v44 }
 0x890   :  { %v3344_v51 = vpop.eup %3343 }
 0x891   :  { %v2200_v53 = vmul.f32 %v3344_v51, %v2199_v50 }
 0x893   :  { %v4561_v56 = vadd.f32 %v2201_v55, %v2200_v53  ;;  %v2381_v53 = vld [vmem:[#allocation2 + $0xa] sm:$0x3] }
 0x895   :  { %2203 = vst.msk [vmem:[#allocation5 + $0x6] sm:$0x3] %vm349_vm2, %v4561_v56  ;;  %3154 = vmatmul.msk.f32.vlgmr.msra.gmra.mxu0 %vm529_vm0, %v4561_v56  ;;  %3155 = vmatmul.msk.f32.vlgmr.msrb.gmra.mxu1 %vm529_vm0, %v4561_v56 }
 0x896   :  { %3156 = vmatmul.msk.f32.vlgmr.msra.gmra.mxu2 %vm529_vm0, %v4561_v56  ;;  %2487 = vmatpush.msra.mxu0 %v4412_v1 }
 0x897   :  { %2561 = vmatpush.msrb.mxu1 %v3400_v57  ;;  %2581 = vmatpush.msra.mxu2 %v4353_v38 }
 0x898   :  { %2488 = vmatpush.msra.mxu0 %v4418_v46 }
 0x899   :  { %2562 = vmatpush.msrb.mxu1 %v3401_v5  ;;  %2582 = vmatpush.msra.mxu2 %v4363_v39  ;;  %v2288_v39 = vld [vmem:[#allocation3 + $0x8] sm:$0x3] }
 0x89a   :  { %2489 = vmatpush.msra.mxu0 %v4420_v47 }
 0x89b   :  { %2563 = vmatpush.msrb.mxu1 %v3402_v16  ;;  %2583 = vmatpush.msra.mxu2 %v4368_v30 }
 0x89c   :  { %2490 = vmatpush.msra.mxu0 %v4424_v0 }
 0x89d   :  { %2564 = vmatpush.msrb.mxu1 %v4340_v62  ;;  %2584 = vmatpush.msra.mxu2 %v4380_v45 }
 0x912   :  { %v2224_v37 = vpop.f32.mrf.mxu0  ;;  %v2244_v38 = vpop.f32.mrf.mxu1 }
 0x913   :  { %v2225_v20 = vadd.f32 %v4458_v22, %v2224_v37  ;;  %v2245_v34 = vadd.f32 %v4461_v25, %v2244_v38 }
 0x915   :  { %v2268_v44 = vadd.f32 %v2267_v24, %v2225_v20  ;;  %v2289_v9 = vadd.f32 %v2288_v39, %v2245_v34 }
 0x917   :  { %v3157_v35 = vmul.f32 -1.442695, %v2268_v44  ;;  %v3158_v13 = vmul.f32 -1.442695, %v2289_v9 }
 0x919   :  { %3345 = vpow2.f32 %v3157_v35  ;;  %v2264_v52 = vpop.f32.mrf.mxu2 }
 0x91a   :  { %3347 = vpow2.f32 %v3158_v13  ;;  %v2265_v4 = vadd.f32 %v4467_v29, %v2264_v52 }
 0x91f   :  { %v3346_v30 = vpop.eup %3345 }
 0x920   :  { %v3348_v31 = vpop.eup %3347  ;;  %v2272_v23 = vadd.f32 1.0, %v3346_v30 }
 0x921   :  { %v2293_v62 = vadd.f32 1.0, %v3348_v31 }
 0x922   :  { %3349 = vrcp.f32 %v2272_v23  ;;  %v2284_v60 = vand.u32 2147483648, %v2272_v23  ;;  %v2282_v61 = vand.u32 2147483647, %v2272_v23  ;;  %vm2278_vm1 = vweird.f32 %v2272_v23 }
 0x923   :  { %3351 = vrcp.f32 %v2293_v62  ;;  %v2305_v63 = vand.u32 2147483648, %v2293_v62  ;;  %vm2299_vm6 = vweird.f32 %v2293_v62  ;;  %v2303_v14 = vand.u32 2147483647, %v2293_v62 }
 0x924   :  { %v2285_v40 = vor.u32 1.1754944e-38, %v2284_v60  ;;  %vm2283_vm4 = vcmp.eq.f32.partialorder %v2282_v61, 8.507059e+37 }
 0x925   :  { %v2306_v21 = vor.u32 1.1754944e-38, %v2305_v63  ;;  %vm2304_vm8 = vcmp.eq.f32.partialorder %v2303_v14, 8.507059e+37  ;;  %v2495_v63 = vld [vmem:[#allocation2 + $0xc] sm:$0x3] }
 0x928   :  { %v3350_v45 = vpop.eup %3349 }
 0x929   :  { %v3352_v42 = vpop.eup %3351  ;;  %v2274_v26 = vmul.f32 %v3350_v45, %v2272_v23  ;;  %vm2279_vm15 = vweird.f32 %v3350_v45 }
 0x92a   :  { %v2295_v12 = vmul.f32 %v3352_v42, %v2293_v62  ;;  %vm2280_vm3 = vmor %vm2278_vm1, %vm2279_vm15  ;;  %vm2300_vm5 = vweird.f32 %v3352_v42 }
 0x92b   :  { %v2275_v58 = vsub.f32 1.0, %v2274_v26  ;;  %vm2301_vm7 = vmor %vm2299_vm6, %vm2300_vm5 }
 0x92c   :  { %v2296_v54 = vsub.f32 1.0, %v2295_v12  ;;  %v2423_v12 = vld [vmem:[#allocation4 + $0xa] sm:$0x3] }
 0x92d   :  { %v2276_v59 = vmul.f32 %v3350_v45, %v2275_v58 }
 0x92e   :  { %v2297_v41 = vmul.f32 %v3352_v42, %v2296_v54 }
 0x92f   :  { %v2277_v3 = vadd.f32 %v3350_v45, %v2276_v59 }
 0x930   :  { %v2298_v10 = vadd.f32 %v3352_v42, %v2297_v41 }
 0x931   :  { %v2281_v6 = vsel %vm2280_vm3, %v3350_v45, %v2277_v3 }
 0x932   :  { %v2286_v8 = vsel %vm2283_vm4, %v2285_v40, %v2281_v6  ;;  %v2302_v19 = vsel %vm2301_vm7, %v3352_v42, %v2298_v10 }
 0x933   :  { %v2310_v11 = vmul.f32 %v2286_v8, %v2265_v4  ;;  %v2307_v27 = vsel %vm2304_vm8, %v2306_v21, %v2302_v19 }
 0x934   :  { %v2313_v17 = vsub.f32 1.0, %v2307_v27  ;;  %v2315_v33 = vmul.f32 %v2307_v27, %v4561_v56 }
 0x935   :  { %v2311_v18 = vadd.f32 %v2310_v11, %v2309_v15  ;;  %v2516_v11 = vld [vmem:[#allocation3 + $0xc] sm:$0x3] }
 0x937   :  { %3353 = vtanh.f32 %v2311_v18 }
 0x93d   :  { %v3354_v28 = vpop.eup %3353 }
 0x93e   :  { %v2314_v32 = vmul.f32 %v3354_v28, %v2313_v17 }
 0x940   :  { %v4584_v49 = vadd.f32 %v2315_v33, %v2314_v32 }
 0x942   :  { %2317 = vst.msk [vmem:[#allocation5 + $0x8] sm:$0x3] %vm349_vm2, %v4584_v49  ;;  %3159 = vmatmul.msk.f32.vlgmr.msrb.gmra.mxu3 %vm529_vm0, %v4584_v49  ;;  %3160 = vmatmul.msk.f32.vlgmr.msrb.gmra.mxu0 %vm529_vm0, %v4584_v49 }
 0x943   :  { %3161 = vmatmul.msk.f32.vlgmr.msra.gmra.mxu1 %vm529_vm0, %v4584_v49  ;;  %2601 = vmatpush.msrb.mxu3 %v4412_v1 }
 0x945   :  { %2602 = vmatpush.msrb.mxu3 %v4418_v46 }
 0x947   :  { %2603 = vmatpush.msrb.mxu3 %v4420_v47 }
 0x949   :  { %2604 = vmatpush.msrb.mxu3 %v4424_v0 }
 0x9bf   :  { %v2358_v36 = vpop.f32.mrf.mxu0 }
 0x9c0   :  { %v2359_v43 = vadd.f32 %v4461_v25, %v2358_v36  ;;  %v2378_v9 = vpop.f32.mrf.mxu1 }
 0x9c1   :  { %v2379_v30 = vadd.f32 %v4467_v29, %v2378_v9 }
 0x9c2   :  { %v2403_v48 = vadd.f32 %v2402_v2, %v2359_v43 }
 0x9c4   :  { %v3163_v7 = vmul.f32 -1.442695, %v2403_v48 }
 0x9c5   :  { %v2338_v50 = vpop.f32.mrf.mxu3 }
 0x9c6   :  { %3355 = vpow2.f32 %v3163_v7  ;;  %v2339_v51 = vadd.f32 %v4458_v22, %v2338_v50 }
 0x9c8   :  { %v2382_v55 = vadd.f32 %v2381_v53, %v2339_v51 }
 0x9ca   :  { %v3162_v56 = vmul.f32 -1.442695, %v2382_v55 }
 0x9cc   :  { %v3356_v1 = vpop.eup %3355  ;;  %3357 = vpow2.f32 %v3162_v56 }
 0x9cd   :  { %v2407_v46 = vadd.f32 1.0, %v3356_v1 }
 0x9cf   :  { %3359 = vrcp.f32 %v2407_v46  ;;  %v2419_v45 = vand.u32 2147483648, %v2407_v46  ;;  %vm2413_vm14 = vweird.f32 %v2407_v46  ;;  %v2417_v26 = vand.u32 2147483647, %v2407_v46 }
 0x9d1   :  { %v2420_v60 = vor.u32 1.1754944e-38, %v2419_v45  ;;  %vm2418_vm1 = vcmp.eq.f32.partialorder %v2417_v26, 8.507059e+37  ;;  %v3403_v45 = vld [vmem:[#allocation20 + $0x1] ss:$0 sm:$0xff]  ;;  %v2630_v26 = vld [vmem:[#allocation3 + $0xe] sm:$0x3] }
 0x9d2   :  { %v3358_v47 = vpop.eup %3357 }
 0x9d3   :  { %v2386_v57 = vadd.f32 1.0, %v3358_v47 }
 0x9d5   :  { %3361 = vrcp.f32 %v2386_v57  ;;  %v3360_v0 = vpop.eup %3359  ;;  %v2398_v34 = vand.u32 2147483648, %v2386_v57  ;;  %v2396_v39 = vand.u32 2147483647, %v2386_v57  ;;  %vm2392_vm10 = vweird.f32 %v2386_v57 }
 0x9d6   :  { %v2409_v5 = vmul.f32 %v3360_v0, %v2407_v46  ;;  %vm2414_vm13 = vweird.f32 %v3360_v0 }
 0x9d7   :  { %v2399_v13 = vor.u32 1.1754944e-38, %v2398_v34  ;;  %vm2397_vm12 = vcmp.eq.f32.partialorder %v2396_v39, 8.507059e+37  ;;  %vm2415_vm15 = vmor %vm2413_vm14, %vm2414_vm13 }
 0x9d8   :  { %v2410_v38 = vsub.f32 1.0, %v2409_v5 }
 0x9da   :  { %v2411_v44 = vmul.f32 %v3360_v0, %v2410_v38 }
 0x9db   :  { %v3362_v16 = vpop.eup %3361 }
 0x9dc   :  { %v2388_v37 = vmul.f32 %v3362_v16, %v2386_v57  ;;  %vm2393_vm9 = vweird.f32 %v3362_v16  ;;  %v2412_v62 = vadd.f32 %v3360_v0, %v2411_v44 }
 0x9dd   :  { %vm2394_vm11 = vmor %vm2392_vm10, %vm2393_vm9 }
 0x9de   :  { %v2389_v20 = vsub.f32 1.0, %v2388_v37  ;;  %v2416_v54 = vsel %vm2415_vm15, %v3360_v0, %v2412_v62 }
 0x9df   :  { %v2421_v59 = vsel %vm2418_vm1, %v2420_v60, %v2416_v54  ;;  %v2712_v54 = vld [vmem:[#allocation21 + $0x18] sm:$0xff]  ;;  %v2711_v60 = vld [vmem:[#allocation21 + $0x10] sm:$0xff] }
 0x9e0   :  { %v2390_v24 = vmul.f32 %v3362_v16, %v2389_v20  ;;  %v2427_v61 = vsub.f32 1.0, %v2421_v59  ;;  %v2429_v3 = vmul.f32 %v2421_v59, %v4584_v49  ;;  %2732 = vmatpush.msrb.mxu0 %v2712_v54 }
 0x9e2   :  { %v2391_v35 = vadd.f32 %v3362_v16, %v2390_v24  ;;  %2733 = vmatpush.msrb.mxu0 %v2711_v60 }
 0x9e4   :  { %v2395_v31 = vsel %vm2394_vm11, %v3362_v16, %v2391_v35  ;;  %v2537_v16 = vld [vmem:[#allocation4 + $0xc] sm:$0x3] }
 0x9e5   :  { %v2400_v23 = vsel %vm2397_vm12, %v2399_v13, %v2395_v31 }
 0x9e6   :  { %v2424_v42 = vmul.f32 %v2400_v23, %v2379_v30  ;;  %v2609_v30 = vld [vmem:[#allocation2 + $0xe] sm:$0x3] }
 0x9e8   :  { %v2425_v58 = vadd.f32 %v2424_v42, %v2423_v12 }
 0x9ea   :  { %3363 = vtanh.f32 %v2425_v58 }
 0x9f0   :  { %v3364_v41 = vpop.eup %3363 }
 0x9f1   :  { %v2428_v52 = vmul.f32 %v3364_v41, %v2427_v61  ;;  %v2710_v41 = vld [vmem:[#allocation21 + $0x8] sm:$0xff] }
 0x9f2   :  { %2734 = vmatpush.msrb.mxu0 %v2710_v41 }
 0x9f3   :  { %v2430_v40 = vadd.f32 %v2429_v3, %v2428_v52  ;;  %v2709_v52 = vld [vmem:[#allocation21] sm:$0xff]  ;;  %v2780_v3 = vld [vmem:[#allocation24 + $0x18] sm:$0xff] }
 0x9f4   :  { %2735 = vmatpush.msrb.mxu0 %v2709_v52 }
 0x9f5   :  { %2431 = vst.msk [vmem:[#allocation5 + $0xa] sm:$0x3] %vm349_vm2, %v2430_v40  ;;  %3164 = vmatmul.msk.f32.vlgmr.msrb.gmra.mxu2 %vm529_vm0, %v2430_v40  ;;  %3165 = vmatmul.msk.f32.vlgmr.msra.gmra.mxu3 %vm529_vm0, %v2430_v40 }
 0x9f6   :  { %3166 = vmatmul.msk.f32.vlgmr.msra.gmra.mxu0 %vm529_vm0, %v2430_v40  ;;  %2797 = vmatpush.msrb.mxu2 %v2780_v3 }
 0xa73   :  { %v2492_v50 = vpop.f32.mrf.mxu0 }
 0xa74   :  { %v2493_v56 = vadd.f32 %v4467_v29, %v2492_v50 }
 0xa78   :  { %v2452_v4 = vpop.f32.mrf.mxu2  ;;  %v2472_v6 = vpop.f32.mrf.mxu3 }
 0xa79   :  { %v2453_v8 = vadd.f32 %v4458_v22, %v2452_v4  ;;  %v2473_v10 = vadd.f32 %v4461_v25, %v2472_v6  ;;  %v2779_v4 = vld [vmem:[#allocation24 + $0x10] sm:$0xff]  ;;  %v2741_v6 = vld [vmem:[#allocation23 + $0x8] sm:$0xff] }
 0xa7a   :  { %2798 = vmatpush.msrb.mxu2 %v2779_v4 }
 0xa7b   :  { %v2496_v14 = vadd.f32 %v2495_v63, %v2453_v8  ;;  %v2517_v15 = vadd.f32 %v2516_v11, %v2473_v10  ;;  %v2778_v10 = vld [vmem:[#allocation24 + $0x8] sm:$0xff]  ;;  %v2740_v11 = vld [vmem:[#allocation23] sm:$0xff] }
 0xa7c   :  { %2799 = vmatpush.msrb.mxu2 %v2778_v10 }
 0xa7d   :  { %v3167_v18 = vmul.f32 -1.442695, %v2496_v14  ;;  %v3168_v19 = vmul.f32 -1.442695, %v2517_v15  ;;  %v2777_v14 = vld [vmem:[#allocation24] sm:$0xff] }
 0xa7e   :  { %2800 = vmatpush.msrb.mxu2 %v2777_v14 }
 0xa7f   :  { %3365 = vpow2.f32 %v3167_v18 }
 0xa80   :  { %3367 = vpow2.f32 %v3168_v19 }
 0xa85   :  { %v3366_v21 = vpop.eup %3365 }
 0xa86   :  { %v3368_v27 = vpop.eup %3367  ;;  %v2500_v17 = vadd.f32 1.0, %v3366_v21 }
 0xa87   :  { %v2521_v28 = vadd.f32 1.0, %v3368_v27 }
 0xa88   :  { %3369 = vrcp.f32 %v2500_v17  ;;  %v2512_v25 = vand.u32 2147483648, %v2500_v17  ;;  %v2510_v7 = vand.u32 2147483647, %v2500_v17  ;;  %vm2506_vm4 = vweird.f32 %v2500_v17 }
 0xa89   :  { %3371 = vrcp.f32 %v2521_v28  ;;  %v2533_v0 = vand.u32 2147483648, %v2521_v28  ;;  %vm2527_vm8 = vweird.f32 %v2521_v28  ;;  %v2531_v5 = vand.u32 2147483647, %v2521_v28 }
 0xa8a   :  { %v2513_v55 = vor.u32 1.1754944e-38, %v2512_v25  ;;  %vm2511_vm6 = vcmp.eq.f32.partialorder %v2510_v7, 8.507059e+37  ;;  %v3404_v25 = vld [vmem:[#allocation20 + $0x2] ss:$0 sm:$0xff] }
 0xa8b   :  { %v2534_v20 = vor.u32 1.1754944e-38, %v2533_v0  ;;  %vm2532_vm10 = vcmp.eq.f32.partialorder %v2531_v5, 8.507059e+37 }
 0xa8e   :  { %v3370_v32 = vpop.eup %3369 }
 0xa8f   :  { %v3372_v33 = vpop.eup %3371  ;;  %v2502_v49 = vmul.f32 %v3370_v32, %v2500_v17  ;;  %vm2507_vm3 = vweird.f32 %v3370_v32 }
 0xa90   :  { %v2523_v36 = vmul.f32 %v3372_v33, %v2521_v28  ;;  %vm2508_vm5 = vmor %vm2506_vm4, %vm2507_vm3  ;;  %vm2528_vm7 = vweird.f32 %v3372_v33 }
 0xa91   :  { %v2503_v43 = vsub.f32 1.0, %v2502_v49  ;;  %vm2529_vm9 = vmor %vm2527_vm8, %vm2528_vm7 }
 0xa92   :  { %v2524_v2 = vsub.f32 1.0, %v2523_v36 }
 0xa93   :  { %v2504_v48 = vmul.f32 %v3370_v32, %v2503_v43 }
 0xa94   :  { %v2525_v51 = vmul.f32 %v3372_v33, %v2524_v2 }
 0xa95   :  { %v2505_v53 = vadd.f32 %v3370_v32, %v2504_v48 }
 0xa96   :  { %v2526_v47 = vadd.f32 %v3372_v33, %v2525_v51 }
 0xa97   :  { %v2509_v1 = vsel %vm2508_vm5, %v3370_v32, %v2505_v53  ;;  %vm2669_vm5 = vcmask 1047556  }
 0xa98   :  { %v2514_v46 = vsel %vm2511_vm6, %v2513_v55, %v2509_v1  ;;  %v2530_v38 = vsel %vm2529_vm9, %v3372_v33, %v2526_v47  ;;  %vm2871_vm6 = vcmask 60416  }
 0xa99   :  { %v2538_v57 = vmul.f32 %v2514_v46, %v2493_v56  ;;  %v2535_v34 = vsel %vm2532_vm10, %v2534_v20, %v2530_v38  ;;  %v2651_v56 = vld [vmem:[#allocation4 + $0xe] sm:$0x3]  ;;  %v2663_v20 = vld [vmem:[#allocation5 + $0x6] sm:$0x3] }
 0xa9a   :  { %v2541_v24 = vsub.f32 1.0, %v2535_v34  ;;  %v2543_v44 = vmul.f32 %v2535_v34, %v2430_v40  ;;  %v2742_v40 = vld [vmem:[#allocation23 + $0x10] sm:$0xff] }
 0xa9b   :  { %v2539_v37 = vadd.f32 %v2538_v57, %v2537_v16 }
 0xa9d   :  { %3373 = vtanh.f32 %v2539_v37 }
 0xaa3   :  { %v3374_v39 = vpop.eup %3373 }
 0xaa4   :  { %v2542_v29 = vmul.f32 %v3374_v39, %v2541_v24  ;;  %v2675_v24 = vrot.slane %v2663_v20, 4  ;;  %v3802_v39 = vmov 1983009808  }
 0xaa6   :  { %v4609_v9 = vadd.f32 %v2543_v44, %v2542_v29  ;;  %v2672_v29 = vunpack.c.l.s4 %v3802_v39  ;;  %v2661_v44 = vld [vmem:[#allocation5 + $0x2] sm:$0x3] }
 0xaa8   :  { %2545 = vst.msk [vmem:[#allocation5 + $0xc] sm:$0x3] %vm349_vm2, %v4609_v9  ;;  %3169 = vmatmul.msk.f32.vlgmr.msrb.gmra.mxu1 %vm529_vm0, %v4609_v9  ;;  %3170 = vmatmul.msk.f32.vlgmr.msra.gmra.mxu2 %vm529_vm0, %v4609_v9 }
 0xaa9   :  { %3171 = vmatmul.msk.f32.vlgmr.msrb.gmra.mxu3 %vm529_vm0, %v4609_v9 }
 0xb25   :  { %v2566_v35 = vpop.f32.mrf.mxu1 }
 0xb26   :  { %v2567_v13 = vadd.f32 %v4458_v22, %v2566_v35  ;;  %v2743_v22 = vld [vmem:[#allocation23 + $0x18] sm:$0xff]  ;;  %v2662_v35 = vld [vmem:[#allocation5 + $0x4] sm:$0x3] }
 0xb27   :  { %2766 = vmatpush.msra.mxu1 %v2743_v22 }
 0xb28   :  { %v2610_v31 = vadd.f32 %v2609_v30, %v2567_v13  ;;  %v2666_v13 = vld [vmem:[#allocation5 + $0xc] sm:$0x3]  ;;  %v2676_v30 = vsel %vm2669_vm5, %v2675_v24, %v2661_v44 }
 0xb29   :  { %2767 = vmatpush.msra.mxu1 %v2742_v40 }
 0xb2a   :  { %v3172_v23 = vmul.f32 -1.442695, %v2610_v31  ;;  %v2673_v31 = vunpack.c.0.s8 %v2672_v29 }
 0xb2b   :  { %v2586_v62 = vpop.f32.mrf.mxu2  ;;  %2768 = vmatpush.msra.mxu1 %v2741_v6 }
 0xb2c   :  { %3375 = vpow2.f32 %v3172_v23  ;;  %v2587_v42 = vadd.f32 %v3403_v45, %v2586_v62  ;;  %v2606_v32 = vpop.f32.mrf.mxu3  ;;  %v2668_v23 = vrot.slane %v2662_v35, 4  ;;  %v2681_v62 = vrot.slane %v2666_v13, 4 }
 0xb2d   :  { %2769 = vmatpush.msra.mxu1 %v2740_v11  ;;  %v2607_v2 = vadd.f32 %v3404_v25, %v2606_v32  ;;  %v4641_v32 = vld [vmem:[%s4696_s18] sm:$0xf] }
 0xb2e   :  { %v2631_v12 = vadd.f32 %v2630_v26, %v2587_v42  ;;  %v2660_v26 = vld [vmem:[#allocation5] sm:$0x3] }
 0xb2f   :  { %v2670_v54 = vsel %vm2669_vm5, %v2668_v23, %v2660_v26 }
 0xb30   :  { %v3173_v58 = vmul.f32 -1.442695, %v2631_v12  ;;  %v2664_v12 = vld [vmem:[#allocation5 + $0x8] sm:$0x3]  ;;  %v2674_v3 = vperm.slane %v2670_v54, %v2673_v31 }
 0xb31   :  { %v2682_v60 = vsel %vm2669_vm5, %v2681_v62, %v2664_v12 }
 0xb32   :  { %v3376_v59 = vpop.eup %3375  ;;  %3377 = vpow2.f32 %v3173_v58  ;;  %v2665_v58 = vld [vmem:[#allocation5 + $0xa] sm:$0x3]  ;;  %v2686_v40 = vperm.slane %v2682_v60, %v2673_v31 }
 0xb33   :  { %v2614_v61 = vadd.f32 1.0, %v3376_v59 }
 0xb35   :  { %3379 = vrcp.f32 %v2614_v61  ;;  %v2626_v21 = vand.u32 2147483648, %v2614_v61  ;;  %v2624_v17 = vand.u32 2147483647, %v2614_v61  ;;  %vm2620_vm12 = vweird.f32 %v2614_v61 }
 0xb37   :  { %v2627_v36 = vor.u32 1.1754944e-38, %v2626_v21  ;;  %vm2625_vm14 = vcmp.eq.f32.partialorder %v2624_v17, 8.507059e+37  ;;  %v3221_v21 = vld [vmem:[%s4691_s13] ss:$0 sm:$0xff] }
 0xb38   :  { %v3378_v8 = vpop.eup %3377 }
 0xb39   :  { %v2635_v63 = vadd.f32 1.0, %v3378_v8 }
 0xb3b   :  { %v3380_v15 = vpop.eup %3379  ;;  %3381 = vrcp.f32 %v2635_v63  ;;  %v2647_v51 = vand.u32 2147483648, %v2635_v63  ;;  %v2645_v55 = vand.u32 2147483647, %v2635_v63  ;;  %vm2641_vm1 = vweird.f32 %v2635_v63 }
 0xb3c   :  { %v2616_v18 = vmul.f32 %v3380_v15, %v2614_v61  ;;  %vm2621_vm11 = vweird.f32 %v3380_v15  ;;  %v3803_v61 = vmov 1934713408  }
 0xb3d   :  { %vm2622_vm13 = vmor %vm2620_vm12, %vm2621_vm11  ;;  %v2648_v47 = vor.u32 1.1754944e-38, %v2647_v51  ;;  %vm2646_vm4 = vcmp.eq.f32.partialorder %v2645_v55, 8.507059e+37  ;;  %v2696_v41 = vunpack.c.l.s4 %v3803_v61  ;;  %vm2920_vm11 = vcmask 64512  }
 0xb3e   :  { %v2617_v19 = vsub.f32 1.0, %v2616_v18 }
 0xb3f   :  { %v2697_v6 = vunpack.c.0.s8 %v2696_v41 }
 0xb40   :  { %v2618_v27 = vmul.f32 %v3380_v15, %v2617_v19 }
 0xb41   :  { %v3382_v28 = vpop.eup %3381 }
 0xb42   :  { %v2637_v33 = vmul.f32 %v3382_v28, %v2635_v63  ;;  %v2619_v49 = vadd.f32 %v3380_v15, %v2618_v27  ;;  %vm2642_vm15 = vweird.f32 %v3382_v28 }
 0xb43   :  { %vm2643_vm3 = vmor %vm2641_vm1, %vm2642_vm15  ;;  %vm2994_vm1 = vcmask 1041409  }
 0xb44   :  { %v2638_v43 = vsub.f32 1.0, %v2637_v33  ;;  %v2623_v48 = vsel %vm2622_vm13, %v3380_v15, %v2619_v49  ;;  %v3222_v33 = vld [vmem:[%s4692_s14] ss:$0 sm:$0xff]  ;;  %s3804_s14 = smov [#allocation28]  }
 0xb45   :  { %v2628_v7 = vsel %vm2625_vm14, %v2627_v36, %v2623_v48 }
 0xb46   :  { %v2639_v50 = vmul.f32 %v3382_v28, %v2638_v43  ;;  %v2652_v53 = vmul.f32 %v2628_v7, %v2607_v2  ;;  %v3223_v2 = vld [vmem:[%s4693_s15] ss:$0 sm:$0xff]  ;;  %s3057_s15 = sshll.u32 %s3804_s14, 4  ;;  %s3058_s15 = int_to_ptr.vmem [resolvable:$true] %s3057_s15 }
 0xb48   :  { %v2640_v1 = vadd.f32 %v3382_v28, %v2639_v50  ;;  %v2653_v46 = vadd.f32 %v2652_v53, %v2651_v56 }
 0xb4a   :  { %v2644_v57 = vsel %vm2643_vm3, %v3382_v28, %v2640_v1  ;;  %3383 = vtanh.f32 %v2653_v46  ;;  %vm3039_vm3 = vcmask 58368  }
 0xb4b   :  { %v2649_v0 = vsel %vm2646_vm4, %v2648_v47, %v2644_v57  ;;  %vm2969_vm4 = vcmask 257024  }
 0xb4c   :  { %v2655_v5 = vsub.f32 1.0, %v2649_v0  ;;  %v2657_v38 = vmul.f32 %v2649_v0, %v4609_v9  ;;  %v2680_v9 = vperm.slane %v2676_v30, %v2673_v31 }
 0xb4e   :  { %v2693_v22 = vrot.slane %v2680_v9, 4 }
 0xb50   :  { %v3384_v16 = vpop.eup %3383  ;;  %v2694_v8 = vsel %vm2669_vm5, %v2693_v22, %v2674_v3 }
 0xb51   :  { %v2656_v37 = vmul.f32 %v3384_v16, %v2655_v5  ;;  %v2698_v11 = vperm.slane %v2694_v8, %v2697_v6 }
 0xb53   :  { %v2658_v34 = vadd.f32 %v2657_v38, %v2656_v37  ;;  %v2707_v18 = vrot.slane %v2698_v11, 4 }
 0xb55   :  { %2659 = vst.msk [vmem:[#allocation5 + $0xe] sm:$0x3] %vm349_vm2, %v2658_v34  ;;  %3174 = vmatmul.msk.f32.vlgmr.msrb.gmra.mxu0 %vm529_vm0, %v2658_v34 }
 0xb5c   :  { %v2667_v45 = vld [vmem:[#allocation5 + $0xe] sm:$0x3] }
 0xb5d   :  { %v2687_v42 = vrot.slane %v2667_v45, 4 }
 0xb5f   :  { %v2688_v59 = vsel %vm2669_vm5, %v2687_v42, %v2665_v58 }
 0xb60   :  { %v2692_v52 = vperm.slane %v2688_v59, %v2673_v31 }
 0xb62   :  { %v2699_v4 = vrot.slane %v2692_v52, 4 }
 0xb64   :  { %v2700_v10 = vsel %vm2669_vm5, %v2699_v4, %v2686_v40 }
 0xb65   :  { %v2704_v63 = vperm.slane %v2700_v10, %v2697_v6 }
 0xb67   :  { %v2705_v14 = vrot.slane %v2704_v63, 4  ;;  %v2708_v19 = vsel %vm2669_vm5, %v2704_v63, %v2707_v18 }
 0xb69   :  { %v2706_v15 = vsel %vm2669_vm5, %v2705_v14, %v2698_v11 }
 0xb6a   :  { %3175 = vmatmul.msk.f32.vlgmr.msra.gmra.mxu1 %vm529_vm0, %v2706_v15  ;;  %3177 = vmatmul.msk.f32.vlgmr.msrb.gmra.mxu2 %vm529_vm0, %v2706_v15 }
 0xb72   :  { %3176 = vmatmul.msk.f32.gmra.mxu1 %vm529_vm0, %v2708_v19  ;;  %3178 = vmatmul.msk.f32.gmra.mxu2 %vm529_vm0, %v2708_v19 }
 0xbd2   :  { %v2737_v27 = vpop.f32.mrf.mxu0 }
 0xbd3   :  { %v2738_v17 = vadd.f32 %v3221_v21, %v2737_v27 }
 0xbd5   :  { %v2811_v28 = vperm.slane %v2738_v17, 0  ;;  %v2810_v49 = vrot.slane %v2738_v17, 1 }
 0xbd7   :  { %v2815_v36 = vmul.f32 %v2811_v28, %v4641_v32  ;;  %v2812_v48 = vperm.slane %v2810_v49, 0 }
 0xbd9   :  { %v2817_v7 = vmul.f32 0.35355338, %v2815_v36  ;;  %v2816_v53 = vmul.f32 %v2812_v48, %v4641_v32 }
 0xbdb   :  { %v2818_v1 = vmul.f32 0.35355338, %v2816_v53  ;;  %v2985_v53 = vld [vmem:[#allocation26 + $0x8] sm:$0xff] }
 0xbe7   :  { %v2771_v43 = vpop.f32.mrf.mxu1 }
 0xbe8   :  { %v2772_v25 = vadd.f32 %v3222_v33, %v2771_v43 }
 0xbea   :  { %3179 = vmatpush.xpose.msk.msra.mxu3 %vm529_vm0, %v2772_v25 }
 0xbed   :  { %v2802_v50 = vpop.f32.mrf.mxu2  ;;  %3180 = vmatmul.msk.f32.vlgmr.msra.gmra.mxu3 %vm529_vm0, %v2817_v7 }
 0xbee   :  { %v2803_v51 = vadd.f32 %v3223_v2, %v2802_v50  ;;  %v2987_v50 = vld [vmem:[#allocation26 + $0x18] sm:$0xff] }
 0xbef   :  { %v2774_v55 = vpop.f32.mrf.mxu1  ;;  %3010 = vmatpush.msrb.mxu1 %v2987_v50 }
 0xbf0   :  { %v2775_v56 = vadd.f32 %v3222_v33, %v2774_v55  ;;  %2939 = vmatpush.msrb.mxu3 %v2803_v51  ;;  %v2986_v51 = vld [vmem:[#allocation26 + $0x10] sm:$0xff]  ;;  %v2984_v55 = vld [vmem:[#allocation26] sm:$0xff] }
 0xbf1   :  { %3011 = vmatpush.msrb.mxu1 %v2986_v51 }
 0xbf2   :  { %3181 = vmatpush.xpose.msk.msra.mxu0 %vm529_vm0, %v2775_v56 }
 0xbf3   :  { %3012 = vmatpush.msrb.mxu1 %v2985_v53 }
 0xbf5   :  { %v2805_v46 = vpop.f32.mrf.mxu2  ;;  %3182 = vmatmul.msk.f32.vlgmr.msra.gmra.mxu0 %vm529_vm0, %v2818_v1  ;;  %3013 = vmatpush.msrb.mxu1 %v2984_v55 }
 0xbf6   :  { %v2806_v47 = vadd.f32 %v3223_v2, %v2805_v46 }
 0xbf8   :  { %2962 = vmatpush.msrb.mxu0 %v2806_v47 }
 0xc70   :  { %v2842_v57 = vpop.f32.mrf.mxu3 }
 0xc71   :  { %v2872_v0 = vsel %vm2871_vm6, %v2842_v57, -inf }
 0xc72   :  { %2873 = vmax.xlane.f32.xlu0 %v2872_v0  ;;  %v2868_v5 = vpop.f32.mrf.mxu0 }
 0xc73   :  { %v2875_v16 = vsel %vm2871_vm6, %v2868_v5, -inf }
 0xc7a   :  { %2876 = vmax.xlane.f32.xlu0 %v2875_v16 }
 0xce5   :  { %v2874_v37 = vpop.xlane.xlu0 %2873 }
 0xce6   :  { %v2878_v38 = vsub.f32 %v2842_v57, %v2874_v37 }
 0xce8   :  { %v2880_v20 = vmul.f32 1.442695, %v2878_v38 }
 0xcea   :  { %3385 = vpow2.f32 %v2880_v20 }
 0xced   :  { %v2877_v34 = vpop.xlane.xlu0 %2876 }
 0xcee   :  { %v2879_v24 = vsub.f32 %v2868_v5, %v2877_v34 }
 0xcf0   :  { %v3386_v39 = vpop.eup %3385  ;;  %v2882_v29 = vmul.f32 1.442695, %v2879_v24 }
 0xcf1   :  { %v2884_v44 = vsel %vm2871_vm6, %v3386_v39, 0.0 }
 0xcf2   :  { %3387 = vpow2.f32 %v2882_v29  ;;  %2885 = vadd.xlane.f32.xlu1 %v2884_v44 }
 0xcf8   :  { %v3388_v35 = vpop.eup %3387 }
 0xcf9   :  { %v2887_v13 = vsel %vm2871_vm6, %v3388_v35, 0.0 }
 0xcfa   :  { %2888 = vadd.xlane.f32.xlu1 %v2887_v13 }
 0xd65   :  { %v2886_v30 = vpop.xlane.xlu1 %2885 }
 0xd66   :  { %3389 = vrcp.f32 %v2886_v30  ;;  %v2901_v9 = vand.u32 2147483648, %v2886_v30  ;;  %v2899_v26 = vand.u32 2147483647, %v2886_v30  ;;  %vm2895_vm8 = vweird.f32 %v2886_v30 }
 0xd68   :  { %v2902_v54 = vor.u32 1.1754944e-38, %v2901_v9  ;;  %vm2900_vm10 = vcmp.eq.f32.partialorder %v2899_v26, 8.507059e+37 }
 0xd6c   :  { %v3390_v31 = vpop.eup %3389 }
 0xd6d   :  { %v2891_v23 = vmul.f32 %v3390_v31, %v2886_v30  ;;  %v2889_v62 = vpop.xlane.xlu1 %2888  ;;  %vm2896_vm7 = vweird.f32 %v3390_v31 }
 0xd6e   :  { %3391 = vrcp.f32 %v2889_v62  ;;  %vm2897_vm9 = vmor %vm2895_vm8, %vm2896_vm7  ;;  %v2916_v22 = vand.u32 2147483648, %v2889_v62  ;;  %v2914_v40 = vand.u32 2147483647, %v2889_v62  ;;  %vm2910_vm13 = vweird.f32 %v2889_v62 }
 0xd6f   :  { %v2892_v45 = vsub.f32 1.0, %v2891_v23 }
 0xd70   :  { %v2917_v10 = vor.u32 1.1754944e-38, %v2916_v22  ;;  %vm2915_vm15 = vcmp.eq.f32.partialorder %v2914_v40, 8.507059e+37 }
 0xd71   :  { %v2893_v42 = vmul.f32 %v3390_v31, %v2892_v45 }
 0xd73   :  { %v2894_v12 = vadd.f32 %v3390_v31, %v2893_v42 }
 0xd74   :  { %v3392_v58 = vpop.eup %3391 }
 0xd75   :  { %v2898_v60 = vsel %vm2897_vm9, %v3390_v31, %v2894_v12  ;;  %v2906_v59 = vmul.f32 %v3392_v58, %v2889_v62  ;;  %vm2911_vm12 = vweird.f32 %v3392_v58 }
 0xd76   :  { %v2903_v61 = vsel %vm2900_vm10, %v2902_v54, %v2898_v60  ;;  %vm2912_vm14 = vmor %vm2910_vm13, %vm2911_vm12 }
 0xd77   :  { %v2907_v41 = vsub.f32 1.0, %v2906_v59  ;;  %v2904_v52 = vmul.f32 %v3386_v39, %v2903_v61 }
 0xd79   :  { %v2908_v3 = vmul.f32 %v3392_v58, %v2907_v41  ;;  %3183 = vmatmul.msk.f32.vlgmr.msrb.gmra.mxu3 %vm2920_vm11, %v2904_v52  ;;  %v3019_v4 = vsel %vm2871_vm6, %v2904_v52, 0.0 }
 0xd7a   :  { %v3020_v6 = vrot.slane %v3019_v4, 4 }
 0xd7b   :  { %v2909_v8 = vadd.f32 %v3392_v58, %v2908_v3 }
 0xd7c   :  { %v3021_v63 = vadd.f32 %v3020_v6, %v3019_v4 }
 0xd7d   :  { %v2913_v11 = vsel %vm2912_vm14, %v3392_v58, %v2909_v8 }
 0xd7e   :  { %v2918_v14 = vsel %vm2915_vm15, %v2917_v10, %v2913_v11  ;;  %v3022_v15 = vrot.slane %v3021_v63, 2 }
 0xd7f   :  { %v2919_v18 = vmul.f32 %v3388_v35, %v2918_v14 }
 0xd80   :  { %v3023_v27 = vadd.f32 %v3022_v15, %v3021_v63 }
 0xd81   :  { %v3026_v19 = vsel %vm2871_vm6, %v2919_v18, 0.0  ;;  %3184 = vmatmul.msk.f32.vlgmr.msrb.gmra.mxu0 %vm2920_vm11, %v2919_v18 }
 0xd82   :  { %v3027_v21 = vrot.slane %v3026_v19, 4  ;;  %v3024_v33 = vrot.slane %v3023_v27, 1 }
 0xd84   :  { %v3028_v17 = vadd.f32 %v3027_v21, %v3026_v19  ;;  %v3025_v36 = vadd.f32 %v3024_v33, %v3023_v27 }
 0xd86   :  { %v3029_v28 = vrot.slane %v3028_v17, 2  ;;  %v3033_v2 = vmul.f32 0.25, %v3025_v36 }
 0xd88   :  { %v3030_v49 = vadd.f32 %v3029_v28, %v3028_v17 }
 0xd8a   :  { %v3031_v43 = vrot.slane %v3030_v49, 1 }
 0xd8c   :  { %v3032_v25 = vadd.f32 %v3031_v43, %v3030_v49 }
 0xd8e   :  { %v3034_v48 = vmul.f32 0.25, %v3032_v25 }
 0xd90   :  { %v3037_v7 = vsel %vm2994_vm1, %v3034_v48, %v3033_v2 }
 0xd91   :  { %3040 = vst.msk [vmem:[#allocation28] sm:$0x3] %vm3039_vm3, %v3037_v7 }
 0xd92   :  { %3062 = dma.vmem_to_hbm [thread:$0]  %s3058_s15, 32, %s3060_s6, [#allocation29]  }
 0xdfc   :  { %v2941_v56 = vpop.f32.mrf.mxu3 }
 0xdfd   :  { %v2967_v1 = vmul.f32 %v2941_v56, %v4641_v32 }
 0xdfe   :  { %v2964_v46 = vpop.f32.mrf.mxu0 }
 0xdff   :  { %v2970_v47 = vsel %vm2969_vm4, %v2967_v1, 0.0  ;;  %v2968_v57 = vmul.f32 %v2964_v46, %v4641_v32  ;;  %v3224_v32 = vld [vmem:[%s4695_s17] ss:$0 sm:$0xff] }
 0xe00   :  { %v2971_v0 = vrot.slane %v2970_v47, 4 }
 0xe01   :  { %v2977_v5 = vsel %vm2969_vm4, %v2968_v57, 0.0 }
 0xe02   :  { %v2972_v16 = vadd.f32 %v2971_v0, %v2970_v47  ;;  %v2978_v37 = vrot.slane %v2977_v5, 4 }
 0xe04   :  { %v2973_v38 = vrot.slane %v2972_v16, 2  ;;  %v2979_v20 = vadd.f32 %v2978_v37, %v2977_v5 }
 0xe06   :  { %v2974_v34 = vadd.f32 %v2973_v38, %v2972_v16  ;;  %v2980_v24 = vrot.slane %v2979_v20, 2 }
 0xe08   :  { %v2975_v39 = vrot.slane %v2974_v34, 1  ;;  %v2981_v29 = vadd.f32 %v2980_v24, %v2979_v20 }
 0xe0a   :  { %v2982_v44 = vrot.slane %v2981_v29, 1  ;;  %v2976_v35 = vadd.f32 %v2975_v39, %v2974_v34 }
 0xe0c   :  { %v2983_v13 = vadd.f32 %v2982_v44, %v2981_v29 }
 0xe0e   :  { %v2995_v30 = vsel %vm2994_vm1, %v2983_v13, %v2976_v35 }
 0xe0f   :  { %3185 = vmatmul.msk.f32.vlgmr.msrb.gmra.mxu1 %vm529_vm0, %v2995_v30 }
 0xe8c   :  { %v3015_v31 = vpop.f32.mrf.mxu1 }
 0xe8d   :  { %v3016_v23 = vadd.f32 %v3224_v32, %v3015_v31 }
 0xe8f   :  { %3018 = vst.msk [vmem:[#allocation27] sm:$0x3] %vm349_vm2, %v3016_v23 }
 0xe90   :  { %3051 = dma.vmem_to_hbm [thread:$0]  %s3047_s1, 32, %s3049_s11, [#allocation8]  }
 0xe91   :  { %3779 = dma.done.wait [#allocation8], 32  }
 0xe92   :  { %3780 = vsyncadd [#allocation8], 4294967264 }
 0xe93   :  { %3781 = dma.done.wait [#allocation29], 32  }
 0xe94   :  { %3782 = vsyncadd [#allocation29], 4294967264 }
 0xe95   :  { %3071 = vsyncpa [#allocation7], 1 }
 0xe96   :  { %3072 = vsyncpa [#allocation10], 1 }
 0xe97   :  { %3073 = vsyncpa [#allocation13], 1 }
 0xe98   :  { %3074 = vsyncpa [#allocation16], 1 }
 0xe99   :  { %3075 = vsyncpa [#allocation19], 1 }
 0xe9a   :  { %3076 = vsyncpa [#allocation22], 1 }
 0xe9b   :  { %3077 = vsyncpa [#allocation25], 1 }
 0xe9c   :  { %3078 = vsyncpa [#allocation8], 1 }
 0xe9d   :  { %3079 = vsyncpa [#allocation29], 1 }

</bundles_post_ra>
